<compile_context>
chip_gen: v7x
topology: tpu7x:2x2x1
jax: 0.10.0
libtpu: 0.0.40
codegen_flags: <defaults>
</compile_context>

<pallas_src>
import functools
import math

import jax
import jax.numpy as jnp
from jax import lax
from jax.experimental import pallas as pl
from jax.experimental.pallas import tpu as pltpu

NEG_INF = -1e9      # stands in for -inf in generate_square_subsequent_mask
LN_EPS = 1e-5       # PyTorch LayerNorm default

_COMPILER_PARAMS = pltpu.CompilerParams(
    dimension_semantics=("arbitrary",),
    vmem_limit_bytes=48 * 1024 * 1024)


# ----------------------------- in-kernel helpers -----------------------------

def _layer_norm(x, w, b):
    mu = jnp.mean(x, axis=-1, keepdims=True)
    d = x - mu
    var = jnp.mean(d * d, axis=-1, keepdims=True)
    return d * lax.rsqrt(var + LN_EPS) * w + b


def _softmax(s):
    s = s - jnp.max(s, axis=-1, keepdims=True)
    p = jnp.exp(s)
    # divide -> EUP reciprocal (frees VALU slots)
    return p * pl.reciprocal(jnp.sum(p, axis=-1, keepdims=True), approx=True)


def _mha(q_all, k_all, v_all, w_out, b_out, *, mask, n_heads):
    """Multi-head SDPA over a whole (N, E) slab.

    q_all: (Nq, E) f32 projected queries; k_all/v_all: (Nk, E) f32.
    mask : (Nq, Nk) additive mask (block-diag batch mask [+ causal]).
    w_out: (E, E) bf16 pre-transposed out-projection; b_out: (1, E) f32.
    Returns (Nq, E) f32.
    """
    _, e = q_all.shape
    hd = e // n_heads
    scale = 1.0 / math.sqrt(hd)
    outs = []
    for h in range(n_heads):
        sl = slice(h * hd, (h + 1) * hd)
        q = q_all[:, sl] * scale
        k = k_all[:, sl]
        v = v_all[:, sl]
        s = lax.dot_general(q, k, (((1,), (1,)), ((), ())),
                            preferred_element_type=jnp.float32)
        s = s + mask
        p = _softmax(s)
        outs.append(jnp.dot(p, v, preferred_element_type=jnp.float32))
    # in-register concat of heads along lanes, then ONE (N,E)x(E,E) matmul
    o = jnp.concatenate(outs, axis=-1)
    return jnp.dot(o.astype(jnp.bfloat16), w_out,
                   preferred_element_type=jnp.float32) + b_out


# ------------------------------ encoder kernel ------------------------------

def _encoder_stack_kernel(
        x_ref, pe_ref, dense_w_ref, dense_b_ref, mask_ref,
        qkv_w_ref, qkv_b_ref, ao_w_ref, ao_b_ref,
        ln1_w_ref, ln1_b_ref,
        ff1_w_ref, ff1_b_ref, ff2_w_ref, ff2_b_ref,
        ln2_w_ref, ln2_b_ref,
        fn_w_ref, fn_b_ref,
        o_ref, h_ref,
        *, n_heads):
    i = pl.program_id(0)
    e = h_ref.shape[-1]

    # grid step 0: input embedding (value projection + positional encoding)
    @pl.when(i == 0)
    def _():
        feat = jnp.dot(x_ref[...], dense_w_ref[...],
                       preferred_element_type=jnp.float32) + dense_b_ref[...]
        h_ref[...] = feat + pe_ref[...]

    h = h_ref[...]                                           # (B*L, E) f32
    # fused Q/K/V projection for the whole slab (bf16 in, f32 accumulate)
    qkv = jnp.dot(h.astype(jnp.bfloat16), qkv_w_ref[...],
                  preferred_element_type=jnp.float32) + qkv_b_ref[...]

    attn = _mha(qkv[:, :e], qkv[:, e:2 * e], qkv[:, 2 * e:],
                ao_w_ref[...], ao_b_ref[...],
                mask=mask_ref[...], n_heads=n_heads)
    h1 = _layer_norm(h + attn, ln1_w_ref[...], ln1_b_ref[...])

    f = jnp.dot(h1.astype(jnp.bfloat16), ff1_w_ref[...],
                preferred_element_type=jnp.float32) + ff1_b_ref[...]
    f = jnp.maximum(f, 0.0)
    f = jnp.dot(f.astype(jnp.bfloat16), ff2_w_ref[...],
                preferred_element_type=jnp.float32) + ff2_b_ref[...]
    h2 = _layer_norm(h1 + f, ln2_w_ref[...], ln2_b_ref[...])
    h_ref[...] = h2                                          # one full-slab store

    # final encoder LayerNorm fused into the last grid step
    @pl.when(i == pl.num_programs(0) - 1)
    def _():
        o_ref[...] = _layer_norm(h2, fn_w_ref[...], fn_b_ref[...])


# ------------------------------ decoder kernel ------------------------------

def _decoder_stack_kernel(
        t_ref, pe_ref, dense_w_ref, dense_b_ref, mem_ref,
        sa_mask_ref, ca_mask_ref,
        sa_qkv_w_ref, sa_qkv_b_ref, sa_out_w_ref, sa_out_b_ref,
        ln1_w_ref, ln1_b_ref,
        ca_q_w_ref, ca_q_b_ref, ca_kv_w_ref, ca_kv_b_ref,
        ca_out_w_ref, ca_out_b_ref,
        ln2_w_ref, ln2_b_ref,
        ff1_w_ref, ff1_b_ref, ff2_w_ref, ff2_b_ref,
        ln3_w_ref, ln3_b_ref,
        fn_w_ref, fn_b_ref, fin_w_ref, fin_b_ref,
        o_ref, h_ref,
        *, n_heads):
    i = pl.program_id(0)
    e = h_ref.shape[-1]

    @pl.when(i == 0)
    def _():
        feat = jnp.dot(t_ref[...], dense_w_ref[...],
                       preferred_element_type=jnp.float32) + dense_b_ref[...]
        h_ref[...] = feat + pe_ref[...]

    h = h_ref[...]                                           # (B*Lt, E) f32
    mem_bf = mem_ref[...].astype(jnp.bfloat16)               # (B*Ls, E)

    # decoder self-attention (block-diag + causal mask, built once outside)
    sa_qkv = jnp.dot(h.astype(jnp.bfloat16), sa_qkv_w_ref[...],
                     preferred_element_type=jnp.float32) + sa_qkv_b_ref[...]
    sa = _mha(sa_qkv[:, :e], sa_qkv[:, e:2 * e], sa_qkv[:, 2 * e:],
              sa_out_w_ref[...], sa_out_b_ref[...],
              mask=sa_mask_ref[...], n_heads=n_heads)
    h1 = _layer_norm(h + sa, ln1_w_ref[...], ln1_b_ref[...])

    # cross-attention (block-diag mask over batches)
    mem_kv = jnp.dot(mem_bf, ca_kv_w_ref[...],
                     preferred_element_type=jnp.float32) + ca_kv_b_ref[...]
    q_c = jnp.dot(h1.astype(jnp.bfloat16), ca_q_w_ref[...],
                  preferred_element_type=jnp.float32) + ca_q_b_ref[...]
    ca = _mha(q_c, mem_kv[:, :e], mem_kv[:, e:],
              ca_out_w_ref[...], ca_out_b_ref[...],
              mask=ca_mask_ref[...], n_heads=n_heads)
    h2 = _layer_norm(h1 + ca, ln2_w_ref[...], ln2_b_ref[...])

    # feed-forward
    f = jnp.dot(h2.astype(jnp.bfloat16), ff1_w_ref[...],
                preferred_element_type=jnp.float32) + ff1_b_ref[...]
    f = jnp.maximum(f, 0.0)
    f = jnp.dot(f.astype(jnp.bfloat16), ff2_w_ref[...],
                preferred_element_type=jnp.float32) + ff2_b_ref[...]
    h3 = _layer_norm(h2 + f, ln3_w_ref[...], ln3_b_ref[...])
    h_ref[...] = h3

    # last grid step: final decoder LayerNorm + (E -> 1) head, emitted
    # lane-dense as (1, B*Lt) via a single contraction over E.
    @pl.when(i == pl.num_programs(0) - 1)
    def _():
        hn = _layer_norm(h3, fn_w_ref[...], fn_b_ref[...])
        o_ref[...] = lax.dot_general(
            fin_w_ref[...], hn, (((1,), (1,)), ((), ())),
            preferred_element_type=jnp.float32) + fin_b_ref[...]


# ------------------------------ pallas wrappers ------------------------------

def _shared_spec(a):
    return pl.BlockSpec(a.shape, lambda i: (0, 0))


def _per_layer_spec(a):
    # (n_layers, r, c) stacked weights; grid step i sees layer i's (r, c) slab
    # (layer axis squeezed) — the pipeline prefetches layer i+1 during layer i.
    return pl.BlockSpec((None, a.shape[1], a.shape[2]), lambda i: (i, 0, 0))


def _encoder_stack(params, src_flat, pe_src, dense_w, dense_b, enc_mask, *,
                   n_heads):
    e = dense_w.shape[1]
    n_rows = src_flat.shape[0]
    enc = params["enc"]
    n_layers = enc["qkv_w"].shape[0]

    shared_head = [src_flat, pe_src, dense_w, dense_b, enc_mask]
    layer_arrays = [enc["qkv_w"], enc["qkv_b"], enc["out_w"], enc["out_b"],
                    enc["ln1_w"], enc["ln1_b"],
                    enc["ff1_w"], enc["ff1_b"], enc["ff2_w"], enc["ff2_b"],
                    enc["ln2_w"], enc["ln2_b"]]
    shared_tail = [params["enc_norm_w"], params["enc_norm_b"]]

    kernel = functools.partial(_encoder_stack_kernel, n_heads=n_heads)
    return pl.pallas_call(
        kernel,
        out_shape=jax.ShapeDtypeStruct((n_rows, e), jnp.float32),
        grid=(n_layers,),
        in_specs=([_shared_spec(a) for a in shared_head]
                  + [_per_layer_spec(a) for a in layer_arrays]
                  + [_shared_spec(a) for a in shared_tail]),
        out_specs=pl.BlockSpec((n_rows, e), lambda i: (0, 0)),
        scratch_shapes=[pltpu.VMEM((n_rows, e), jnp.float32)],
        compiler_params=_COMPILER_PARAMS,
    )(*shared_head, *layer_arrays, *shared_tail)


def _decoder_stack(params, tgt_flat, pe_tgt, dense_w, dense_b, mem,
                   sa_mask, ca_mask, *, n_heads):
    e = dense_w.shape[1]
    n_rows = tgt_flat.shape[0]
    dec = params["dec"]
    n_layers = dec["sa_qkv_w"].shape[0]

    shared_head = [tgt_flat, pe_tgt, dense_w, dense_b, mem, sa_mask, ca_mask]
    layer_arrays = [dec["sa_qkv_w"], dec["sa_qkv_b"],
                    dec["sa_out_w"], dec["sa_out_b"],
                    dec["ln1_w"], dec["ln1_b"],
                    dec["ca_q_w"], dec["ca_q_b"],
                    dec["ca_kv_w"], dec["ca_kv_b"],
                    dec["ca_out_w"], dec["ca_out_b"],
                    dec["ln2_w"], dec["ln2_b"],
                    dec["ff1_w"], dec["ff1_b"], dec["ff2_w"], dec["ff2_b"],
                    dec["ln3_w"], dec["ln3_b"]]
    shared_tail = [params["dec_norm_w"], params["dec_norm_b"],
                   params["final_w"], params["final_b"]]

    kernel = functools.partial(_decoder_stack_kernel, n_heads=n_heads)
    return pl.pallas_call(
        kernel,
        out_shape=jax.ShapeDtypeStruct((1, n_rows), jnp.float32),  # lane-dense
        grid=(n_layers,),
        in_specs=([_shared_spec(a) for a in shared_head]
                  + [_per_layer_spec(a) for a in layer_arrays]
                  + [_shared_spec(a) for a in shared_tail]),
        out_specs=pl.BlockSpec((1, n_rows), lambda i: (0, 0)),
        scratch_shapes=[pltpu.VMEM((n_rows, e), jnp.float32)],
        compiler_params=_COMPILER_PARAMS,
    )(*shared_head, *layer_arrays, *shared_tail)


# ------------------------------ model forward ------------------------------

def make_positional_encoding(d_model, max_len=5000):
    position = jnp.arange(max_len, dtype=jnp.float32)[:, None]
    div_term = jnp.exp(jnp.arange(0, d_model, 2, dtype=jnp.float32)
                       * (-math.log(10000.0) / d_model))
    ang = position * div_term
    pe = jnp.zeros((max_len, d_model), jnp.float32)
    pe = pe.at[:, 0::2].set(jnp.sin(ang))
    pe = pe.at[:, 1::2].set(jnp.cos(ang))
    return pe


def _block_diag_mask(n_rows, n_cols, row_blk, col_blk, causal=False):
    """Additive mask: 0 where (same batch [and col<=row]), NEG_INF elsewhere."""
    rb = jnp.arange(n_rows) // row_blk
    cb = jnp.arange(n_cols) // col_blk
    keep = rb[:, None] == cb[None, :]
    if causal:
        rt = jnp.arange(n_rows) % row_blk
        ct = jnp.arange(n_cols) % col_blk
        keep = keep & (ct[None, :] <= rt[None, :])
    return jnp.where(keep, 0.0, NEG_INF).astype(jnp.float32)


def simple_transformer_forward(params, x, t, *, n_heads, out_seq_len):
    # x: (B, seq_length+1, n_ts), t: (B, out_seq_len, n_ts)
    b = x.shape[0]
    n_ts = x.shape[2]
    e = params["dense_w"].shape[1]

    src = x[:, :-1, :]
    ls = src.shape[1]
    lt = t.shape[1]

    # pad the tiny feature contraction (n_ts) to a sublane multiple once,
    # outside the kernels; zero weight rows contribute nothing.
    k_pad = max(8, -(-n_ts // 8) * 8)
    dense_w = jnp.zeros((k_pad, e), jnp.float32).at[:n_ts, :].set(params["dense_w"])
    dense_b = params["dense_b"]

    def flat_pad(z):
        zf = z.reshape(z.shape[0] * z.shape[1], n_ts)
        return jnp.pad(zf, ((0, 0), (0, k_pad - n_ts)))

    src_flat = flat_pad(src)                        # (B*Ls, k_pad)
    tgt_flat = flat_pad(t)                          # (B*Lt, k_pad)

    # NOTE: reproduces the upstream quirk — the PE table is indexed by the
    # *batch* dimension (x is still batch-first when SimplePositionalEncoding
    # is applied).
    pe_b = params["pe"][:b]                         # (B, E)
    pe_src = jnp.repeat(pe_b, ls, axis=0)           # (B*Ls, E)
    pe_tgt = jnp.repeat(pe_b, lt, axis=0)           # (B*Lt, E)

    # attention masks built ONCE here (hoisted out of the per-layer body):
    # block-diagonal "same batch" masks fold the batch loop into full-slab
    # matmuls; the decoder self-attn mask additionally carries the causal
    # (square-subsequent) structure.
    enc_mask = _block_diag_mask(b * ls, b * ls, ls, ls)
    sa_mask = _block_diag_mask(b * lt, b * lt, lt, lt, causal=True)
    ca_mask = _block_diag_mask(b * lt, b * ls, lt, ls)

    mem = _encoder_stack(params, src_flat, pe_src, dense_w, dense_b, enc_mask,
                         n_heads=n_heads)                           # (B*Ls, E)
    out = _decoder_stack(params, tgt_flat, pe_tgt, dense_w, dense_b, mem,
                         sa_mask, ca_mask, n_heads=n_heads)         # (1, B*Lt)

    # rows are (batch, time); PyTorch applies .view(-1, out_seq_len) to a
    # time-major (Lt, B, 1) tensor, so reorder to (time, batch) first.
    return out.reshape(b, lt).T.reshape(-1, out_seq_len)


# --------------------------- pure-JAX reference ---------------------------

def reference_forward(params, x, t, *, n_heads, out_seq_len):
    """Plain-XLA reference mirroring the kernel's mixed-precision policy."""
    HI = lax.Precision.HIGHEST
    e = params["dense_w"].shape[1]
    hd = e // n_heads
    bf16 = jnp.bfloat16

    def mm(a, w):   # bf16-input matmul, f32 accumulation (matches kernel MXU path)
        return jnp.einsum("...i,io->...o", a.astype(bf16), w.astype(bf16),
                          preferred_element_type=jnp.float32)

    def ln(z, w, b):
        mu = z.mean(-1, keepdims=True)
        var = ((z - mu) ** 2).mean(-1, keepdims=True)
        return (z - mu) * lax.rsqrt(var + LN_EPS) * w + b

    def feature(z):
        h = jnp.einsum("bln,ne->ble", z, params["dense_w"], precision=HI)
        h = h + params["dense_b"][0]
        return h + params["pe"][:z.shape[0]][:, None, :]

    def attention(q, k, v, w_o, b_o, mask):
        bb, lq, _ = q.shape
        lk = k.shape[1]
        qh = (q * (1.0 / math.sqrt(hd))).reshape(bb, lq, n_heads, hd)
        kh = k.reshape(bb, lk, n_heads, hd)
        vh = v.reshape(bb, lk, n_heads, hd)
        s = jnp.einsum("bqhd,bkhd->bhqk", qh, kh, precision=HI)
        if mask is not None:
            s = s + mask
        p = jax.nn.softmax(s, axis=-1)
        o = jnp.einsum("bhqk,bkhd->bqhd", p, vh, precision=HI).reshape(bb, lq, e)
        return mm(o, w_o) + b_o

    # encoder
    h = feature(x[:, :-1, :])
    enc = params["enc"]
    for i in range(enc["qkv_w"].shape[0]):
        qkv = mm(h, enc["qkv_w"][i]) + enc["qkv_b"][i][0]
        sa = attention(qkv[..., :e], qkv[..., e:2 * e], qkv[..., 2 * e:],
                       enc["out_w"][i], enc["out_b"][i][0], None)
        h1 = ln(h + sa, enc["ln1_w"][i][0], enc["ln1_b"][i][0])
        f = jax.nn.relu(mm(h1, enc["ff1_w"][i]) + enc["ff1_b"][i][0])
        f = mm(f, enc["ff2_w"][i]) + enc["ff2_b"][i][0]
        h = ln(h1 + f, enc["ln2_w"][i][0], enc["ln2_b"][i][0])
    mem = ln(h, params["enc_norm_w"][0], params["enc_norm_b"][0])

    # decoder
    lt = t.shape[1]
    causal = jnp.where(jnp.arange(lt)[None, :] <= jnp.arange(lt)[:, None],
                       0.0, NEG_INF).astype(jnp.float32)
    h = feature(t)
    dec = params["dec"]
    for i in range(dec["sa_qkv_w"].shape[0]):
        qkv = mm(h, dec["sa_qkv_w"][i]) + dec["sa_qkv_b"][i][0]
        sa = attention(qkv[..., :e], qkv[..., e:2 * e], qkv[..., 2 * e:],
                       dec["sa_out_w"][i], dec["sa_out_b"][i][0], causal)
        h1 = ln(h + sa, dec["ln1_w"][i][0], dec["ln1_b"][i][0])
        qc = mm(h1, dec["ca_q_w"][i]) + dec["ca_q_b"][i][0]
        kv = mm(mem, dec["ca_kv_w"][i]) + dec["ca_kv_b"][i][0]
        ca = attention(qc, kv[..., :e], kv[..., e:],
                       dec["ca_out_w"][i], dec["ca_out_b"][i][0], None)
        h2 = ln(h1 + ca, dec["ln2_w"][i][0], dec["ln2_b"][i][0])
        f = jax.nn.relu(mm(h2, dec["ff1_w"][i]) + dec["ff1_b"][i][0])
        f = mm(f, dec["ff2_w"][i]) + dec["ff2_b"][i][0]
        h = ln(h2 + f, dec["ln3_w"][i][0], dec["ln3_b"][i][0])
    h = ln(h, params["dec_norm_w"][0], params["dec_norm_b"][0])
    out = jnp.einsum("ble,e->bl", h, params["final_w"][0], precision=HI) \
        + params["final_b"][0, 0]
    return out.T.reshape(-1, out_seq_len)


# ------------------------------ parameter init ------------------------------

def init_params(key, n_ts, d_model, dim_ff, n_enc, n_dec, max_len=5000):
    keys = iter(jax.random.split(key, 64))
    BF = jnp.bfloat16

    def rnd(shape, scale=0.05, dtype=jnp.float32):
        w = jax.random.normal(next(keys), shape, jnp.float32) * scale
        return w.astype(dtype)

    def enc_layer_params(nl):
        return {
            # big per-layer weights stored bf16 (halves weight DMA / VMEM);
            # biases / LN params stay f32.
            "qkv_w": rnd((nl, d_model, 3 * d_model), dtype=BF),   # (in, out)
            "qkv_b": rnd((nl, 1, 3 * d_model), 0.02),
            "out_w": rnd((nl, d_model, d_model), dtype=BF),
            "out_b": rnd((nl, 1, d_model), 0.02),
            "ln1_w": jnp.ones((nl, 1, d_model), jnp.float32),
            "ln1_b": jnp.zeros((nl, 1, d_model), jnp.float32),
            "ff1_w": rnd((nl, d_model, dim_ff), dtype=BF),
            "ff1_b": rnd((nl, 1, dim_ff), 0.02),
            "ff2_w": rnd((nl, dim_ff, d_model), dtype=BF),
            "ff2_b": rnd((nl, 1, d_model), 0.02),
            "ln2_w": jnp.ones((nl, 1, d_model), jnp.float32),
            "ln2_b": jnp.zeros((nl, 1, d_model), jnp.float32),
        }

    def dec_layer_params(nl):
        return {
            "sa_qkv_w": rnd((nl, d_model, 3 * d_model), dtype=BF),
            "sa_qkv_b": rnd((nl, 1, 3 * d_model), 0.02),
            "sa_out_w": rnd((nl, d_model, d_model), dtype=BF),
            "sa_out_b": rnd((nl, 1, d_model), 0.02),
            "ln1_w": jnp.ones((nl, 1, d_model), jnp.float32),
            "ln1_b": jnp.zeros((nl, 1, d_model), jnp.float32),
            "ca_q_w": rnd((nl, d_model, d_model), dtype=BF),
            "ca_q_b": rnd((nl, 1, d_model), 0.02),
            "ca_kv_w": rnd((nl, d_model, 2 * d_model), dtype=BF),
            "ca_kv_b": rnd((nl, 1, 2 * d_model), 0.02),
            "ca_out_w": rnd((nl, d_model, d_model), dtype=BF),
            "ca_out_b": rnd((nl, 1, d_model), 0.02),
            "ln2_w": jnp.ones((nl, 1, d_model), jnp.float32),
            "ln2_b": jnp.zeros((nl, 1, d_model), jnp.float32),
            "ff1_w": rnd((nl, d_model, dim_ff), dtype=BF),
            "ff1_b": rnd((nl, 1, dim_ff), 0.02),
            "ff2_w": rnd((nl, dim_ff, d_model), dtype=BF),
            "ff2_b": rnd((nl, 1, d_model), 0.02),
            "ln3_w": jnp.ones((nl, 1, d_model), jnp.float32),
            "ln3_b": jnp.zeros((nl, 1, d_model), jnp.float32),
        }

    return {
        "dense_w": rnd((n_ts, d_model)),                    # pre-transposed, f32
        "dense_b": rnd((1, d_model), 0.02),
        "pe": make_positional_encoding(d_model, max_len),
        "enc": enc_layer_params(n_enc),
        "enc_norm_w": jnp.ones((1, d_model), jnp.float32),
        "enc_norm_b": jnp.zeros((1, d_model), jnp.float32),
        "dec": dec_layer_params(n_dec),
        "dec_norm_w": jnp.ones((1, d_model), jnp.float32),
        "dec_norm_b": jnp.zeros((1, d_model), jnp.float32),
        "final_w": rnd((1, d_model)),                       # row vector (E -> 1)
        "final_b": rnd((1, 1), 0.02),
    }


# ----------------------------------- main -----------------------------------

if __name__ == "__main__":
    number_time_series = 3
    seq_length = 8
    out_seq_len = 8
    d_model = 32
    n_heads = 4
    # nn.Transformer default dim_feedforward is 2048; shrunk to keep the demo
    # small — the kernel structure is size-agnostic.
    dim_ff = 64
    num_layers = 6      # nn.Transformer default: 6 encoder + 6 decoder layers
    batch = 2

    key = jax.random.PRNGKey(0)
    kx, kt, kp = jax.random.split(key, 3)
    # forward() encodes x[:, :-1, :], so feed seq_length + 1 source steps.
    x = jax.random.normal(kx, (batch, seq_length + 1, number_time_series),
                          jnp.float32)
    t = jax.random.normal(kt, (batch, out_seq_len, number_time_series),
                          jnp.float32)

    params = init_params(kp, number_time_series, d_model, dim_ff,
                         num_layers, num_layers)

    fwd = jax.jit(functools.partial(simple_transformer_forward,
                                    n_heads=n_heads, out_seq_len=out_seq_len))
    y = jax.block_until_ready(fwd(params, x, t))

    assert y.shape == (batch, out_seq_len), y.shape
    assert bool(jnp.all(jnp.isfinite(y)))

    # pure-JAX reference check (same math & mixed-precision policy, plain XLA).
    # Tolerance accounts for the approximate EUP reciprocal in the in-kernel
    # softmax; a structural bug would show up as O(0.1+) error.
    y_ref = reference_forward(params, x, t, n_heads=n_heads,
                              out_seq_len=out_seq_len)
    assert jnp.allclose(y, y_ref, atol=1e-2, rtol=1e-2), (
        float(jnp.max(jnp.abs(y - y_ref))))

    print("KERNEL_OK")
</pallas_src>

<mosaic_0001>
module attributes {stable_mosaic.version = 11 : i64} {
  func.func @_encoder_stack_kernel(%arg0: i32, %arg1: memref<16x8xf32, #tpu.memory_space<vmem>>, %arg2: memref<16x32xf32, #tpu.memory_space<vmem>>, %arg3: memref<8x32xf32, #tpu.memory_space<vmem>>, %arg4: memref<1x32xf32, #tpu.memory_space<vmem>>, %arg5: memref<16x16xf32, #tpu.memory_space<vmem>>, %arg6: memref<1x32x96xbf16, #tpu.memory_space<vmem>>, %arg7: memref<1x1x96xf32, #tpu.memory_space<vmem>>, %arg8: memref<1x32x32xbf16, #tpu.memory_space<vmem>>, %arg9: memref<1x1x32xf32, #tpu.memory_space<vmem>>, %arg10: memref<1x1x32xf32, #tpu.memory_space<vmem>>, %arg11: memref<1x1x32xf32, #tpu.memory_space<vmem>>, %arg12: memref<1x32x64xbf16, #tpu.memory_space<vmem>>, %arg13: memref<1x1x64xf32, #tpu.memory_space<vmem>>, %arg14: memref<1x64x32xbf16, #tpu.memory_space<vmem>>, %arg15: memref<1x1x32xf32, #tpu.memory_space<vmem>>, %arg16: memref<1x1x32xf32, #tpu.memory_space<vmem>>, %arg17: memref<1x1x32xf32, #tpu.memory_space<vmem>>, %arg18: memref<1x32xf32, #tpu.memory_space<vmem>>, %arg19: memref<1x32xf32, #tpu.memory_space<vmem>>, %arg20: memref<16x32xf32, #tpu.memory_space<vmem>>, %arg21: memref<16x32xf32, #tpu.memory_space<vmem>>) attributes {dimension_semantics = [#tpu.dimension_semantics<arbitrary>], iteration_bounds = array<i64: 6>, scalar_prefetch = 0 : i64, scratch_operands = 1 : i64, tpu.core_type = #tpu.core_type<tc>, window_params = [{pipeline_mode = #tpu.pipeline_mode<synchronous>, transform_indices = @transform_0, window_bounds = array<i64: 16, 8>}, {pipeline_mode = #tpu.pipeline_mode<synchronous>, transform_indices = @transform_1, window_bounds = array<i64: 16, 32>}, {pipeline_mode = #tpu.pipeline_mode<synchronous>, transform_indices = @transform_2, window_bounds = array<i64: 8, 32>}, {pipeline_mode = #tpu.pipeline_mode<synchronous>, transform_indices = @transform_3, window_bounds = array<i64: 1, 32>}, {pipeline_mode = #tpu.pipeline_mode<synchronous>, transform_indices = @transform_4, window_bounds = array<i64: 16, 16>}, {transform_indices = @transform_5, window_bounds = array<i64: 1, 32, 96>}, {transform_indices = @transform_6, window_bounds = array<i64: 1, 1, 96>}, {transform_indices = @transform_7, window_bounds = array<i64: 1, 32, 32>}, {transform_indices = @transform_8, window_bounds = array<i64: 1, 1, 32>}, {transform_indices = @transform_9, window_bounds = array<i64: 1, 1, 32>}, {transform_indices = @transform_10, window_bounds = array<i64: 1, 1, 32>}, {transform_indices = @transform_11, window_bounds = array<i64: 1, 32, 64>}, {transform_indices = @transform_12, window_bounds = array<i64: 1, 1, 64>}, {transform_indices = @transform_13, window_bounds = array<i64: 1, 64, 32>}, {transform_indices = @transform_14, window_bounds = array<i64: 1, 1, 32>}, {transform_indices = @transform_15, window_bounds = array<i64: 1, 1, 32>}, {transform_indices = @transform_16, window_bounds = array<i64: 1, 1, 32>}, {pipeline_mode = #tpu.pipeline_mode<synchronous>, transform_indices = @transform_17, window_bounds = array<i64: 1, 32>}, {pipeline_mode = #tpu.pipeline_mode<synchronous>, transform_indices = @transform_18, window_bounds = array<i64: 1, 32>}, {pipeline_mode = #tpu.pipeline_mode<synchronous>, transform_indices = @transform_19, window_bounds = array<i64: 16, 32>}]} {
    %c0_i32 = arith.constant 0 : i32
    %0 = arith.cmpi eq, %arg0, %c0_i32 : i32
    %1 = arith.extui %0 : i1 to i32
    %c0_i32_0 = arith.constant 0 : i32
    %2 = arith.cmpi ne, %1, %c0_i32_0 : i32
    scf.if %2 {
      %c0_77 = arith.constant 0 : index
      %c0_78 = arith.constant 0 : index
      %169 = vector.load %arg1[%c0_77, %c0_78] : memref<16x8xf32, #tpu.memory_space<vmem>>, vector<16x8xf32>
      %c0_79 = arith.constant 0 : index
      %c0_80 = arith.constant 0 : index
      %170 = vector.load %arg3[%c0_79, %c0_80] : memref<8x32xf32, #tpu.memory_space<vmem>>, vector<8x32xf32>
      %cst_81 = arith.constant dense<0.000000e+00> : vector<16x32xf32>
      %171 = tpu.matmul %169, %170, %cst_81 {dimension_numbers = #tpu.dot_dimension_numbers<[1], [0], [0], [1], [0, 0, 1, 1], [], []>} : vector<16x8xf32>, vector<8x32xf32>, vector<16x32xf32> -> vector<16x32xf32>
      %c0_82 = arith.constant 0 : index
      %c0_83 = arith.constant 0 : index
      %172 = vector.load %arg4[%c0_82, %c0_83] : memref<1x32xf32, #tpu.memory_space<vmem>>, vector<1x32xf32>
      %173 = vector.broadcast %172 : vector<1x32xf32> to vector<16x32xf32>
      %174 = arith.addf %171, %173 : vector<16x32xf32>
      %c0_84 = arith.constant 0 : index
      %c0_85 = arith.constant 0 : index
      %175 = vector.load %arg2[%c0_84, %c0_85] : memref<16x32xf32, #tpu.memory_space<vmem>>, vector<16x32xf32>
      %176 = arith.addf %174, %175 : vector<16x32xf32>
      %c0_86 = arith.constant 0 : index
      %c0_87 = arith.constant 0 : index
      %177 = vector.load %arg21[%c0_86, %c0_87] : memref<16x32xf32, #tpu.memory_space<vmem>>, vector<16x32xf32>
      tpu.vector_store %arg21[%c0_86, %c0_87], %176 {strides = array<i32>} : memref<16x32xf32, #tpu.memory_space<vmem>>, vector<16x32xf32>,
    } else {
    }
    %c0 = arith.constant 0 : index
    %c0_1 = arith.constant 0 : index
    %3 = vector.load %arg21[%c0, %c0_1] : memref<16x32xf32, #tpu.memory_space<vmem>>, vector<16x32xf32>
    %4 = arith.truncf %3 : vector<16x32xf32> to vector<16x32xbf16>
    %c0_2 = arith.constant 0 : index
    %c0_3 = arith.constant 0 : index
    %c0_4 = arith.constant 0 : index
    %5 = vector.load %arg6[%c0_2, %c0_3, %c0_4] : memref<1x32x96xbf16, #tpu.memory_space<vmem>>, vector<1x32x96xbf16>
    %6 = vector.shape_cast %5 : vector<1x32x96xbf16> to vector<32x96xbf16>
    %cst = arith.constant dense<0.000000e+00> : vector<16x96xf32>
    %7 = tpu.matmul %4, %6, %cst {dimension_numbers = #tpu.dot_dimension_numbers<[1], [0], [0], [1], [0, 0, 1, 1], [], []>} : vector<16x32xbf16>, vector<32x96xbf16>, vector<16x96xf32> -> vector<16x96xf32>
    %c0_5 = arith.constant 0 : index
    %c0_6 = arith.constant 0 : index
    %c0_7 = arith.constant 0 : index
    %8 = vector.load %arg7[%c0_5, %c0_6, %c0_7] : memref<1x1x96xf32, #tpu.memory_space<vmem>>, vector<1x1x96xf32>
    %9 = vector.shape_cast %8 : vector<1x1x96xf32> to vector<1x96xf32>
    %10 = vector.broadcast %9 : vector<1x96xf32> to vector<16x96xf32>
    %11 = arith.addf %7, %10 : vector<16x96xf32>
    %12 = vector.extract_strided_slice %11 {offsets = [0, 0], sizes = [16, 32], strides = [1, 1]} : vector<16x96xf32> to vector<16x32xf32>
    %13 = vector.extract_strided_slice %11 {offsets = [0, 32], sizes = [16, 32], strides = [1, 1]} : vector<16x96xf32> to vector<16x32xf32>
    %14 = vector.extract_strided_slice %11 {offsets = [0, 64], sizes = [16, 32], strides = [1, 1]} : vector<16x96xf32> to vector<16x32xf32>
    %c0_8 = arith.constant 0 : index
    %c0_9 = arith.constant 0 : index
    %c0_10 = arith.constant 0 : index
    %15 = vector.load %arg8[%c0_8, %c0_9, %c0_10] : memref<1x32x32xbf16, #tpu.memory_space<vmem>>, vector<1x32x32xbf16>
    %16 = vector.shape_cast %15 : vector<1x32x32xbf16> to vector<32x32xbf16>
    %c0_11 = arith.constant 0 : index
    %c0_12 = arith.constant 0 : index
    %c0_13 = arith.constant 0 : index
    %17 = vector.load %arg9[%c0_11, %c0_12, %c0_13] : memref<1x1x32xf32, #tpu.memory_space<vmem>>, vector<1x1x32xf32>
    %18 = vector.shape_cast %17 : vector<1x1x32xf32> to vector<1x32xf32>
    %c0_14 = arith.constant 0 : index
    %c0_15 = arith.constant 0 : index
    %19 = vector.load %arg5[%c0_14, %c0_15] : memref<16x16xf32, #tpu.memory_space<vmem>>, vector<16x16xf32>
    %20 = vector.extract_strided_slice %12 {offsets = [0, 0], sizes = [16, 8], strides = [1, 1]} : vector<16x32xf32> to vector<16x8xf32>
    %cst_16 = arith.constant 0.353553385 : f32
    %21 = vector.broadcast %cst_16 : f32 to vector<16x8xf32>
    %22 = arith.mulf %20, %21 : vector<16x8xf32>
    %23 = vector.extract_strided_slice %13 {offsets = [0, 0], sizes = [16, 8], strides = [1, 1]} : vector<16x32xf32> to vector<16x8xf32>
    %24 = vector.extract_strided_slice %14 {offsets = [0, 0], sizes = [16, 8], strides = [1, 1]} : vector<16x32xf32> to vector<16x8xf32>
    %cst_17 = arith.constant dense<0.000000e+00> : vector<16x16xf32>
    %25 = tpu.matmul %22, %23, %cst_17 {dimension_numbers = #tpu.dot_dimension_numbers<[1], [1], [0], [0], [0, 0, 1, 0], [], []>} : vector<16x8xf32>, vector<16x8xf32>, vector<16x16xf32> -> vector<16x16xf32>
    %26 = arith.addf %25, %19 : vector<16x16xf32>
    %cst_18 = arith.constant dense<0xFF800000> : vector<16xf32>
    %27 = vector.multi_reduction <maximumf>, %26, %cst_18 [1] : vector<16x16xf32> to vector<16xf32>
    %28 = vector.shape_cast %27 : vector<16xf32> to vector<16x1xf32>
    %29 = vector.broadcast %28 : vector<16x1xf32> to vector<16x16xf32>
    %30 = arith.subf %26, %29 : vector<16x16xf32>
    %31 = math.exp %30 : vector<16x16xf32>
    %cst_19 = arith.constant dense<0.000000e+00> : vector<16xf32>
    %32 = vector.multi_reduction <add>, %31, %cst_19 [1] : vector<16x16xf32> to vector<16xf32>
    %33 = vector.shape_cast %32 : vector<16xf32> to vector<16x1xf32>
    %34 = tpu.reciprocal %33 {approx = true} : vector<16x1xf32> -> vector<16x1xf32>
    %35 = vector.broadcast %34 : vector<16x1xf32> to vector<16x16xf32>
    %36 = arith.mulf %31, %35 : vector<16x16xf32>
    %cst_20 = arith.constant dense<0.000000e+00> : vector<16x8xf32>
    %37 = tpu.matmul %36, %24, %cst_20 {dimension_numbers = #tpu.dot_dimension_numbers<[1], [0], [0], [1], [0, 0, 1, 1], [], []>} : vector<16x16xf32>, vector<16x8xf32>, vector<16x8xf32> -> vector<16x8xf32>
    %38 = vector.extract_strided_slice %12 {offsets = [0, 8], sizes = [16, 8], strides = [1, 1]} : vector<16x32xf32> to vector<16x8xf32>
    %cst_21 = arith.constant 0.353553385 : f32
    %39 = vector.broadcast %cst_21 : f32 to vector<16x8xf32>
    %40 = arith.mulf %38, %39 : vector<16x8xf32>
    %41 = vector.extract_strided_slice %13 {offsets = [0, 8], sizes = [16, 8], strides = [1, 1]} : vector<16x32xf32> to vector<16x8xf32>
    %42 = vector.extract_strided_slice %14 {offsets = [0, 8], sizes = [16, 8], strides = [1, 1]} : vector<16x32xf32> to vector<16x8xf32>
    %cst_22 = arith.constant dense<0.000000e+00> : vector<16x16xf32>
    %43 = tpu.matmul %40, %41, %cst_22 {dimension_numbers = #tpu.dot_dimension_numbers<[1], [1], [0], [0], [0, 0, 1, 0], [], []>} : vector<16x8xf32>, vector<16x8xf32>, vector<16x16xf32> -> vector<16x16xf32>
    %44 = arith.addf %43, %19 : vector<16x16xf32>
    %cst_23 = arith.constant dense<0xFF800000> : vector<16xf32>
    %45 = vector.multi_reduction <maximumf>, %44, %cst_23 [1] : vector<16x16xf32> to vector<16xf32>
    %46 = vector.shape_cast %45 : vector<16xf32> to vector<16x1xf32>
    %47 = vector.broadcast %46 : vector<16x1xf32> to vector<16x16xf32>
    %48 = arith.subf %44, %47 : vector<16x16xf32>
    %49 = math.exp %48 : vector<16x16xf32>
    %cst_24 = arith.constant dense<0.000000e+00> : vector<16xf32>
    %50 = vector.multi_reduction <add>, %49, %cst_24 [1] : vector<16x16xf32> to vector<16xf32>
    %51 = vector.shape_cast %50 : vector<16xf32> to vector<16x1xf32>
    %52 = tpu.reciprocal %51 {approx = true} : vector<16x1xf32> -> vector<16x1xf32>
    %53 = vector.broadcast %52 : vector<16x1xf32> to vector<16x16xf32>
    %54 = arith.mulf %49, %53 : vector<16x16xf32>
    %cst_25 = arith.constant dense<0.000000e+00> : vector<16x8xf32>
    %55 = tpu.matmul %54, %42, %cst_25 {dimension_numbers = #tpu.dot_dimension_numbers<[1], [0], [0], [1], [0, 0, 1, 1], [], []>} : vector<16x16xf32>, vector<16x8xf32>, vector<16x8xf32> -> vector<16x8xf32>
    %56 = vector.extract_strided_slice %12 {offsets = [0, 16], sizes = [16, 8], strides = [1, 1]} : vector<16x32xf32> to vector<16x8xf32>
    %cst_26 = arith.constant 0.353553385 : f32
    %57 = vector.broadcast %cst_26 : f32 to vector<16x8xf32>
    %58 = arith.mulf %56, %57 : vector<16x8xf32>
    %59 = vector.extract_strided_slice %13 {offsets = [0, 16], sizes = [16, 8], strides = [1, 1]} : vector<16x32xf32> to vector<16x8xf32>
    %60 = vector.extract_strided_slice %14 {offsets = [0, 16], sizes = [16, 8], strides = [1, 1]} : vector<16x32xf32> to vector<16x8xf32>
    %cst_27 = arith.constant dense<0.000000e+00> : vector<16x16xf32>
    %61 = tpu.matmul %58, %59, %cst_27 {dimension_numbers = #tpu.dot_dimension_numbers<[1], [1], [0], [0], [0, 0, 1, 0], [], []>} : vector<16x8xf32>, vector<16x8xf32>, vector<16x16xf32> -> vector<16x16xf32>
    %62 = arith.addf %61, %19 : vector<16x16xf32>
    %cst_28 = arith.constant dense<0xFF800000> : vector<16xf32>
    %63 = vector.multi_reduction <maximumf>, %62, %cst_28 [1] : vector<16x16xf32> to vector<16xf32>
    %64 = vector.shape_cast %63 : vector<16xf32> to vector<16x1xf32>
    %65 = vector.broadcast %64 : vector<16x1xf32> to vector<16x16xf32>
    %66 = arith.subf %62, %65 : vector<16x16xf32>
    %67 = math.exp %66 : vector<16x16xf32>
    %cst_29 = arith.constant dense<0.000000e+00> : vector<16xf32>
    %68 = vector.multi_reduction <add>, %67, %cst_29 [1] : vector<16x16xf32> to vector<16xf32>
    %69 = vector.shape_cast %68 : vector<16xf32> to vector<16x1xf32>
    %70 = tpu.reciprocal %69 {approx = true} : vector<16x1xf32> -> vector<16x1xf32>
    %71 = vector.broadcast %70 : vector<16x1xf32> to vector<16x16xf32>
    %72 = arith.mulf %67, %71 : vector<16x16xf32>
    %cst_30 = arith.constant dense<0.000000e+00> : vector<16x8xf32>
    %73 = tpu.matmul %72, %60, %cst_30 {dimension_numbers = #tpu.dot_dimension_numbers<[1], [0], [0], [1], [0, 0, 1, 1], [], []>} : vector<16x16xf32>, vector<16x8xf32>, vector<16x8xf32> -> vector<16x8xf32>
    %74 = vector.extract_strided_slice %12 {offsets = [0, 24], sizes = [16, 8], strides = [1, 1]} : vector<16x32xf32> to vector<16x8xf32>
    %cst_31 = arith.constant 0.353553385 : f32
    %75 = vector.broadcast %cst_31 : f32 to vector<16x8xf32>
    %76 = arith.mulf %74, %75 : vector<16x8xf32>
    %77 = vector.extract_strided_slice %13 {offsets = [0, 24], sizes = [16, 8], strides = [1, 1]} : vector<16x32xf32> to vector<16x8xf32>
    %78 = vector.extract_strided_slice %14 {offsets = [0, 24], sizes = [16, 8], strides = [1, 1]} : vector<16x32xf32> to vector<16x8xf32>
    %cst_32 = arith.constant dense<0.000000e+00> : vector<16x16xf32>
    %79 = tpu.matmul %76, %77, %cst_32 {dimension_numbers = #tpu.dot_dimension_numbers<[1], [1], [0], [0], [0, 0, 1, 0], [], []>} : vector<16x8xf32>, vector<16x8xf32>, vector<16x16xf32> -> vector<16x16xf32>
    %80 = arith.addf %79, %19 : vector<16x16xf32>
    %cst_33 = arith.constant dense<0xFF800000> : vector<16xf32>
    %81 = vector.multi_reduction <maximumf>, %80, %cst_33 [1] : vector<16x16xf32> to vector<16xf32>
    %82 = vector.shape_cast %81 : vector<16xf32> to vector<16x1xf32>
    %83 = vector.broadcast %82 : vector<16x1xf32> to vector<16x16xf32>
    %84 = arith.subf %80, %83 : vector<16x16xf32>
    %85 = math.exp %84 : vector<16x16xf32>
    %cst_34 = arith.constant dense<0.000000e+00> : vector<16xf32>
    %86 = vector.multi_reduction <add>, %85, %cst_34 [1] : vector<16x16xf32> to vector<16xf32>
    %87 = vector.shape_cast %86 : vector<16xf32> to vector<16x1xf32>
    %88 = tpu.reciprocal %87 {approx = true} : vector<16x1xf32> -> vector<16x1xf32>
    %89 = vector.broadcast %88 : vector<16x1xf32> to vector<16x16xf32>
    %90 = arith.mulf %85, %89 : vector<16x16xf32>
    %cst_35 = arith.constant dense<0.000000e+00> : vector<16x8xf32>
    %91 = tpu.matmul %90, %78, %cst_35 {dimension_numbers = #tpu.dot_dimension_numbers<[1], [0], [0], [1], [0, 0, 1, 1], [], []>} : vector<16x16xf32>, vector<16x8xf32>, vector<16x8xf32> -> vector<16x8xf32>
    %92 = tpu.concatenate %37, %55, %73, %91 in 1 : vector<16x8xf32>, vector<16x8xf32>, vector<16x8xf32>, vector<16x8xf32> -> vector<16x32xf32>
    %93 = arith.truncf %92 : vector<16x32xf32> to vector<16x32xbf16>
    %cst_36 = arith.constant dense<0.000000e+00> : vector<16x32xf32>
    %94 = tpu.matmul %93, %16, %cst_36 {dimension_numbers = #tpu.dot_dimension_numbers<[1], [0], [0], [1], [0, 0, 1, 1], [], []>} : vector<16x32xbf16>, vector<32x32xbf16>, vector<16x32xf32> -> vector<16x32xf32>
    %95 = vector.broadcast %18 : vector<1x32xf32> to vector<16x32xf32>
    %96 = arith.addf %94, %95 : vector<16x32xf32>
    %97 = arith.addf %3, %96 : vector<16x32xf32>
    %c0_37 = arith.constant 0 : index
    %c0_38 = arith.constant 0 : index
    %c0_39 = arith.constant 0 : index
    %98 = vector.load %arg10[%c0_37, %c0_38, %c0_39] : memref<1x1x32xf32, #tpu.memory_space<vmem>>, vector<1x1x32xf32>
    %99 = vector.shape_cast %98 : vector<1x1x32xf32> to vector<1x32xf32>
    %c0_40 = arith.constant 0 : index
    %c0_41 = arith.constant 0 : index
    %c0_42 = arith.constant 0 : index
    %100 = vector.load %arg11[%c0_40, %c0_41, %c0_42] : memref<1x1x32xf32, #tpu.memory_space<vmem>>, vector<1x1x32xf32>
    %101 = vector.shape_cast %100 : vector<1x1x32xf32> to vector<1x32xf32>
    %cst_43 = arith.constant dense<0.000000e+00> : vector<16xf32>
    %102 = vector.multi_reduction <add>, %97, %cst_43 [1] : vector<16x32xf32> to vector<16xf32>
    %103 = vector.shape_cast %102 : vector<16xf32> to vector<16x1xf32>
    %cst_44 = arith.constant 3.200000e+01 : f32
    %104 = vector.broadcast %cst_44 : f32 to vector<16x1xf32>
    %105 = arith.divf %103, %104 : vector<16x1xf32>
    %106 = vector.broadcast %105 : vector<16x1xf32> to vector<16x32xf32>
    %107 = arith.subf %97, %106 : vector<16x32xf32>
    %108 = arith.mulf %107, %107 : vector<16x32xf32>
    %cst_45 = arith.constant dense<0.000000e+00> : vector<16xf32>
    %109 = vector.multi_reduction <add>, %108, %cst_45 [1] : vector<16x32xf32> to vector<16xf32>
    %110 = vector.shape_cast %109 : vector<16xf32> to vector<16x1xf32>
    %cst_46 = arith.constant 3.200000e+01 : f32
    %111 = vector.broadcast %cst_46 : f32 to vector<16x1xf32>
    %112 = arith.divf %110, %111 : vector<16x1xf32>
    %cst_47 = arith.constant 9.99999974E-6 : f32
    %113 = vector.broadcast %cst_47 : f32 to vector<16x1xf32>
    %114 = arith.addf %112, %113 : vector<16x1xf32>
    %115 = math.rsqrt %114 : vector<16x1xf32>
    %116 = vector.broadcast %115 : vector<16x1xf32> to vector<16x32xf32>
    %117 = arith.mulf %107, %116 : vector<16x32xf32>
    %118 = vector.broadcast %99 : vector<1x32xf32> to vector<16x32xf32>
    %119 = arith.mulf %117, %118 : vector<16x32xf32>
    %120 = vector.broadcast %101 : vector<1x32xf32> to vector<16x32xf32>
    %121 = arith.addf %119, %120 : vector<16x32xf32>
    %122 = arith.truncf %121 : vector<16x32xf32> to vector<16x32xbf16>
    %c0_48 = arith.constant 0 : index
    %c0_49 = arith.constant 0 : index
    %c0_50 = arith.constant 0 : index
    %123 = vector.load %arg12[%c0_48, %c0_49, %c0_50] : memref<1x32x64xbf16, #tpu.memory_space<vmem>>, vector<1x32x64xbf16>
    %124 = vector.shape_cast %123 : vector<1x32x64xbf16> to vector<32x64xbf16>
    %cst_51 = arith.constant dense<0.000000e+00> : vector<16x64xf32>
    %125 = tpu.matmul %122, %124, %cst_51 {dimension_numbers = #tpu.dot_dimension_numbers<[1], [0], [0], [1], [0, 0, 1, 1], [], []>} : vector<16x32xbf16>, vector<32x64xbf16>, vector<16x64xf32> -> vector<16x64xf32>
    %c0_52 = arith.constant 0 : index
    %c0_53 = arith.constant 0 : index
    %c0_54 = arith.constant 0 : index
    %126 = vector.load %arg13[%c0_52, %c0_53, %c0_54] : memref<1x1x64xf32, #tpu.memory_space<vmem>>, vector<1x1x64xf32>
    %127 = vector.shape_cast %126 : vector<1x1x64xf32> to vector<1x64xf32>
    %128 = vector.broadcast %127 : vector<1x64xf32> to vector<16x64xf32>
    %129 = arith.addf %125, %128 : vector<16x64xf32>
    %cst_55 = arith.constant 0.000000e+00 : f32
    %130 = vector.broadcast %cst_55 : f32 to vector<16x64xf32>
    %131 = arith.maximumf %129, %130 : vector<16x64xf32>
    %132 = arith.truncf %131 : vector<16x64xf32> to vector<16x64xbf16>
    %c0_56 = arith.constant 0 : index
    %c0_57 = arith.constant 0 : index
    %c0_58 = arith.constant 0 : index
    %133 = vector.load %arg14[%c0_56, %c0_57, %c0_58] : memref<1x64x32xbf16, #tpu.memory_space<vmem>>, vector<1x64x32xbf16>
    %134 = vector.shape_cast %133 : vector<1x64x32xbf16> to vector<64x32xbf16>
    %cst_59 = arith.constant dense<0.000000e+00> : vector<16x32xf32>
    %135 = tpu.matmul %132, %134, %cst_59 {dimension_numbers = #tpu.dot_dimension_numbers<[1], [0], [0], [1], [0, 0, 1, 1], [], []>} : vector<16x64xbf16>, vector<64x32xbf16>, vector<16x32xf32> -> vector<16x32xf32>
    %c0_60 = arith.constant 0 : index
    %c0_61 = arith.constant 0 : index
    %c0_62 = arith.constant 0 : index
    %136 = vector.load %arg15[%c0_60, %c0_61, %c0_62] : memref<1x1x32xf32, #tpu.memory_space<vmem>>, vector<1x1x32xf32>
    %137 = vector.shape_cast %136 : vector<1x1x32xf32> to vector<1x32xf32>
    %138 = vector.broadcast %137 : vector<1x32xf32> to vector<16x32xf32>
    %139 = arith.addf %135, %138 : vector<16x32xf32>
    %140 = arith.addf %121, %139 : vector<16x32xf32>
    %c0_63 = arith.constant 0 : index
    %c0_64 = arith.constant 0 : index
    %c0_65 = arith.constant 0 : index
    %141 = vector.load %arg16[%c0_63, %c0_64, %c0_65] : memref<1x1x32xf32, #tpu.memory_space<vmem>>, vector<1x1x32xf32>
    %142 = vector.shape_cast %141 : vector<1x1x32xf32> to vector<1x32xf32>
    %c0_66 = arith.constant 0 : index
    %c0_67 = arith.constant 0 : index
    %c0_68 = arith.constant 0 : index
    %143 = vector.load %arg17[%c0_66, %c0_67, %c0_68] : memref<1x1x32xf32, #tpu.memory_space<vmem>>, vector<1x1x32xf32>
    %144 = vector.shape_cast %143 : vector<1x1x32xf32> to vector<1x32xf32>
    %cst_69 = arith.constant dense<0.000000e+00> : vector<16xf32>
    %145 = vector.multi_reduction <add>, %140, %cst_69 [1] : vector<16x32xf32> to vector<16xf32>
    %146 = vector.shape_cast %145 : vector<16xf32> to vector<16x1xf32>
    %cst_70 = arith.constant 3.200000e+01 : f32
    %147 = vector.broadcast %cst_70 : f32 to vector<16x1xf32>
    %148 = arith.divf %146, %147 : vector<16x1xf32>
    %149 = vector.broadcast %148 : vector<16x1xf32> to vector<16x32xf32>
    %150 = arith.subf %140, %149 : vector<16x32xf32>
    %151 = arith.mulf %150, %150 : vector<16x32xf32>
    %cst_71 = arith.constant dense<0.000000e+00> : vector<16xf32>
    %152 = vector.multi_reduction <add>, %151, %cst_71 [1] : vector<16x32xf32> to vector<16xf32>
    %153 = vector.shape_cast %152 : vector<16xf32> to vector<16x1xf32>
    %cst_72 = arith.constant 3.200000e+01 : f32
    %154 = vector.broadcast %cst_72 : f32 to vector<16x1xf32>
    %155 = arith.divf %153, %154 : vector<16x1xf32>
    %cst_73 = arith.constant 9.99999974E-6 : f32
    %156 = vector.broadcast %cst_73 : f32 to vector<16x1xf32>
    %157 = arith.addf %155, %156 : vector<16x1xf32>
    %158 = math.rsqrt %157 : vector<16x1xf32>
    %159 = vector.broadcast %158 : vector<16x1xf32> to vector<16x32xf32>
    %160 = arith.mulf %150, %159 : vector<16x32xf32>
    %161 = vector.broadcast %142 : vector<1x32xf32> to vector<16x32xf32>
    %162 = arith.mulf %160, %161 : vector<16x32xf32>
    %163 = vector.broadcast %144 : vector<1x32xf32> to vector<16x32xf32>
    %164 = arith.addf %162, %163 : vector<16x32xf32>
    %c0_74 = arith.constant 0 : index
    %c0_75 = arith.constant 0 : index
    %165 = vector.load %arg21[%c0_74, %c0_75] : memref<16x32xf32, #tpu.memory_space<vmem>>, vector<16x32xf32>
    tpu.vector_store %arg21[%c0_74, %c0_75], %164 {strides = array<i32>} : memref<16x32xf32, #tpu.memory_space<vmem>>, vector<16x32xf32>,
    %c5_i32 = arith.constant 5 : i32
    %166 = arith.cmpi eq, %arg0, %c5_i32 : i32
    %167 = arith.extui %166 : i1 to i32
    %c0_i32_76 = arith.constant 0 : i32
    %168 = arith.cmpi ne, %167, %c0_i32_76 : i32
    scf.if %168 {
      %c0_77 = arith.constant 0 : index
      %c0_78 = arith.constant 0 : index
      %169 = vector.load %arg18[%c0_77, %c0_78] : memref<1x32xf32, #tpu.memory_space<vmem>>, vector<1x32xf32>
      %c0_79 = arith.constant 0 : index
      %c0_80 = arith.constant 0 : index
      %170 = vector.load %arg19[%c0_79, %c0_80] : memref<1x32xf32, #tpu.memory_space<vmem>>, vector<1x32xf32>
      %cst_81 = arith.constant dense<0.000000e+00> : vector<16xf32>
      %171 = vector.multi_reduction <add>, %164, %cst_81 [1] : vector<16x32xf32> to vector<16xf32>
      %172 = vector.shape_cast %171 : vector<16xf32> to vector<16x1xf32>
      %cst_82 = arith.constant 3.200000e+01 : f32
      %173 = vector.broadcast %cst_82 : f32 to vector<16x1xf32>
      %174 = arith.divf %172, %173 : vector<16x1xf32>
      %175 = vector.broadcast %174 : vector<16x1xf32> to vector<16x32xf32>
      %176 = arith.subf %164, %175 : vector<16x32xf32>
      %177 = arith.mulf %176, %176 : vector<16x32xf32>
      %cst_83 = arith.constant dense<0.000000e+00> : vector<16xf32>
      %178 = vector.multi_reduction <add>, %177, %cst_83 [1] : vector<16x32xf32> to vector<16xf32>
      %179 = vector.shape_cast %178 : vector<16xf32> to vector<16x1xf32>
      %cst_84 = arith.constant 3.200000e+01 : f32
      %180 = vector.broadcast %cst_84 : f32 to vector<16x1xf32>
      %181 = arith.divf %179, %180 : vector<16x1xf32>
      %cst_85 = arith.constant 9.99999974E-6 : f32
      %182 = vector.broadcast %cst_85 : f32 to vector<16x1xf32>
      %183 = arith.addf %181, %182 : vector<16x1xf32>
      %184 = math.rsqrt %183 : vector<16x1xf32>
      %185 = vector.broadcast %184 : vector<16x1xf32> to vector<16x32xf32>
      %186 = arith.mulf %176, %185 : vector<16x32xf32>
      %187 = vector.broadcast %169 : vector<1x32xf32> to vector<16x32xf32>
      %188 = arith.mulf %186, %187 : vector<16x32xf32>
      %189 = vector.broadcast %170 : vector<1x32xf32> to vector<16x32xf32>
      %190 = arith.addf %188, %189 : vector<16x32xf32>
      %c0_86 = arith.constant 0 : index
      %c0_87 = arith.constant 0 : index
      %191 = vector.load %arg20[%c0_86, %c0_87] : memref<16x32xf32, #tpu.memory_space<vmem>>, vector<16x32xf32>
      tpu.vector_store %arg20[%c0_86, %c0_87], %190 {strides = array<i32>} : memref<16x32xf32, #tpu.memory_space<vmem>>, vector<16x32xf32>,
    } else {
    }
    return
  }
  func.func @transform_0(%arg0: i32) -> (i32, i32) {
    %c0_i32 = arith.constant 0 : i32
    %c0_i32_0 = arith.constant 0 : i32
    %c0_i32_1 = arith.constant 0 : i32
    return %c0_i32, %c0_i32_0 : i32, i32
  }
  func.func @transform_1(%arg0: i32) -> (i32, i32) {
    %c0_i32 = arith.constant 0 : i32
    %c0_i32_0 = arith.constant 0 : i32
    %c0_i32_1 = arith.constant 0 : i32
    return %c0_i32, %c0_i32_0 : i32, i32
  }
  func.func @transform_2(%arg0: i32) -> (i32, i32) {
    %c0_i32 = arith.constant 0 : i32
    %c0_i32_0 = arith.constant 0 : i32
    %c0_i32_1 = arith.constant 0 : i32
    return %c0_i32, %c0_i32_0 : i32, i32
  }
  func.func @transform_3(%arg0: i32) -> (i32, i32) {
    %c0_i32 = arith.constant 0 : i32
    %c0_i32_0 = arith.constant 0 : i32
    %c0_i32_1 = arith.constant 0 : i32
    return %c0_i32, %c0_i32_0 : i32, i32
  }
  func.func @transform_4(%arg0: i32) -> (i32, i32) {
    %c0_i32 = arith.constant 0 : i32
    %c0_i32_0 = arith.constant 0 : i32
    %c0_i32_1 = arith.constant 0 : i32
    return %c0_i32, %c0_i32_0 : i32, i32
  }
  func.func @transform_5(%arg0: i32) -> (i32, i32, i32) {
    %c0_i32 = arith.constant 0 : i32
    %c0_i32_0 = arith.constant 0 : i32
    %c0_i32_1 = arith.constant 0 : i32
    return %arg0, %c0_i32, %c0_i32_0 : i32, i32, i32
  }
  func.func @transform_6(%arg0: i32) -> (i32, i32, i32) {
    %c0_i32 = arith.constant 0 : i32
    %c0_i32_0 = arith.constant 0 : i32
    %c0_i32_1 = arith.constant 0 : i32
    return %arg0, %c0_i32, %c0_i32_0 : i32, i32, i32
  }
  func.func @transform_7(%arg0: i32) -> (i32, i32, i32) {
    %c0_i32 = arith.constant 0 : i32
    %c0_i32_0 = arith.constant 0 : i32
    %c0_i32_1 = arith.constant 0 : i32
    return %arg0, %c0_i32, %c0_i32_0 : i32, i32, i32
  }
  func.func @transform_8(%arg0: i32) -> (i32, i32, i32) {
    %c0_i32 = arith.constant 0 : i32
    %c0_i32_0 = arith.constant 0 : i32
    %c0_i32_1 = arith.constant 0 : i32
    return %arg0, %c0_i32, %c0_i32_0 : i32, i32, i32
  }
  func.func @transform_9(%arg0: i32) -> (i32, i32, i32) {
    %c0_i32 = arith.constant 0 : i32
    %c0_i32_0 = arith.constant 0 : i32
    %c0_i32_1 = arith.constant 0 : i32
    return %arg0, %c0_i32, %c0_i32_0 : i32, i32, i32
  }
  func.func @transform_10(%arg0: i32) -> (i32, i32, i32) {
    %c0_i32 = arith.constant 0 : i32
    %c0_i32_0 = arith.constant 0 : i32
    %c0_i32_1 = arith.constant 0 : i32
    return %arg0, %c0_i32, %c0_i32_0 : i32, i32, i32
  }
  func.func @transform_11(%arg0: i32) -> (i32, i32, i32) {
    %c0_i32 = arith.constant 0 : i32
    %c0_i32_0 = arith.constant 0 : i32
    %c0_i32_1 = arith.constant 0 : i32
    return %arg0, %c0_i32, %c0_i32_0 : i32, i32, i32
  }
  func.func @transform_12(%arg0: i32) -> (i32, i32, i32) {
    %c0_i32 = arith.constant 0 : i32
    %c0_i32_0 = arith.constant 0 : i32
    %c0_i32_1 = arith.constant 0 : i32
    return %arg0, %c0_i32, %c0_i32_0 : i32, i32, i32
  }
  func.func @transform_13(%arg0: i32) -> (i32, i32, i32) {
    %c0_i32 = arith.constant 0 : i32
    %c0_i32_0 = arith.constant 0 : i32
    %c0_i32_1 = arith.constant 0 : i32
    return %arg0, %c0_i32, %c0_i32_0 : i32, i32, i32
  }
  func.func @transform_14(%arg0: i32) -> (i32, i32, i32) {
    %c0_i32 = arith.constant 0 : i32
    %c0_i32_0 = arith.constant 0 : i32
    %c0_i32_1 = arith.constant 0 : i32
    return %arg0, %c0_i32, %c0_i32_0 : i32, i32, i32
  }
  func.func @transform_15(%arg0: i32) -> (i32, i32, i32) {
    %c0_i32 = arith.constant 0 : i32
    %c0_i32_0 = arith.constant 0 : i32
    %c0_i32_1 = arith.constant 0 : i32
    return %arg0, %c0_i32, %c0_i32_0 : i32, i32, i32
  }
  func.func @transform_16(%arg0: i32) -> (i32, i32, i32) {
    %c0_i32 = arith.constant 0 : i32
    %c0_i32_0 = arith.constant 0 : i32
    %c0_i32_1 = arith.constant 0 : i32
    return %arg0, %c0_i32, %c0_i32_0 : i32, i32, i32
  }
  func.func @transform_17(%arg0: i32) -> (i32, i32) {
    %c0_i32 = arith.constant 0 : i32
    %c0_i32_0 = arith.constant 0 : i32
    %c0_i32_1 = arith.constant 0 : i32
    return %c0_i32, %c0_i32_0 : i32, i32
  }
  func.func @transform_18(%arg0: i32) -> (i32, i32) {
    %c0_i32 = arith.constant 0 : i32
    %c0_i32_0 = arith.constant 0 : i32
    %c0_i32_1 = arith.constant 0 : i32
    return %c0_i32, %c0_i32_0 : i32, i32
  }
  func.func @transform_19(%arg0: i32) -> (i32, i32) {
    %c0_i32 = arith.constant 0 : i32
    %c0_i32_0 = arith.constant 0 : i32
    %c0_i32_1 = arith.constant 0 : i32
    return %c0_i32, %c0_i32_0 : i32, i32
  }
}

module attributes {stable_mosaic.version = 11 : i64} {
  func.func @_decoder_stack_kernel(%arg0: i32, %arg1: memref<16x8xf32, #tpu.memory_space<vmem>>, %arg2: memref<16x32xf32, #tpu.memory_space<vmem>>, %arg3: memref<8x32xf32, #tpu.memory_space<vmem>>, %arg4: memref<1x32xf32, #tpu.memory_space<vmem>>, %arg5: memref<16x32xf32, #tpu.memory_space<vmem>>, %arg6: memref<16x16xf32, #tpu.memory_space<vmem>>, %arg7: memref<16x16xf32, #tpu.memory_space<vmem>>, %arg8: memref<1x32x96xbf16, #tpu.memory_space<vmem>>, %arg9: memref<1x1x96xf32, #tpu.memory_space<vmem>>, %arg10: memref<1x32x32xbf16, #tpu.memory_space<vmem>>, %arg11: memref<1x1x32xf32, #tpu.memory_space<vmem>>, %arg12: memref<1x1x32xf32, #tpu.memory_space<vmem>>, %arg13: memref<1x1x32xf32, #tpu.memory_space<vmem>>, %arg14: memref<1x32x32xbf16, #tpu.memory_space<vmem>>, %arg15: memref<1x1x32xf32, #tpu.memory_space<vmem>>, %arg16: memref<1x32x64xbf16, #tpu.memory_space<vmem>>, %arg17: memref<1x1x64xf32, #tpu.memory_space<vmem>>, %arg18: memref<1x32x32xbf16, #tpu.memory_space<vmem>>, %arg19: memref<1x1x32xf32, #tpu.memory_space<vmem>>, %arg20: memref<1x1x32xf32, #tpu.memory_space<vmem>>, %arg21: memref<1x1x32xf32, #tpu.memory_space<vmem>>, %arg22: memref<1x32x64xbf16, #tpu.memory_space<vmem>>, %arg23: memref<1x1x64xf32, #tpu.memory_space<vmem>>, %arg24: memref<1x64x32xbf16, #tpu.memory_space<vmem>>, %arg25: memref<1x1x32xf32, #tpu.memory_space<vmem>>, %arg26: memref<1x1x32xf32, #tpu.memory_space<vmem>>, %arg27: memref<1x1x32xf32, #tpu.memory_space<vmem>>, %arg28: memref<1x32xf32, #tpu.memory_space<vmem>>, %arg29: memref<1x32xf32, #tpu.memory_space<vmem>>, %arg30: memref<1x32xf32, #tpu.memory_space<vmem>>, %arg31: memref<1x1xf32, #tpu.memory_space<vmem>>, %arg32: memref<1x16xf32, #tpu.memory_space<vmem>>, %arg33: memref<16x32xf32, #tpu.memory_space<vmem>>) attributes {dimension_semantics = [#tpu.dimension_semantics<arbitrary>], iteration_bounds = array<i64: 6>, scalar_prefetch = 0 : i64, scratch_operands = 1 : i64, tpu.core_type = #tpu.core_type<tc>, window_params = [{pipeline_mode = #tpu.pipeline_mode<synchronous>, transform_indices = @transform_0, window_bounds = array<i64: 16, 8>}, {pipeline_mode = #tpu.pipeline_mode<synchronous>, transform_indices = @transform_1, window_bounds = array<i64: 16, 32>}, {pipeline_mode = #tpu.pipeline_mode<synchronous>, transform_indices = @transform_2, window_bounds = array<i64: 8, 32>}, {pipeline_mode = #tpu.pipeline_mode<synchronous>, transform_indices = @transform_3, window_bounds = array<i64: 1, 32>}, {pipeline_mode = #tpu.pipeline_mode<synchronous>, transform_indices = @transform_4, window_bounds = array<i64: 16, 32>}, {pipeline_mode = #tpu.pipeline_mode<synchronous>, transform_indices = @transform_5, window_bounds = array<i64: 16, 16>}, {pipeline_mode = #tpu.pipeline_mode<synchronous>, transform_indices = @transform_6, window_bounds = array<i64: 16, 16>}, {transform_indices = @transform_7, window_bounds = array<i64: 1, 32, 96>}, {transform_indices = @transform_8, window_bounds = array<i64: 1, 1, 96>}, {transform_indices = @transform_9, window_bounds = array<i64: 1, 32, 32>}, {transform_indices = @transform_10, window_bounds = array<i64: 1, 1, 32>}, {transform_indices = @transform_11, window_bounds = array<i64: 1, 1, 32>}, {transform_indices = @transform_12, window_bounds = array<i64: 1, 1, 32>}, {transform_indices = @transform_13, window_bounds = array<i64: 1, 32, 32>}, {transform_indices = @transform_14, window_bounds = array<i64: 1, 1, 32>}, {transform_indices = @transform_15, window_bounds = array<i64: 1, 32, 64>}, {transform_indices = @transform_16, window_bounds = array<i64: 1, 1, 64>}, {transform_indices = @transform_17, window_bounds = array<i64: 1, 32, 32>}, {transform_indices = @transform_18, window_bounds = array<i64: 1, 1, 32>}, {transform_indices = @transform_19, window_bounds = array<i64: 1, 1, 32>}, {transform_indices = @transform_20, window_bounds = array<i64: 1, 1, 32>}, {transform_indices = @transform_21, window_bounds = array<i64: 1, 32, 64>}, {transform_indices = @transform_22, window_bounds = array<i64: 1, 1, 64>}, {transform_indices = @transform_23, window_bounds = array<i64: 1, 64, 32>}, {transform_indices = @transform_24, window_bounds = array<i64: 1, 1, 32>}, {transform_indices = @transform_25, window_bounds = array<i64: 1, 1, 32>}, {transform_indices = @transform_26, window_bounds = array<i64: 1, 1, 32>}, {pipeline_mode = #tpu.pipeline_mode<synchronous>, transform_indices = @transform_27, window_bounds = array<i64: 1, 32>}, {pipeline_mode = #tpu.pipeline_mode<synchronous>, transform_indices = @transform_28, window_bounds = array<i64: 1, 32>}, {pipeline_mode = #tpu.pipeline_mode<synchronous>, transform_indices = @transform_29, window_bounds = array<i64: 1, 32>}, {pipeline_mode = #tpu.pipeline_mode<synchronous>, transform_indices = @transform_30, window_bounds = array<i64: 1, 1>}, {pipeline_mode = #tpu.pipeline_mode<synchronous>, transform_indices = @transform_31, window_bounds = array<i64: 1, 16>}]} {
    %c0_i32 = arith.constant 0 : i32
    %0 = arith.cmpi eq, %arg0, %c0_i32 : i32
    %1 = arith.extui %0 : i1 to i32
    %c0_i32_0 = arith.constant 0 : i32
    %2 = arith.cmpi ne, %1, %c0_i32_0 : i32
    scf.if %2 {
      %c0_133 = arith.constant 0 : index
      %c0_134 = arith.constant 0 : index
      %295 = vector.load %arg1[%c0_133, %c0_134] : memref<16x8xf32, #tpu.memory_space<vmem>>, vector<16x8xf32>
      %c0_135 = arith.constant 0 : index
      %c0_136 = arith.constant 0 : index
      %296 = vector.load %arg3[%c0_135, %c0_136] : memref<8x32xf32, #tpu.memory_space<vmem>>, vector<8x32xf32>
      %cst_137 = arith.constant dense<0.000000e+00> : vector<16x32xf32>
      %297 = tpu.matmul %295, %296, %cst_137 {dimension_numbers = #tpu.dot_dimension_numbers<[1], [0], [0], [1], [0, 0, 1, 1], [], []>} : vector<16x8xf32>, vector<8x32xf32>, vector<16x32xf32> -> vector<16x32xf32>
      %c0_138 = arith.constant 0 : index
      %c0_139 = arith.constant 0 : index
      %298 = vector.load %arg4[%c0_138, %c0_139] : memref<1x32xf32, #tpu.memory_space<vmem>>, vector<1x32xf32>
      %299 = vector.broadcast %298 : vector<1x32xf32> to vector<16x32xf32>
      %300 = arith.addf %297, %299 : vector<16x32xf32>
      %c0_140 = arith.constant 0 : index
      %c0_141 = arith.constant 0 : index
      %301 = vector.load %arg2[%c0_140, %c0_141] : memref<16x32xf32, #tpu.memory_space<vmem>>, vector<16x32xf32>
      %302 = arith.addf %300, %301 : vector<16x32xf32>
      %c0_142 = arith.constant 0 : index
      %c0_143 = arith.constant 0 : index
      %303 = vector.load %arg33[%c0_142, %c0_143] : memref<16x32xf32, #tpu.memory_space<vmem>>, vector<16x32xf32>
      tpu.vector_store %arg33[%c0_142, %c0_143], %302 {strides = array<i32>} : memref<16x32xf32, #tpu.memory_space<vmem>>, vector<16x32xf32>,
    } else {
    }
    %c0 = arith.constant 0 : index
    %c0_1 = arith.constant 0 : index
    %3 = vector.load %arg33[%c0, %c0_1] : memref<16x32xf32, #tpu.memory_space<vmem>>, vector<16x32xf32>
    %c0_2 = arith.constant 0 : index
    %c0_3 = arith.constant 0 : index
    %4 = vector.load %arg5[%c0_2, %c0_3] : memref<16x32xf32, #tpu.memory_space<vmem>>, vector<16x32xf32>
    %5 = arith.truncf %4 : vector<16x32xf32> to vector<16x32xbf16>
    %6 = arith.truncf %3 : vector<16x32xf32> to vector<16x32xbf16>
    %c0_4 = arith.constant 0 : index
    %c0_5 = arith.constant 0 : index
    %c0_6 = arith.constant 0 : index
    %7 = vector.load %arg8[%c0_4, %c0_5, %c0_6] : memref<1x32x96xbf16, #tpu.memory_space<vmem>>, vector<1x32x96xbf16>
    %8 = vector.shape_cast %7 : vector<1x32x96xbf16> to vector<32x96xbf16>
    %cst = arith.constant dense<0.000000e+00> : vector<16x96xf32>
    %9 = tpu.matmul %6, %8, %cst {dimension_numbers = #tpu.dot_dimension_numbers<[1], [0], [0], [1], [0, 0, 1, 1], [], []>} : vector<16x32xbf16>, vector<32x96xbf16>, vector<16x96xf32> -> vector<16x96xf32>
    %c0_7 = arith.constant 0 : index
    %c0_8 = arith.constant 0 : index
    %c0_9 = arith.constant 0 : index
    %10 = vector.load %arg9[%c0_7, %c0_8, %c0_9] : memref<1x1x96xf32, #tpu.memory_space<vmem>>, vector<1x1x96xf32>
    %11 = vector.shape_cast %10 : vector<1x1x96xf32> to vector<1x96xf32>
    %12 = vector.broadcast %11 : vector<1x96xf32> to vector<16x96xf32>
    %13 = arith.addf %9, %12 : vector<16x96xf32>
    %14 = vector.extract_strided_slice %13 {offsets = [0, 0], sizes = [16, 32], strides = [1, 1]} : vector<16x96xf32> to vector<16x32xf32>
    %15 = vector.extract_strided_slice %13 {offsets = [0, 32], sizes = [16, 32], strides = [1, 1]} : vector<16x96xf32> to vector<16x32xf32>
    %16 = vector.extract_strided_slice %13 {offsets = [0, 64], sizes = [16, 32], strides = [1, 1]} : vector<16x96xf32> to vector<16x32xf32>
    %c0_10 = arith.constant 0 : index
    %c0_11 = arith.constant 0 : index
    %c0_12 = arith.constant 0 : index
    %17 = vector.load %arg10[%c0_10, %c0_11, %c0_12] : memref<1x32x32xbf16, #tpu.memory_space<vmem>>, vector<1x32x32xbf16>
    %18 = vector.shape_cast %17 : vector<1x32x32xbf16> to vector<32x32xbf16>
    %c0_13 = arith.constant 0 : index
    %c0_14 = arith.constant 0 : index
    %c0_15 = arith.constant 0 : index
    %19 = vector.load %arg11[%c0_13, %c0_14, %c0_15] : memref<1x1x32xf32, #tpu.memory_space<vmem>>, vector<1x1x32xf32>
    %20 = vector.shape_cast %19 : vector<1x1x32xf32> to vector<1x32xf32>
    %c0_16 = arith.constant 0 : index
    %c0_17 = arith.constant 0 : index
    %21 = vector.load %arg6[%c0_16, %c0_17] : memref<16x16xf32, #tpu.memory_space<vmem>>, vector<16x16xf32>
    %22 = vector.extract_strided_slice %14 {offsets = [0, 0], sizes = [16, 8], strides = [1, 1]} : vector<16x32xf32> to vector<16x8xf32>
    %cst_18 = arith.constant 0.353553385 : f32
    %23 = vector.broadcast %cst_18 : f32 to vector<16x8xf32>
    %24 = arith.mulf %22, %23 : vector<16x8xf32>
    %25 = vector.extract_strided_slice %15 {offsets = [0, 0], sizes = [16, 8], strides = [1, 1]} : vector<16x32xf32> to vector<16x8xf32>
    %26 = vector.extract_strided_slice %16 {offsets = [0, 0], sizes = [16, 8], strides = [1, 1]} : vector<16x32xf32> to vector<16x8xf32>
    %cst_19 = arith.constant dense<0.000000e+00> : vector<16x16xf32>
    %27 = tpu.matmul %24, %25, %cst_19 {dimension_numbers = #tpu.dot_dimension_numbers<[1], [1], [0], [0], [0, 0, 1, 0], [], []>} : vector<16x8xf32>, vector<16x8xf32>, vector<16x16xf32> -> vector<16x16xf32>
    %28 = arith.addf %27, %21 : vector<16x16xf32>
    %cst_20 = arith.constant dense<0xFF800000> : vector<16xf32>
    %29 = vector.multi_reduction <maximumf>, %28, %cst_20 [1] : vector<16x16xf32> to vector<16xf32>
    %30 = vector.shape_cast %29 : vector<16xf32> to vector<16x1xf32>
    %31 = vector.broadcast %30 : vector<16x1xf32> to vector<16x16xf32>
    %32 = arith.subf %28, %31 : vector<16x16xf32>
    %33 = math.exp %32 : vector<16x16xf32>
    %cst_21 = arith.constant dense<0.000000e+00> : vector<16xf32>
    %34 = vector.multi_reduction <add>, %33, %cst_21 [1] : vector<16x16xf32> to vector<16xf32>
    %35 = vector.shape_cast %34 : vector<16xf32> to vector<16x1xf32>
    %36 = tpu.reciprocal %35 {approx = true} : vector<16x1xf32> -> vector<16x1xf32>
    %37 = vector.broadcast %36 : vector<16x1xf32> to vector<16x16xf32>
    %38 = arith.mulf %33, %37 : vector<16x16xf32>
    %cst_22 = arith.constant dense<0.000000e+00> : vector<16x8xf32>
    %39 = tpu.matmul %38, %26, %cst_22 {dimension_numbers = #tpu.dot_dimension_numbers<[1], [0], [0], [1], [0, 0, 1, 1], [], []>} : vector<16x16xf32>, vector<16x8xf32>, vector<16x8xf32> -> vector<16x8xf32>
    %40 = vector.extract_strided_slice %14 {offsets = [0, 8], sizes = [16, 8], strides = [1, 1]} : vector<16x32xf32> to vector<16x8xf32>
    %cst_23 = arith.constant 0.353553385 : f32
    %41 = vector.broadcast %cst_23 : f32 to vector<16x8xf32>
    %42 = arith.mulf %40, %41 : vector<16x8xf32>
    %43 = vector.extract_strided_slice %15 {offsets = [0, 8], sizes = [16, 8], strides = [1, 1]} : vector<16x32xf32> to vector<16x8xf32>
    %44 = vector.extract_strided_slice %16 {offsets = [0, 8], sizes = [16, 8], strides = [1, 1]} : vector<16x32xf32> to vector<16x8xf32>
    %cst_24 = arith.constant dense<0.000000e+00> : vector<16x16xf32>
    %45 = tpu.matmul %42, %43, %cst_24 {dimension_numbers = #tpu.dot_dimension_numbers<[1], [1], [0], [0], [0, 0, 1, 0], [], []>} : vector<16x8xf32>, vector<16x8xf32>, vector<16x16xf32> -> vector<16x16xf32>
    %46 = arith.addf %45, %21 : vector<16x16xf32>
    %cst_25 = arith.constant dense<0xFF800000> : vector<16xf32>
    %47 = vector.multi_reduction <maximumf>, %46, %cst_25 [1] : vector<16x16xf32> to vector<16xf32>
    %48 = vector.shape_cast %47 : vector<16xf32> to vector<16x1xf32>
    %49 = vector.broadcast %48 : vector<16x1xf32> to vector<16x16xf32>
    %50 = arith.subf %46, %49 : vector<16x16xf32>
    %51 = math.exp %50 : vector<16x16xf32>
    %cst_26 = arith.constant dense<0.000000e+00> : vector<16xf32>
    %52 = vector.multi_reduction <add>, %51, %cst_26 [1] : vector<16x16xf32> to vector<16xf32>
    %53 = vector.shape_cast %52 : vector<16xf32> to vector<16x1xf32>
    %54 = tpu.reciprocal %53 {approx = true} : vector<16x1xf32> -> vector<16x1xf32>
    %55 = vector.broadcast %54 : vector<16x1xf32> to vector<16x16xf32>
    %56 = arith.mulf %51, %55 : vector<16x16xf32>
    %cst_27 = arith.constant dense<0.000000e+00> : vector<16x8xf32>
    %57 = tpu.matmul %56, %44, %cst_27 {dimension_numbers = #tpu.dot_dimension_numbers<[1], [0], [0], [1], [0, 0, 1, 1], [], []>} : vector<16x16xf32>, vector<16x8xf32>, vector<16x8xf32> -> vector<16x8xf32>
    %58 = vector.extract_strided_slice %14 {offsets = [0, 16], sizes = [16, 8], strides = [1, 1]} : vector<16x32xf32> to vector<16x8xf32>
    %cst_28 = arith.constant 0.353553385 : f32
    %59 = vector.broadcast %cst_28 : f32 to vector<16x8xf32>
    %60 = arith.mulf %58, %59 : vector<16x8xf32>
    %61 = vector.extract_strided_slice %15 {offsets = [0, 16], sizes = [16, 8], strides = [1, 1]} : vector<16x32xf32> to vector<16x8xf32>
    %62 = vector.extract_strided_slice %16 {offsets = [0, 16], sizes = [16, 8], strides = [1, 1]} : vector<16x32xf32> to vector<16x8xf32>
    %cst_29 = arith.constant dense<0.000000e+00> : vector<16x16xf32>
    %63 = tpu.matmul %60, %61, %cst_29 {dimension_numbers = #tpu.dot_dimension_numbers<[1], [1], [0], [0], [0, 0, 1, 0], [], []>} : vector<16x8xf32>, vector<16x8xf32>, vector<16x16xf32> -> vector<16x16xf32>
    %64 = arith.addf %63, %21 : vector<16x16xf32>
    %cst_30 = arith.constant dense<0xFF800000> : vector<16xf32>
    %65 = vector.multi_reduction <maximumf>, %64, %cst_30 [1] : vector<16x16xf32> to vector<16xf32>
    %66 = vector.shape_cast %65 : vector<16xf32> to vector<16x1xf32>
    %67 = vector.broadcast %66 : vector<16x1xf32> to vector<16x16xf32>
    %68 = arith.subf %64, %67 : vector<16x16xf32>
    %69 = math.exp %68 : vector<16x16xf32>
    %cst_31 = arith.constant dense<0.000000e+00> : vector<16xf32>
    %70 = vector.multi_reduction <add>, %69, %cst_31 [1] : vector<16x16xf32> to vector<16xf32>
    %71 = vector.shape_cast %70 : vector<16xf32> to vector<16x1xf32>
    %72 = tpu.reciprocal %71 {approx = true} : vector<16x1xf32> -> vector<16x1xf32>
    %73 = vector.broadcast %72 : vector<16x1xf32> to vector<16x16xf32>
    %74 = arith.mulf %69, %73 : vector<16x16xf32>
    %cst_32 = arith.constant dense<0.000000e+00> : vector<16x8xf32>
    %75 = tpu.matmul %74, %62, %cst_32 {dimension_numbers = #tpu.dot_dimension_numbers<[1], [0], [0], [1], [0, 0, 1, 1], [], []>} : vector<16x16xf32>, vector<16x8xf32>, vector<16x8xf32> -> vector<16x8xf32>
    %76 = vector.extract_strided_slice %14 {offsets = [0, 24], sizes = [16, 8], strides = [1, 1]} : vector<16x32xf32> to vector<16x8xf32>
    %cst_33 = arith.constant 0.353553385 : f32
    %77 = vector.broadcast %cst_33 : f32 to vector<16x8xf32>
    %78 = arith.mulf %76, %77 : vector<16x8xf32>
    %79 = vector.extract_strided_slice %15 {offsets = [0, 24], sizes = [16, 8], strides = [1, 1]} : vector<16x32xf32> to vector<16x8xf32>
    %80 = vector.extract_strided_slice %16 {offsets = [0, 24], sizes = [16, 8], strides = [1, 1]} : vector<16x32xf32> to vector<16x8xf32>
    %cst_34 = arith.constant dense<0.000000e+00> : vector<16x16xf32>
    %81 = tpu.matmul %78, %79, %cst_34 {dimension_numbers = #tpu.dot_dimension_numbers<[1], [1], [0], [0], [0, 0, 1, 0], [], []>} : vector<16x8xf32>, vector<16x8xf32>, vector<16x16xf32> -> vector<16x16xf32>
    %82 = arith.addf %81, %21 : vector<16x16xf32>
    %cst_35 = arith.constant dense<0xFF800000> : vector<16xf32>
    %83 = vector.multi_reduction <maximumf>, %82, %cst_35 [1] : vector<16x16xf32> to vector<16xf32>
    %84 = vector.shape_cast %83 : vector<16xf32> to vector<16x1xf32>
    %85 = vector.broadcast %84 : vector<16x1xf32> to vector<16x16xf32>
    %86 = arith.subf %82, %85 : vector<16x16xf32>
    %87 = math.exp %86 : vector<16x16xf32>
    %cst_36 = arith.constant dense<0.000000e+00> : vector<16xf32>
    %88 = vector.multi_reduction <add>, %87, %cst_36 [1] : vector<16x16xf32> to vector<16xf32>
    %89 = vector.shape_cast %88 : vector<16xf32> to vector<16x1xf32>
    %90 = tpu.reciprocal %89 {approx = true} : vector<16x1xf32> -> vector<16x1xf32>
    %91 = vector.broadcast %90 : vector<16x1xf32> to vector<16x16xf32>
    %92 = arith.mulf %87, %91 : vector<16x16xf32>
    %cst_37 = arith.constant dense<0.000000e+00> : vector<16x8xf32>
    %93 = tpu.matmul %92, %80, %cst_37 {dimension_numbers = #tpu.dot_dimension_numbers<[1], [0], [0], [1], [0, 0, 1, 1], [], []>} : vector<16x16xf32>, vector<16x8xf32>, vector<16x8xf32> -> vector<16x8xf32>
    %94 = tpu.concatenate %39, %57, %75, %93 in 1 : vector<16x8xf32>, vector<16x8xf32>, vector<16x8xf32>, vector<16x8xf32> -> vector<16x32xf32>
    %95 = arith.truncf %94 : vector<16x32xf32> to vector<16x32xbf16>
    %cst_38 = arith.constant dense<0.000000e+00> : vector<16x32xf32>
    %96 = tpu.matmul %95, %18, %cst_38 {dimension_numbers = #tpu.dot_dimension_numbers<[1], [0], [0], [1], [0, 0, 1, 1], [], []>} : vector<16x32xbf16>, vector<32x32xbf16>, vector<16x32xf32> -> vector<16x32xf32>
    %97 = vector.broadcast %20 : vector<1x32xf32> to vector<16x32xf32>
    %98 = arith.addf %96, %97 : vector<16x32xf32>
    %99 = arith.addf %3, %98 : vector<16x32xf32>
    %c0_39 = arith.constant 0 : index
    %c0_40 = arith.constant 0 : index
    %c0_41 = arith.constant 0 : index
    %100 = vector.load %arg12[%c0_39, %c0_40, %c0_41] : memref<1x1x32xf32, #tpu.memory_space<vmem>>, vector<1x1x32xf32>
    %101 = vector.shape_cast %100 : vector<1x1x32xf32> to vector<1x32xf32>
    %c0_42 = arith.constant 0 : index
    %c0_43 = arith.constant 0 : index
    %c0_44 = arith.constant 0 : index
    %102 = vector.load %arg13[%c0_42, %c0_43, %c0_44] : memref<1x1x32xf32, #tpu.memory_space<vmem>>, vector<1x1x32xf32>
    %103 = vector.shape_cast %102 : vector<1x1x32xf32> to vector<1x32xf32>
    %cst_45 = arith.constant dense<0.000000e+00> : vector<16xf32>
    %104 = vector.multi_reduction <add>, %99, %cst_45 [1] : vector<16x32xf32> to vector<16xf32>
    %105 = vector.shape_cast %104 : vector<16xf32> to vector<16x1xf32>
    %cst_46 = arith.constant 3.200000e+01 : f32
    %106 = vector.broadcast %cst_46 : f32 to vector<16x1xf32>
    %107 = arith.divf %105, %106 : vector<16x1xf32>
    %108 = vector.broadcast %107 : vector<16x1xf32> to vector<16x32xf32>
    %109 = arith.subf %99, %108 : vector<16x32xf32>
    %110 = arith.mulf %109, %109 : vector<16x32xf32>
    %cst_47 = arith.constant dense<0.000000e+00> : vector<16xf32>
    %111 = vector.multi_reduction <add>, %110, %cst_47 [1] : vector<16x32xf32> to vector<16xf32>
    %112 = vector.shape_cast %111 : vector<16xf32> to vector<16x1xf32>
    %cst_48 = arith.constant 3.200000e+01 : f32
    %113 = vector.broadcast %cst_48 : f32 to vector<16x1xf32>
    %114 = arith.divf %112, %113 : vector<16x1xf32>
    %cst_49 = arith.constant 9.99999974E-6 : f32
    %115 = vector.broadcast %cst_49 : f32 to vector<16x1xf32>
    %116 = arith.addf %114, %115 : vector<16x1xf32>
    %117 = math.rsqrt %116 : vector<16x1xf32>
    %118 = vector.broadcast %117 : vector<16x1xf32> to vector<16x32xf32>
    %119 = arith.mulf %109, %118 : vector<16x32xf32>
    %120 = vector.broadcast %101 : vector<1x32xf32> to vector<16x32xf32>
    %121 = arith.mulf %119, %120 : vector<16x32xf32>
    %122 = vector.broadcast %103 : vector<1x32xf32> to vector<16x32xf32>
    %123 = arith.addf %121, %122 : vector<16x32xf32>
    %c0_50 = arith.constant 0 : index
    %c0_51 = arith.constant 0 : index
    %c0_52 = arith.constant 0 : index
    %124 = vector.load %arg16[%c0_50, %c0_51, %c0_52] : memref<1x32x64xbf16, #tpu.memory_space<vmem>>, vector<1x32x64xbf16>
    %125 = vector.shape_cast %124 : vector<1x32x64xbf16> to vector<32x64xbf16>
    %cst_53 = arith.constant dense<0.000000e+00> : vector<16x64xf32>
    %126 = tpu.matmul %5, %125, %cst_53 {dimension_numbers = #tpu.dot_dimension_numbers<[1], [0], [0], [1], [0, 0, 1, 1], [], []>} : vector<16x32xbf16>, vector<32x64xbf16>, vector<16x64xf32> -> vector<16x64xf32>
    %c0_54 = arith.constant 0 : index
    %c0_55 = arith.constant 0 : index
    %c0_56 = arith.constant 0 : index
    %127 = vector.load %arg17[%c0_54, %c0_55, %c0_56] : memref<1x1x64xf32, #tpu.memory_space<vmem>>, vector<1x1x64xf32>
    %128 = vector.shape_cast %127 : vector<1x1x64xf32> to vector<1x64xf32>
    %129 = vector.broadcast %128 : vector<1x64xf32> to vector<16x64xf32>
    %130 = arith.addf %126, %129 : vector<16x64xf32>
    %131 = arith.truncf %123 : vector<16x32xf32> to vector<16x32xbf16>
    %c0_57 = arith.constant 0 : index
    %c0_58 = arith.constant 0 : index
    %c0_59 = arith.constant 0 : index
    %132 = vector.load %arg14[%c0_57, %c0_58, %c0_59] : memref<1x32x32xbf16, #tpu.memory_space<vmem>>, vector<1x32x32xbf16>
    %133 = vector.shape_cast %132 : vector<1x32x32xbf16> to vector<32x32xbf16>
    %cst_60 = arith.constant dense<0.000000e+00> : vector<16x32xf32>
    %134 = tpu.matmul %131, %133, %cst_60 {dimension_numbers = #tpu.dot_dimension_numbers<[1], [0], [0], [1], [0, 0, 1, 1], [], []>} : vector<16x32xbf16>, vector<32x32xbf16>, vector<16x32xf32> -> vector<16x32xf32>
    %c0_61 = arith.constant 0 : index
    %c0_62 = arith.constant 0 : index
    %c0_63 = arith.constant 0 : index
    %135 = vector.load %arg15[%c0_61, %c0_62, %c0_63] : memref<1x1x32xf32, #tpu.memory_space<vmem>>, vector<1x1x32xf32>
    %136 = vector.shape_cast %135 : vector<1x1x32xf32> to vector<1x32xf32>
    %137 = vector.broadcast %136 : vector<1x32xf32> to vector<16x32xf32>
    %138 = arith.addf %134, %137 : vector<16x32xf32>
    %139 = vector.extract_strided_slice %130 {offsets = [0, 0], sizes = [16, 32], strides = [1, 1]} : vector<16x64xf32> to vector<16x32xf32>
    %140 = vector.extract_strided_slice %130 {offsets = [0, 32], sizes = [16, 32], strides = [1, 1]} : vector<16x64xf32> to vector<16x32xf32>
    %c0_64 = arith.constant 0 : index
    %c0_65 = arith.constant 0 : index
    %c0_66 = arith.constant 0 : index
    %141 = vector.load %arg18[%c0_64, %c0_65, %c0_66] : memref<1x32x32xbf16, #tpu.memory_space<vmem>>, vector<1x32x32xbf16>
    %142 = vector.shape_cast %141 : vector<1x32x32xbf16> to vector<32x32xbf16>
    %c0_67 = arith.constant 0 : index
    %c0_68 = arith.constant 0 : index
    %c0_69 = arith.constant 0 : index
    %143 = vector.load %arg19[%c0_67, %c0_68, %c0_69] : memref<1x1x32xf32, #tpu.memory_space<vmem>>, vector<1x1x32xf32>
    %144 = vector.shape_cast %143 : vector<1x1x32xf32> to vector<1x32xf32>
    %c0_70 = arith.constant 0 : index
    %c0_71 = arith.constant 0 : index
    %145 = vector.load %arg7[%c0_70, %c0_71] : memref<16x16xf32, #tpu.memory_space<vmem>>, vector<16x16xf32>
    %146 = vector.extract_strided_slice %138 {offsets = [0, 0], sizes = [16, 8], strides = [1, 1]} : vector<16x32xf32> to vector<16x8xf32>
    %cst_72 = arith.constant 0.353553385 : f32
    %147 = vector.broadcast %cst_72 : f32 to vector<16x8xf32>
    %148 = arith.mulf %146, %147 : vector<16x8xf32>
    %149 = vector.extract_strided_slice %139 {offsets = [0, 0], sizes = [16, 8], strides = [1, 1]} : vector<16x32xf32> to vector<16x8xf32>
    %150 = vector.extract_strided_slice %140 {offsets = [0, 0], sizes = [16, 8], strides = [1, 1]} : vector<16x32xf32> to vector<16x8xf32>
    %cst_73 = arith.constant dense<0.000000e+00> : vector<16x16xf32>
    %151 = tpu.matmul %148, %149, %cst_73 {dimension_numbers = #tpu.dot_dimension_numbers<[1], [1], [0], [0], [0, 0, 1, 0], [], []>} : vector<16x8xf32>, vector<16x8xf32>, vector<16x16xf32> -> vector<16x16xf32>
    %152 = arith.addf %151, %145 : vector<16x16xf32>
    %cst_74 = arith.constant dense<0xFF800000> : vector<16xf32>
    %153 = vector.multi_reduction <maximumf>, %152, %cst_74 [1] : vector<16x16xf32> to vector<16xf32>
    %154 = vector.shape_cast %153 : vector<16xf32> to vector<16x1xf32>
    %155 = vector.broadcast %154 : vector<16x1xf32> to vector<16x16xf32>
    %156 = arith.subf %152, %155 : vector<16x16xf32>
    %157 = math.exp %156 : vector<16x16xf32>
    %cst_75 = arith.constant dense<0.000000e+00> : vector<16xf32>
    %158 = vector.multi_reduction <add>, %157, %cst_75 [1] : vector<16x16xf32> to vector<16xf32>
    %159 = vector.shape_cast %158 : vector<16xf32> to vector<16x1xf32>
    %160 = tpu.reciprocal %159 {approx = true} : vector<16x1xf32> -> vector<16x1xf32>
    %161 = vector.broadcast %160 : vector<16x1xf32> to vector<16x16xf32>
    %162 = arith.mulf %157, %161 : vector<16x16xf32>
    %cst_76 = arith.constant dense<0.000000e+00> : vector<16x8xf32>
    %163 = tpu.matmul %162, %150, %cst_76 {dimension_numbers = #tpu.dot_dimension_numbers<[1], [0], [0], [1], [0, 0, 1, 1], [], []>} : vector<16x16xf32>, vector<16x8xf32>, vector<16x8xf32> -> vector<16x8xf32>
    %164 = vector.extract_strided_slice %138 {offsets = [0, 8], sizes = [16, 8], strides = [1, 1]} : vector<16x32xf32> to vector<16x8xf32>
    %cst_77 = arith.constant 0.353553385 : f32
    %165 = vector.broadcast %cst_77 : f32 to vector<16x8xf32>
    %166 = arith.mulf %164, %165 : vector<16x8xf32>
    %167 = vector.extract_strided_slice %139 {offsets = [0, 8], sizes = [16, 8], strides = [1, 1]} : vector<16x32xf32> to vector<16x8xf32>
    %168 = vector.extract_strided_slice %140 {offsets = [0, 8], sizes = [16, 8], strides = [1, 1]} : vector<16x32xf32> to vector<16x8xf32>
    %cst_78 = arith.constant dense<0.000000e+00> : vector<16x16xf32>
    %169 = tpu.matmul %166, %167, %cst_78 {dimension_numbers = #tpu.dot_dimension_numbers<[1], [1], [0], [0], [0, 0, 1, 0], [], []>} : vector<16x8xf32>, vector<16x8xf32>, vector<16x16xf32> -> vector<16x16xf32>
    %170 = arith.addf %169, %145 : vector<16x16xf32>
    %cst_79 = arith.constant dense<0xFF800000> : vector<16xf32>
    %171 = vector.multi_reduction <maximumf>, %170, %cst_79 [1] : vector<16x16xf32> to vector<16xf32>
    %172 = vector.shape_cast %171 : vector<16xf32> to vector<16x1xf32>
    %173 = vector.broadcast %172 : vector<16x1xf32> to vector<16x16xf32>
    %174 = arith.subf %170, %173 : vector<16x16xf32>
    %175 = math.exp %174 : vector<16x16xf32>
    %cst_80 = arith.constant dense<0.000000e+00> : vector<16xf32>
    %176 = vector.multi_reduction <add>, %175, %cst_80 [1] : vector<16x16xf32> to vector<16xf32>
    %177 = vector.shape_cast %176 : vector<16xf32> to vector<16x1xf32>
    %178 = tpu.reciprocal %177 {approx = true} : vector<16x1xf32> -> vector<16x1xf32>
    %179 = vector.broadcast %178 : vector<16x1xf32> to vector<16x16xf32>
    %180 = arith.mulf %175, %179 : vector<16x16xf32>
    %cst_81 = arith.constant dense<0.000000e+00> : vector<16x8xf32>
    %181 = tpu.matmul %180, %168, %cst_81 {dimension_numbers = #tpu.dot_dimension_numbers<[1], [0], [0], [1], [0, 0, 1, 1], [], []>} : vector<16x16xf32>, vector<16x8xf32>, vector<16x8xf32> -> vector<16x8xf32>
    %182 = vector.extract_strided_slice %138 {offsets = [0, 16], sizes = [16, 8], strides = [1, 1]} : vector<16x32xf32> to vector<16x8xf32>
    %cst_82 = arith.constant 0.353553385 : f32
    %183 = vector.broadcast %cst_82 : f32 to vector<16x8xf32>
    %184 = arith.mulf %182, %183 : vector<16x8xf32>
    %185 = vector.extract_strided_slice %139 {offsets = [0, 16], sizes = [16, 8], strides = [1, 1]} : vector<16x32xf32> to vector<16x8xf32>
    %186 = vector.extract_strided_slice %140 {offsets = [0, 16], sizes = [16, 8], strides = [1, 1]} : vector<16x32xf32> to vector<16x8xf32>
    %cst_83 = arith.constant dense<0.000000e+00> : vector<16x16xf32>
    %187 = tpu.matmul %184, %185, %cst_83 {dimension_numbers = #tpu.dot_dimension_numbers<[1], [1], [0], [0], [0, 0, 1, 0], [], []>} : vector<16x8xf32>, vector<16x8xf32>, vector<16x16xf32> -> vector<16x16xf32>
    %188 = arith.addf %187, %145 : vector<16x16xf32>
    %cst_84 = arith.constant dense<0xFF800000> : vector<16xf32>
    %189 = vector.multi_reduction <maximumf>, %188, %cst_84 [1] : vector<16x16xf32> to vector<16xf32>
    %190 = vector.shape_cast %189 : vector<16xf32> to vector<16x1xf32>
    %191 = vector.broadcast %190 : vector<16x1xf32> to vector<16x16xf32>
    %192 = arith.subf %188, %191 : vector<16x16xf32>
    %193 = math.exp %192 : vector<16x16xf32>
    %cst_85 = arith.constant dense<0.000000e+00> : vector<16xf32>
    %194 = vector.multi_reduction <add>, %193, %cst_85 [1] : vector<16x16xf32> to vector<16xf32>
    %195 = vector.shape_cast %194 : vector<16xf32> to vector<16x1xf32>
    %196 = tpu.reciprocal %195 {approx = true} : vector<16x1xf32> -> vector<16x1xf32>
    %197 = vector.broadcast %196 : vector<16x1xf32> to vector<16x16xf32>
    %198 = arith.mulf %193, %197 : vector<16x16xf32>
    %cst_86 = arith.constant dense<0.000000e+00> : vector<16x8xf32>
    %199 = tpu.matmul %198, %186, %cst_86 {dimension_numbers = #tpu.dot_dimension_numbers<[1], [0], [0], [1], [0, 0, 1, 1], [], []>} : vector<16x16xf32>, vector<16x8xf32>, vector<16x8xf32> -> vector<16x8xf32>
    %200 = vector.extract_strided_slice %138 {offsets = [0, 24], sizes = [16, 8], strides = [1, 1]} : vector<16x32xf32> to vector<16x8xf32>
    %cst_87 = arith.constant 0.353553385 : f32
    %201 = vector.broadcast %cst_87 : f32 to vector<16x8xf32>
    %202 = arith.mulf %200, %201 : vector<16x8xf32>
    %203 = vector.extract_strided_slice %139 {offsets = [0, 24], sizes = [16, 8], strides = [1, 1]} : vector<16x32xf32> to vector<16x8xf32>
    %204 = vector.extract_strided_slice %140 {offsets = [0, 24], sizes = [16, 8], strides = [1, 1]} : vector<16x32xf32> to vector<16x8xf32>
    %cst_88 = arith.constant dense<0.000000e+00> : vector<16x16xf32>
    %205 = tpu.matmul %202, %203, %cst_88 {dimension_numbers = #tpu.dot_dimension_numbers<[1], [1], [0], [0], [0, 0, 1, 0], [], []>} : vector<16x8xf32>, vector<16x8xf32>, vector<16x16xf32> -> vector<16x16xf32>
    %206 = arith.addf %205, %145 : vector<16x16xf32>
    %cst_89 = arith.constant dense<0xFF800000> : vector<16xf32>
    %207 = vector.multi_reduction <maximumf>, %206, %cst_89 [1] : vector<16x16xf32> to vector<16xf32>
    %208 = vector.shape_cast %207 : vector<16xf32> to vector<16x1xf32>
    %209 = vector.broadcast %208 : vector<16x1xf32> to vector<16x16xf32>
    %210 = arith.subf %206, %209 : vector<16x16xf32>
    %211 = math.exp %210 : vector<16x16xf32>
    %cst_90 = arith.constant dense<0.000000e+00> : vector<16xf32>
    %212 = vector.multi_reduction <add>, %211, %cst_90 [1] : vector<16x16xf32> to vector<16xf32>
    %213 = vector.shape_cast %212 : vector<16xf32> to vector<16x1xf32>
    %214 = tpu.reciprocal %213 {approx = true} : vector<16x1xf32> -> vector<16x1xf32>
    %215 = vector.broadcast %214 : vector<16x1xf32> to vector<16x16xf32>
    %216 = arith.mulf %211, %215 : vector<16x16xf32>
    %cst_91 = arith.constant dense<0.000000e+00> : vector<16x8xf32>
    %217 = tpu.matmul %216, %204, %cst_91 {dimension_numbers = #tpu.dot_dimension_numbers<[1], [0], [0], [1], [0, 0, 1, 1], [], []>} : vector<16x16xf32>, vector<16x8xf32>, vector<16x8xf32> -> vector<16x8xf32>
    %218 = tpu.concatenate %163, %181, %199, %217 in 1 : vector<16x8xf32>, vector<16x8xf32>, vector<16x8xf32>, vector<16x8xf32> -> vector<16x32xf32>
    %219 = arith.truncf %218 : vector<16x32xf32> to vector<16x32xbf16>
    %cst_92 = arith.constant dense<0.000000e+00> : vector<16x32xf32>
    %220 = tpu.matmul %219, %142, %cst_92 {dimension_numbers = #tpu.dot_dimension_numbers<[1], [0], [0], [1], [0, 0, 1, 1], [], []>} : vector<16x32xbf16>, vector<32x32xbf16>, vector<16x32xf32> -> vector<16x32xf32>
    %221 = vector.broadcast %144 : vector<1x32xf32> to vector<16x32xf32>
    %222 = arith.addf %220, %221 : vector<16x32xf32>
    %223 = arith.addf %123, %222 : vector<16x32xf32>
    %c0_93 = arith.constant 0 : index
    %c0_94 = arith.constant 0 : index
    %c0_95 = arith.constant 0 : index
    %224 = vector.load %arg20[%c0_93, %c0_94, %c0_95] : memref<1x1x32xf32, #tpu.memory_space<vmem>>, vector<1x1x32xf32>
    %225 = vector.shape_cast %224 : vector<1x1x32xf32> to vector<1x32xf32>
    %c0_96 = arith.constant 0 : index
    %c0_97 = arith.constant 0 : index
    %c0_98 = arith.constant 0 : index
    %226 = vector.load %arg21[%c0_96, %c0_97, %c0_98] : memref<1x1x32xf32, #tpu.memory_space<vmem>>, vector<1x1x32xf32>
    %227 = vector.shape_cast %226 : vector<1x1x32xf32> to vector<1x32xf32>
    %cst_99 = arith.constant dense<0.000000e+00> : vector<16xf32>
    %228 = vector.multi_reduction <add>, %223, %cst_99 [1] : vector<16x32xf32> to vector<16xf32>
    %229 = vector.shape_cast %228 : vector<16xf32> to vector<16x1xf32>
    %cst_100 = arith.constant 3.200000e+01 : f32
    %230 = vector.broadcast %cst_100 : f32 to vector<16x1xf32>
    %231 = arith.divf %229, %230 : vector<16x1xf32>
    %232 = vector.broadcast %231 : vector<16x1xf32> to vector<16x32xf32>
    %233 = arith.subf %223, %232 : vector<16x32xf32>
    %234 = arith.mulf %233, %233 : vector<16x32xf32>
    %cst_101 = arith.constant dense<0.000000e+00> : vector<16xf32>
    %235 = vector.multi_reduction <add>, %234, %cst_101 [1] : vector<16x32xf32> to vector<16xf32>
    %236 = vector.shape_cast %235 : vector<16xf32> to vector<16x1xf32>
    %cst_102 = arith.constant 3.200000e+01 : f32
    %237 = vector.broadcast %cst_102 : f32 to vector<16x1xf32>
    %238 = arith.divf %236, %237 : vector<16x1xf32>
    %cst_103 = arith.constant 9.99999974E-6 : f32
    %239 = vector.broadcast %cst_103 : f32 to vector<16x1xf32>
    %240 = arith.addf %238, %239 : vector<16x1xf32>
    %241 = math.rsqrt %240 : vector<16x1xf32>
    %242 = vector.broadcast %241 : vector<16x1xf32> to vector<16x32xf32>
    %243 = arith.mulf %233, %242 : vector<16x32xf32>
    %244 = vector.broadcast %225 : vector<1x32xf32> to vector<16x32xf32>
    %245 = arith.mulf %243, %244 : vector<16x32xf32>
    %246 = vector.broadcast %227 : vector<1x32xf32> to vector<16x32xf32>
    %247 = arith.addf %245, %246 : vector<16x32xf32>
    %248 = arith.truncf %247 : vector<16x32xf32> to vector<16x32xbf16>
    %c0_104 = arith.constant 0 : index
    %c0_105 = arith.constant 0 : index
    %c0_106 = arith.constant 0 : index
    %249 = vector.load %arg22[%c0_104, %c0_105, %c0_106] : memref<1x32x64xbf16, #tpu.memory_space<vmem>>, vector<1x32x64xbf16>
    %250 = vector.shape_cast %249 : vector<1x32x64xbf16> to vector<32x64xbf16>
    %cst_107 = arith.constant dense<0.000000e+00> : vector<16x64xf32>
    %251 = tpu.matmul %248, %250, %cst_107 {dimension_numbers = #tpu.dot_dimension_numbers<[1], [0], [0], [1], [0, 0, 1, 1], [], []>} : vector<16x32xbf16>, vector<32x64xbf16>, vector<16x64xf32> -> vector<16x64xf32>
    %c0_108 = arith.constant 0 : index
    %c0_109 = arith.constant 0 : index
    %c0_110 = arith.constant 0 : index
    %252 = vector.load %arg23[%c0_108, %c0_109, %c0_110] : memref<1x1x64xf32, #tpu.memory_space<vmem>>, vector<1x1x64xf32>
    %253 = vector.shape_cast %252 : vector<1x1x64xf32> to vector<1x64xf32>
    %254 = vector.broadcast %253 : vector<1x64xf32> to vector<16x64xf32>
    %255 = arith.addf %251, %254 : vector<16x64xf32>
    %cst_111 = arith.constant 0.000000e+00 : f32
    %256 = vector.broadcast %cst_111 : f32 to vector<16x64xf32>
    %257 = arith.maximumf %255, %256 : vector<16x64xf32>
    %258 = arith.truncf %257 : vector<16x64xf32> to vector<16x64xbf16>
    %c0_112 = arith.constant 0 : index
    %c0_113 = arith.constant 0 : index
    %c0_114 = arith.constant 0 : index
    %259 = vector.load %arg24[%c0_112, %c0_113, %c0_114] : memref<1x64x32xbf16, #tpu.memory_space<vmem>>, vector<1x64x32xbf16>
    %260 = vector.shape_cast %259 : vector<1x64x32xbf16> to vector<64x32xbf16>
    %cst_115 = arith.constant dense<0.000000e+00> : vector<16x32xf32>
    %261 = tpu.matmul %258, %260, %cst_115 {dimension_numbers = #tpu.dot_dimension_numbers<[1], [0], [0], [1], [0, 0, 1, 1], [], []>} : vector<16x64xbf16>, vector<64x32xbf16>, vector<16x32xf32> -> vector<16x32xf32>
    %c0_116 = arith.constant 0 : index
    %c0_117 = arith.constant 0 : index
    %c0_118 = arith.constant 0 : index
    %262 = vector.load %arg25[%c0_116, %c0_117, %c0_118] : memref<1x1x32xf32, #tpu.memory_space<vmem>>, vector<1x1x32xf32>
    %263 = vector.shape_cast %262 : vector<1x1x32xf32> to vector<1x32xf32>
    %264 = vector.broadcast %263 : vector<1x32xf32> to vector<16x32xf32>
    %265 = arith.addf %261, %264 : vector<16x32xf32>
    %266 = arith.addf %247, %265 : vector<16x32xf32>
    %c0_119 = arith.constant 0 : index
    %c0_120 = arith.constant 0 : index
    %c0_121 = arith.constant 0 : index
    %267 = vector.load %arg26[%c0_119, %c0_120, %c0_121] : memref<1x1x32xf32, #tpu.memory_space<vmem>>, vector<1x1x32xf32>
    %268 = vector.shape_cast %267 : vector<1x1x32xf32> to vector<1x32xf32>
    %c0_122 = arith.constant 0 : index
    %c0_123 = arith.constant 0 : index
    %c0_124 = arith.constant 0 : index
    %269 = vector.load %arg27[%c0_122, %c0_123, %c0_124] : memref<1x1x32xf32, #tpu.memory_space<vmem>>, vector<1x1x32xf32>
    %270 = vector.shape_cast %269 : vector<1x1x32xf32> to vector<1x32xf32>
    %cst_125 = arith.constant dense<0.000000e+00> : vector<16xf32>
    %271 = vector.multi_reduction <add>, %266, %cst_125 [1] : vector<16x32xf32> to vector<16xf32>
    %272 = vector.shape_cast %271 : vector<16xf32> to vector<16x1xf32>
    %cst_126 = arith.constant 3.200000e+01 : f32
    %273 = vector.broadcast %cst_126 : f32 to vector<16x1xf32>
    %274 = arith.divf %272, %273 : vector<16x1xf32>
    %275 = vector.broadcast %274 : vector<16x1xf32> to vector<16x32xf32>
    %276 = arith.subf %266, %275 : vector<16x32xf32>
    %277 = arith.mulf %276, %276 : vector<16x32xf32>
    %cst_127 = arith.constant dense<0.000000e+00> : vector<16xf32>
    %278 = vector.multi_reduction <add>, %277, %cst_127 [1] : vector<16x32xf32> to vector<16xf32>
    %279 = vector.shape_cast %278 : vector<16xf32> to vector<16x1xf32>
    %cst_128 = arith.constant 3.200000e+01 : f32
    %280 = vector.broadcast %cst_128 : f32 to vector<16x1xf32>
    %281 = arith.divf %279, %280 : vector<16x1xf32>
    %cst_129 = arith.constant 9.99999974E-6 : f32
    %282 = vector.broadcast %cst_129 : f32 to vector<16x1xf32>
    %283 = arith.addf %281, %282 : vector<16x1xf32>
    %284 = math.rsqrt %283 : vector<16x1xf32>
    %285 = vector.broadcast %284 : vector<16x1xf32> to vector<16x32xf32>
    %286 = arith.mulf %276, %285 : vector<16x32xf32>
    %287 = vector.broadcast %268 : vector<1x32xf32> to vector<16x32xf32>
    %288 = arith.mulf %286, %287 : vector<16x32xf32>
    %289 = vector.broadcast %270 : vector<1x32xf32> to vector<16x32xf32>
    %290 = arith.addf %288, %289 : vector<16x32xf32>
    %c0_130 = arith.constant 0 : index
    %c0_131 = arith.constant 0 : index
    %291 = vector.load %arg33[%c0_130, %c0_131] : memref<16x32xf32, #tpu.memory_space<vmem>>, vector<16x32xf32>
    tpu.vector_store %arg33[%c0_130, %c0_131], %290 {strides = array<i32>} : memref<16x32xf32, #tpu.memory_space<vmem>>, vector<16x32xf32>,
    %c5_i32 = arith.constant 5 : i32
    %292 = arith.cmpi eq, %arg0, %c5_i32 : i32
    %293 = arith.extui %292 : i1 to i32
    %c0_i32_132 = arith.constant 0 : i32
    %294 = arith.cmpi ne, %293, %c0_i32_132 : i32
    scf.if %294 {
      %c0_133 = arith.constant 0 : index
      %c0_134 = arith.constant 0 : index
      %295 = vector.load %arg28[%c0_133, %c0_134] : memref<1x32xf32, #tpu.memory_space<vmem>>, vector<1x32xf32>
      %c0_135 = arith.constant 0 : index
      %c0_136 = arith.constant 0 : index
      %296 = vector.load %arg29[%c0_135, %c0_136] : memref<1x32xf32, #tpu.memory_space<vmem>>, vector<1x32xf32>
      %cst_137 = arith.constant dense<0.000000e+00> : vector<16xf32>
      %297 = vector.multi_reduction <add>, %290, %cst_137 [1] : vector<16x32xf32> to vector<16xf32>
      %298 = vector.shape_cast %297 : vector<16xf32> to vector<16x1xf32>
      %cst_138 = arith.constant 3.200000e+01 : f32
      %299 = vector.broadcast %cst_138 : f32 to vector<16x1xf32>
      %300 = arith.divf %298, %299 : vector<16x1xf32>
      %301 = vector.broadcast %300 : vector<16x1xf32> to vector<16x32xf32>
      %302 = arith.subf %290, %301 : vector<16x32xf32>
      %303 = arith.mulf %302, %302 : vector<16x32xf32>
      %cst_139 = arith.constant dense<0.000000e+00> : vector<16xf32>
      %304 = vector.multi_reduction <add>, %303, %cst_139 [1] : vector<16x32xf32> to vector<16xf32>
      %305 = vector.shape_cast %304 : vector<16xf32> to vector<16x1xf32>
      %cst_140 = arith.constant 3.200000e+01 : f32
      %306 = vector.broadcast %cst_140 : f32 to vector<16x1xf32>
      %307 = arith.divf %305, %306 : vector<16x1xf32>
      %cst_141 = arith.constant 9.99999974E-6 : f32
      %308 = vector.broadcast %cst_141 : f32 to vector<16x1xf32>
      %309 = arith.addf %307, %308 : vector<16x1xf32>
      %310 = math.rsqrt %309 : vector<16x1xf32>
      %311 = vector.broadcast %310 : vector<16x1xf32> to vector<16x32xf32>
      %312 = arith.mulf %302, %311 : vector<16x32xf32>
      %313 = vector.broadcast %295 : vector<1x32xf32> to vector<16x32xf32>
      %314 = arith.mulf %312, %313 : vector<16x32xf32>
      %315 = vector.broadcast %296 : vector<1x32xf32> to vector<16x32xf32>
      %316 = arith.addf %314, %315 : vector<16x32xf32>
      %c0_142 = arith.constant 0 : index
      %c0_143 = arith.constant 0 : index
      %317 = vector.load %arg30[%c0_142, %c0_143] : memref<1x32xf32, #tpu.memory_space<vmem>>, vector<1x32xf32>
      %cst_144 = arith.constant dense<0.000000e+00> : vector<1x16xf32>
      %318 = tpu.matmul %317, %316, %cst_144 {dimension_numbers = #tpu.dot_dimension_numbers<[1], [1], [0], [0], [0, 0, 1, 0], [], []>} : vector<1x32xf32>, vector<16x32xf32>, vector<1x16xf32> -> vector<1x16xf32>
      %c0_145 = arith.constant 0 : index
      %c0_146 = arith.constant 0 : index
      %319 = vector.load %arg31[%c0_145, %c0_146] : memref<1x1xf32, #tpu.memory_space<vmem>>, vector<1x1xf32>
      %320 = vector.broadcast %319 : vector<1x1xf32> to vector<1x16xf32>
      %321 = arith.addf %318, %320 : vector<1x16xf32>
      %c0_147 = arith.constant 0 : index
      %c0_148 = arith.constant 0 : index
      %322 = vector.load %arg32[%c0_147, %c0_148] : memref<1x16xf32, #tpu.memory_space<vmem>>, vector<1x16xf32>
      tpu.vector_store %arg32[%c0_147, %c0_148], %321 {strides = array<i32>} : memref<1x16xf32, #tpu.memory_space<vmem>>, vector<1x16xf32>,
    } else {
    }
    return
  }
  func.func @transform_0(%arg0: i32) -> (i32, i32) {
    %c0_i32 = arith.constant 0 : i32
    %c0_i32_0 = arith.constant 0 : i32
    %c0_i32_1 = arith.constant 0 : i32
    return %c0_i32, %c0_i32_0 : i32, i32
  }
  func.func @transform_1(%arg0: i32) -> (i32, i32) {
    %c0_i32 = arith.constant 0 : i32
    %c0_i32_0 = arith.constant 0 : i32
    %c0_i32_1 = arith.constant 0 : i32
    return %c0_i32, %c0_i32_0 : i32, i32
  }
  func.func @transform_2(%arg0: i32) -> (i32, i32) {
    %c0_i32 = arith.constant 0 : i32
    %c0_i32_0 = arith.constant 0 : i32
    %c0_i32_1 = arith.constant 0 : i32
    return %c0_i32, %c0_i32_0 : i32, i32
  }
  func.func @transform_3(%arg0: i32) -> (i32, i32) {
    %c0_i32 = arith.constant 0 : i32
    %c0_i32_0 = arith.constant 0 : i32
    %c0_i32_1 = arith.constant 0 : i32
    return %c0_i32, %c0_i32_0 : i32, i32
  }
  func.func @transform_4(%arg0: i32) -> (i32, i32) {
    %c0_i32 = arith.constant 0 : i32
    %c0_i32_0 = arith.constant 0 : i32
    %c0_i32_1 = arith.constant 0 : i32
    return %c0_i32, %c0_i32_0 : i32, i32
  }
  func.func @transform_5(%arg0: i32) -> (i32, i32) {
    %c0_i32 = arith.constant 0 : i32
    %c0_i32_0 = arith.constant 0 : i32
    %c0_i32_1 = arith.constant 0 : i32
    return %c0_i32, %c0_i32_0 : i32, i32
  }
  func.func @transform_6(%arg0: i32) -> (i32, i32) {
    %c0_i32 = arith.constant 0 : i32
    %c0_i32_0 = arith.constant 0 : i32
    %c0_i32_1 = arith.constant 0 : i32
    return %c0_i32, %c0_i32_0 : i32, i32
  }
  func.func @transform_7(%arg0: i32) -> (i32, i32, i32) {
    %c0_i32 = arith.constant 0 : i32
    %c0_i32_0 = arith.constant 0 : i32
    %c0_i32_1 = arith.constant 0 : i32
    return %arg0, %c0_i32, %c0_i32_0 : i32, i32, i32
  }
  func.func @transform_8(%arg0: i32) -> (i32, i32, i32) {
    %c0_i32 = arith.constant 0 : i32
    %c0_i32_0 = arith.constant 0 : i32
    %c0_i32_1 = arith.constant 0 : i32
    return %arg0, %c0_i32, %c0_i32_0 : i32, i32, i32
  }
  func.func @transform_9(%arg0: i32) -> (i32, i32, i32) {
    %c0_i32 = arith.constant 0 : i32
    %c0_i32_0 = arith.constant 0 : i32
    %c0_i32_1 = arith.constant 0 : i32
    return %arg0, %c0_i32, %c0_i32_0 : i32, i32, i32
  }
  func.func @transform_10(%arg0: i32) -> (i32, i32, i32) {
    %c0_i32 = arith.constant 0 : i32
    %c0_i32_0 = arith.constant 0 : i32
    %c0_i32_1 = arith.constant 0 : i32
    return %arg0, %c0_i32, %c0_i32_0 : i32, i32, i32
  }
  func.func @transform_11(%arg0: i32) -> (i32, i32, i32) {
    %c0_i32 = arith.constant 0 : i32
    %c0_i32_0 = arith.constant 0 : i32
    %c0_i32_1 = arith.constant 0 : i32
    return %arg0, %c0_i32, %c0_i32_0 : i32, i32, i32
  }
  func.func @transform_12(%arg0: i32) -> (i32, i32, i32) {
    %c0_i32 = arith.constant 0 : i32
    %c0_i32_0 = arith.constant 0 : i32
    %c0_i32_1 = arith.constant 0 : i32
    return %arg0, %c0_i32, %c0_i32_0 : i32, i32, i32
  }
  func.func @transform_13(%arg0: i32) -> (i32, i32, i32) {
    %c0_i32 = arith.constant 0 : i32
    %c0_i32_0 = arith.constant 0 : i32
    %c0_i32_1 = arith.constant 0 : i32
    return %arg0, %c0_i32, %c0_i32_0 : i32, i32, i32
  }
  func.func @transform_14(%arg0: i32) -> (i32, i32, i32) {
    %c0_i32 = arith.constant 0 : i32
    %c0_i32_0 = arith.constant 0 : i32
    %c0_i32_1 = arith.constant 0 : i32
    return %arg0, %c0_i32, %c0_i32_0 : i32, i32, i32
  }
  func.func @transform_15(%arg0: i32) -> (i32, i32, i32) {
    %c0_i32 = arith.constant 0 : i32
    %c0_i32_0 = arith.constant 0 : i32
    %c0_i32_1 = arith.constant 0 : i32
    return %arg0, %c0_i32, %c0_i32_0 : i32, i32, i32
  }
  func.func @transform_16(%arg0: i32) -> (i32, i32, i32) {
    %c0_i32 = arith.constant 0 : i32
    %c0_i32_0 = arith.constant 0 : i32
    %c0_i32_1 = arith.constant 0 : i32
    return %arg0, %c0_i32, %c0_i32_0 : i32, i32, i32
  }
  func.func @transform_17(%arg0: i32) -> (i32, i32, i32) {
    %c0_i32 = arith.constant 0 : i32
    %c0_i32_0 = arith.constant 0 : i32
    %c0_i32_1 = arith.constant 0 : i32
    return %arg0, %c0_i32, %c0_i32_0 : i32, i32, i32
  }
  func.func @transform_18(%arg0: i32) -> (i32, i32, i32) {
    %c0_i32 = arith.constant 0 : i32
    %c0_i32_0 = arith.constant 0 : i32
    %c0_i32_1 = arith.constant 0 : i32
    return %arg0, %c0_i32, %c0_i32_0 : i32, i32, i32
  }
  func.func @transform_19(%arg0: i32) -> (i32, i32, i32) {
    %c0_i32 = arith.constant 0 : i32
    %c0_i32_0 = arith.constant 0 : i32
    %c0_i32_1 = arith.constant 0 : i32
    return %arg0, %c0_i32, %c0_i32_0 : i32, i32, i32
  }
  func.func @transform_20(%arg0: i32) -> (i32, i32, i32) {
    %c0_i32 = arith.constant 0 : i32
    %c0_i32_0 = arith.constant 0 : i32
    %c0_i32_1 = arith.constant 0 : i32
    return %arg0, %c0_i32, %c0_i32_0 : i32, i32, i32
  }
  func.func @transform_21(%arg0: i32) -> (i32, i32, i32) {
    %c0_i32 = arith.constant 0 : i32
    %c0_i32_0 = arith.constant 0 : i32
    %c0_i32_1 = arith.constant 0 : i32
    return %arg0, %c0_i32, %c0_i32_0 : i32, i32, i32
  }
  func.func @transform_22(%arg0: i32) -> (i32, i32, i32) {
    %c0_i32 = arith.constant 0 : i32
    %c0_i32_0 = arith.constant 0 : i32
    %c0_i32_1 = arith.constant 0 : i32
    return %arg0, %c0_i32, %c0_i32_0 : i32, i32, i32
  }
  func.func @transform_23(%arg0: i32) -> (i32, i32, i32) {
    %c0_i32 = arith.constant 0 : i32
    %c0_i32_0 = arith.constant 0 : i32
    %c0_i32_1 = arith.constant 0 : i32
    return %arg0, %c0_i32, %c0_i32_0 : i32, i32, i32
  }
  func.func @transform_24(%arg0: i32) -> (i32, i32, i32) {
    %c0_i32 = arith.constant 0 : i32
    %c0_i32_0 = arith.constant 0 : i32
    %c0_i32_1 = arith.constant 0 : i32
    return %arg0, %c0_i32, %c0_i32_0 : i32, i32, i32
  }
  func.func @transform_25(%arg0: i32) -> (i32, i32, i32) {
    %c0_i32 = arith.constant 0 : i32
    %c0_i32_0 = arith.constant 0 : i32
    %c0_i32_1 = arith.constant 0 : i32
    return %arg0, %c0_i32, %c0_i32_0 : i32, i32, i32
  }
  func.func @transform_26(%arg0: i32) -> (i32, i32, i32) {
    %c0_i32 = arith.constant 0 : i32
    %c0_i32_0 = arith.constant 0 : i32
    %c0_i32_1 = arith.constant 0 : i32
    return %arg0, %c0_i32, %c0_i32_0 : i32, i32, i32
  }
  func.func @transform_27(%arg0: i32) -> (i32, i32) {
    %c0_i32 = arith.constant 0 : i32
    %c0_i32_0 = arith.constant 0 : i32
    %c0_i32_1 = arith.constant 0 : i32
    return %c0_i32, %c0_i32_0 : i32, i32
  }
  func.func @transform_28(%arg0: i32) -> (i32, i32) {
    %c0_i32 = arith.constant 0 : i32
    %c0_i32_0 = arith.constant 0 : i32
    %c0_i32_1 = arith.constant 0 : i32
    return %c0_i32, %c0_i32_0 : i32, i32
  }
  func.func @transform_29(%arg0: i32) -> (i32, i32) {
    %c0_i32 = arith.constant 0 : i32
    %c0_i32_0 = arith.constant 0 : i32
    %c0_i32_1 = arith.constant 0 : i32
    return %c0_i32, %c0_i32_0 : i32, i32
  }
  func.func @transform_30(%arg0: i32) -> (i32, i32) {
    %c0_i32 = arith.constant 0 : i32
    %c0_i32_0 = arith.constant 0 : i32
    %c0_i32_1 = arith.constant 0 : i32
    return %c0_i32, %c0_i32_0 : i32, i32
  }
  func.func @transform_31(%arg0: i32) -> (i32, i32) {
    %c0_i32 = arith.constant 0 : i32
    %c0_i32_0 = arith.constant 0 : i32
    %c0_i32_1 = arith.constant 0 : i32
    return %c0_i32, %c0_i32_0 : i32, i32
  }
}

</mosaic_0001>

<bundles_post_ra>
// kernel: simple_transformer_forward.2
= control target key start
LH: loop header
LB: loop body
LE: loop exit
PB: predicated region body
PF: predicated region fallthrough
CT: control target
= control target key end

     0   :  { %s3096_s0 = inlined_call_operand.vmem [shape: f32[16,8], index: 0, kind: input, shape index: {}]   ;;  %s3097_s1 = inlined_call_operand.vmem [shape: f32[16,32], index: 1, kind: input, shape index: {}]   ;;  %s3098_s2 = inlined_call_operand.vmem [shape: f32[8,32], index: 2, kind: input, shape index: {}]   ;;  %s3099_s3 = inlined_call_operand.vmem [shape: f32[1,32], index: 3, kind: input, shape index: {}]   ;;  %s3100_s4 = inlined_call_operand.vmem [shape: f32[16,16], index: 4, kind: input, shape index: {}]   ;;  %s3101_s5 = inlined_call_operand.vmem [shape: bf16[6,32,96], index: 5, kind: input, shape index: {}]   ;;  %s3102_s6 = inlined_call_operand.vmem [shape: f32[6,1,96], index: 6, kind: input, shape index: {}]   ;;  %s3103_s7 = inlined_call_operand.vmem [shape: bf16[6,32,32], index: 7, kind: input, shape index: {}]   ;;  %s3104_s8 = inlined_call_operand.vmem [shape: f32[6,1,32], index: 8, kind: input, shape index: {}]   ;;  %s3105_s9 = inlined_call_operand.vmem [shape: f32[6,1,32], index: 9, kind: input, shape index: {}]   ;;  %s3106_s10 = inlined_call_operand.vmem [shape: f32[6,1,32], index: 10, kind: input, shape index: {}]   ;;  %s3107_s11 = inlined_call_operand.vmem [shape: bf16[6,32,64], index: 11, kind: input, shape index: {}]   ;;  %s3108_s12 = inlined_call_operand.vmem [shape: f32[6,1,64], index: 12, kind: input, shape index: {}]   ;;  %s3109_s13 = inlined_call_operand.vmem [shape: bf16[6,64,32], index: 13, kind: input, shape index: {}]   ;;  %s3110_s14 = inlined_call_operand.vmem [shape: f32[6,1,32], index: 14, kind: input, shape index: {}]   ;;  %s3111_s15 = inlined_call_operand.vmem [shape: f32[6,1,32], index: 15, kind: input, shape index: {}]   ;;  %s3112_s16 = inlined_call_operand.vmem [shape: f32[6,1,32], index: 16, kind: input, shape index: {}]   ;;  %s3113_s17 = inlined_call_operand.vmem [shape: f32[1,32], index: 17, kind: input, shape index: {}]   ;;  %s3114_s18 = inlined_call_operand.vmem [shape: f32[1,32], index: 18, kind: input, shape index: {}]   ;;  %s3115_s19 = inlined_call_operand.vmem [shape: f32[16,32], index: 19, kind: output, shape index: {}]  }
   0x1   :  { %3121 = sst [smem:[#allocation5_spill]] %s3096_s0  ;;  %s2790_s0 = smov 0  }
   0x2   :  { %3122 = sst [smem:[#allocation6_spill]] %s3097_s1 }
   0x3   :  { %3123 = sst [smem:[#allocation7_spill]] %s3098_s2 }
   0x4   :  { %3124 = sst [smem:[#allocation8_spill]] %s3099_s3 }
   0x5   :  { %3125 = sst [smem:[#allocation9_spill]] %s3101_s5 }
   0x6   :  { %3126 = sst [smem:[#allocation10_spill]] %s3103_s7 }
   0x7   :  { %3127 = sst [smem:[#allocation11_spill]] %s3113_s17 }
   0x8   :  { %3128 = sst [smem:[#allocation12_spill]] %s3114_s18 }
   0x9   :  { %3129 = sst [smem:[#allocation13_spill]] %s3115_s19 }
   0xa LB: > { %3130 = sst [smem:[#allocation3_spill]] %s2672_s0  ;;  %s2796_s30 = sadd.s32 4294967295, %s2672_s0   ;;  %s2672_s0 = sphi %s2790_s0, %s29_s0  }
   0xb   : > { %p2279_p0 = scmp.ge.s32.totalorder %s2672_s0, 1  ;;  %p626_p1 = scmp.lt.s32.totalorder %s2672_s0, 7 }
   0xd   : > { %p627_p2 = pnand %p2279_p0, %p626_p1 }
   0xf   : > { %630 = sbr.rel (%p627_p2) target bundleno = 3669 (0xe55), region = 96 }
  0x16   : > { %p716_p3 = scmp.lt.s32.totalorder %s2796_s30, 5  ;;  %s3131_s5 = sld [smem:[#allocation9_spill]] }
  0x17   : > { %s3132_s7 = sld [smem:[#allocation10_spill]]  ;;  %p2288_p4 = scmp.ne.s32.totalorder %s2796_s30, 0 }
  0x18   : > { %s2802_s20 = scalar_select %p716_p3, %s2796_s30, 5 }
  0x19   : > { %764 = sbr.rel (%p2288_p4) target bundleno = 255 (0xff), region = 100  ;;  %s3134_s28 = sld [smem:[#allocation7_spill]] (!%p2288_p4)  ;;  %vm775_vm0 = vcmask (!%p2288_p4), 64512   ;;  %vm861_vm1 = vcmask (!%p2288_p4), 261120  }
  0x1a   : > { %s2343_s21 = sshll.u32 %s2802_s20, 4  ;;  %s753_s1 = scalar_lea.vmem %s3110_s14, %s2802_s20 }
  0x1b   : > { %s756_s23 = scalar_lea.vmem %s3111_s15, %s2802_s20  ;;  %s759_s17 = scalar_lea.vmem %s3112_s16, %s2802_s20 }
  0x1c   : > { %s2812_s25 = scalar_lea.vmem %s3131_s5, %s2343_s21  ;;  %s2834_s5 = scalar_lea.vmem %s3107_s11, %s2343_s21 }
  0x1d   : > { %s2817_s27 = scalar_lea.vmem %s3132_s7, %s2343_s21  ;;  %s3135_s7 = sld [smem:[#allocation5_spill]] (!%p2288_p4) }
  0x1e   : > { %3133 = sst [smem:[#allocation4_spill]] %s2817_s27  ;;  %s2346_s27 = sshll.u32 %s2802_s20, 5 }
  0x1f   : > { %s2844_s0 = scalar_lea.vmem %s3109_s13, %s2346_s27  ;;  %v767_v0 = vld [vmem:[%s3134_s28] sm:$0xff] (!%p2288_p4)  ;;  %s3136_s21 = sld [smem:[#allocation8_spill]] (!%p2288_p4) }
  0x20   : > { %2396 = vmatprep.subr.mxu0 %v767_v0  ;;  %s3137_s26 = sld [smem:[#allocation6_spill]] }
  0x21   : > { %2397 = vmatpush3.msra.mxu0 %v767_v0 }
  0x23   : > { %v765_v1 = vld [vmem:[%s3135_s7] sm:$0xff]  ;;  %v766_v2 = vld [vmem:[%s3135_s7 + $0x8] sm:$0xff] }
  0x24   : > { %2398 = vmatprep.mubr.msk.f32.mxu0 %vm775_vm0, %v765_v1 }
  0x25   : > { %2399 = vmatmul.mubr.msk.f32.vlgmr.msra.gmra.mrb[0].mxu0 %vm775_vm0, %v766_v2  ;;  %v2289_v3 = vld [vmem:[%s3136_s21] ss:$0 sm:$0xff] }
  0x26   : > { %v858_v5 = vld [vmem:[%s3137_s26 + $0x8] sm:$0xff]  ;;  %v857_v8 = vld [vmem:[%s3137_s26] sm:$0xff] }
  0xf8   : > { %v2400_v4 = vpop.f32.mrb[0].mxu0 }
  0xf9   : > { %v854_v6 = vadd.f32 %v2400_v4, %v2289_v3  ;;  %v848_v7 = vpop.f32.mrb[1].mxu0 }
  0xfa   : > { %v849_v9 = vadd.f32 %v2289_v3, %v848_v7 }
  0xfb   : > { %v860_v10 = vadd.f32 %v858_v5, %v854_v6 }
  0xfc   : > { %v859_v11 = vadd.f32 %v857_v8, %v849_v9 }
  0xfd   : > { %863 = vst.msk [vmem:[#allocation2 + $0x8] sm:$0xff] %vm861_vm1, %v860_v10 }
  0xfe   : > { %862 = vst.msk [vmem:[#allocation2] sm:$0xff] %vm861_vm1, %v859_v11 }
  0xff PF: > { %v2612_v12 = vld [vmem:[%s2812_s25] sm:$0xff]   ;;  %v2674_v13 = vmov 0.0   ;;  %v2613_v14 = vld [vmem:[%s2812_s25 + $0x8] sm:$0xff]   ;;  %vm2675_vm2 = vmmov 0   ;;  %vm890_vm3 = vcmask 261120   ;;  %s3138_s25 = scalar_lea.vmem %s3102_s6, %s2802_s20  ;;  %vm950_vm4 = vcmask 64512  }
 0x100   : > { %2401 = vmatprep.subr.bf16.mxu1 %v2674_v13  ;;  %2405 = vmatprep.mubr.msk.bf16.mxu1 %vm2675_vm2, %v2674_v13  ;;  %v2292_v18 = vld [vmem:[%s3138_s25] ss:$0 sm:$0xff]  ;;  %s2676_s19 = smov 120   ;;  %s2677_s2 = smov 96   ;;  %vm2913_vm5 = vmpackc.low %vm950_vm4, %vm950_vm4  ;;  %v2937_v45 = vld [vmem:[%s3100_s4 + $0x8] sm:$0xff]  ;;  %vm1036_vm6 = vcmask 130048  }
 0x101   : > { %2402 = vmatpush3.bf16.msra.mxu1 %v2612_v12  ;;  %s2678_s22 = smov 80   ;;  %s2679_s21 = smov 88   ;;  %v2942_v46 = vld [vmem:[%s3100_s4] sm:$0xff]  ;;  %vm1774_vm7 = vcmask 195584   ;;  %vm1997_vm8 = vcmask 523264  }
 0x102   : > { %2403 = vmatprep.subr.bf16.mxu1 %v2674_v13  ;;  %s2680_s24 = smov 112   ;;  %s2681_s18 = smov 56  }
 0x103   : > { %s2682_s25 = smov 64   ;;  %s2688_s3 = smov 40  }
 0x104   : > { %v2884_v16 = vld [vmem:[#allocation2 + $0x8] sm:$0xff]  ;;  %s3141_s28 = sld [smem:[#allocation4_spill]]  ;;  %s2689_s27 = smov 24  }
 0x105   : > { %v2882_v15 = vld [vmem:[#allocation2] sm:$0xff]  ;;  %2404 = vmatpush3.bf16.msra.mxu1 %v2613_v14  ;;  %p2338_p5 = scmp.ne.s32.totalorder %s2796_s30, 5 }
 0x106   : > { %v866_v17 = vpack.c.bf16 %v2884_v16, %v2882_v15 }
 0x108   : > { %2406 = vmatmul.mubr.msk.bf16.vlgmr.msra.gmra.mrb[0].mxu1 %vm890_vm3, %v866_v17 }
 0x1db   : > { %v928_v19 = vpop.f32.mrb[0].mxu1 }
 0x1dc   : > { %v929_v20 = vadd.f32 %v2292_v18, %v928_v19  ;;  %v2407_v21 = vpop.f32.mrb[1].mxu1 }
 0x1dd   : > { %v931_v22 = vpop.f32.mrb[2].mxu1 }
 0x1de   : > { %v932_v23 = vadd.f32 %v2292_v18, %v931_v22  ;;  %v2408_v24 = vpop.f32.mrb[3].mxu1  ;;  %v2895_v25 = vmul.f32 0.35355338, %v929_v20 }
 0x1e0   : > { %1146 = vrot.lane.b32.xlu1 %v2895_v25, %s2676_s19  ;;  %2413 = vmatprep.mubr.msk.f32.mxu1 %vm950_vm4, %v2895_v25  ;;  %v2900_v26 = vpack.i.bf16 %v932_v23, %v929_v20  ;;  %v2906_v27 = vmul.f32 0.35355338, %v932_v23 }
 0x1e2   : > { %2558 = vrot.lane.b32.xlu0 %v2900_v26, %s2677_s2  ;;  %s2684_s2 = smov 72  }
 0x1e4   : > { %2568 = vrot.lane.b32.xlu1 %v2900_v26, %s2678_s22  ;;  %s2685_s22 = smov 104  }
 0x1e6   : > { %2563 = vrot.lane.b32.xlu0 %v2900_v26, %s2679_s21  ;;  %s2686_s21 = smov 8  }
 0x1e8   : > { %1346 = vrot.lane.b32.xlu1 %v2895_v25, %s2680_s24 }
 0x1ea   : > { %1148 = vrot.lane.b32.xlu0 %v2906_v27, %s2676_s19  ;;  %s2683_s19 = smov 48  }
 0x1ee   : > { %1348 = vrot.lane.b32.xlu0 %v2906_v27, %s2680_s24  ;;  %s2687_s24 = smov 16  }
 0x252   : > { %v1147_v28 = vpop.permute.xlu1 %1146 }
 0x253   : > { %2427 = vmatprep.mubr.msk.f32.mxu0 %vm950_vm4, %v1147_v28 }
 0x254   : > { %v2559_v29 = vpop.permute.xlu0 %2558 }
 0x255   : > { %v2561_v30 = vunpack.i.h.bf16 %v2559_v29  ;;  %v2560_v31 = vunpack.i.l.bf16 %v2559_v29 }
 0x256   : > { %v2569_v32 = vpop.permute.xlu1 %2568 }
 0x257   : > { %v2493_v34 = vpack.c.bf16 %v2561_v30, %v2560_v31  ;;  %v2571_v36 = vunpack.i.h.bf16 %v2569_v32  ;;  %v2570_v37 = vunpack.i.l.bf16 %v2569_v32 }
 0x258   : > { %v2564_v35 = vpop.permute.xlu0 %2563 }
 0x259   : > { %v2566_v38 = vunpack.i.h.bf16 %v2564_v35  ;;  %v2565_v39 = vunpack.i.l.bf16 %v2564_v35  ;;  %2495 = vmatprep.subr.msk.bf16.mxu1 %vm2913_vm5, %v2493_v34  ;;  %v2513_v41 = vpack.c.bf16 %v2571_v36, %v2570_v37 }
 0x25a   : > { %2498 = vmatpush3.bf16.xpose.msk.msra.mxu1 %vm2913_vm5, %v2493_v34  ;;  %v1347_v43 = vpop.permute.xlu1 %1346 }
 0x25b   : > { %v2503_v40 = vpack.c.bf16 %v2566_v38, %v2565_v39 }
 0x25c   : > { %v1149_v42 = vpop.permute.xlu0 %1148 }
 0x25d   : > { %2505 = vmatprep.subr.msk.bf16.mxu0 %vm2913_vm5, %v2503_v40 }
 0x25e   : > { %2508 = vmatpush3.bf16.xpose.msk.msra.mxu0 %vm2913_vm5, %v2503_v40 }
 0x25f   : > { %2515 = vmatprep.subr.msk.bf16.mxu0 %vm2913_vm5, %v2513_v41 }
 0x260   : > { %v1349_v44 = vpop.permute.xlu0 %1348 }
 0x261   : > { %2414 = vmatmul.mubr.msk.f32.vlgmr.msra.gmra.mrb[4].mxu1 %vm950_vm4, %v2906_v27 }
 0x265   : > { %2428 = vmatmul.mubr.msk.f32.vlgmr.msra.gmra.mrb[0].mxu0 %vm950_vm4, %v1149_v42 }
 0x266   : > { %2518 = vmatpush3.bf16.xpose.msk.msra.mxu0 %vm2913_vm5, %v2513_v41  ;;  %2441 = vmatprep.mubr.msk.f32.mxu0 %vm950_vm4, %v1347_v43 }
 0x26d   : > { %2442 = vmatmul.mubr.msk.f32.vlgmr.msra.gmra.mrb[2].mxu0 %vm950_vm4, %v1349_v44 }
 0x334   : > { %v2415_v47 = vpop.f32.mrb[4].mxu1 }
 0x335   : > { %v1033_v48 = vadd.f32 %v2415_v47, %v2937_v45  ;;  %v1027_v49 = vpop.f32.mrb[5].mxu1 }
 0x336   : > { %v1028_v50 = vadd.f32 %v1027_v49, %v2942_v46 }
 0x337   : > { %v1040_v51 = vsel %vm1036_vm6, %v1033_v48, -inf }
 0x338   : > { %v2429_v52 = vpop.f32.mrb[0].mxu0  ;;  %1041 = vmax.xlane.f32.xlu0 %v1040_v51  ;;  %v1037_v53 = vsel %vm1036_vm6, %v1028_v50, -inf }
 0x339   : > { %v1234_v54 = vadd.f32 %v2429_v52, %v2937_v45  ;;  %v1228_v55 = vpop.f32.mrb[1].mxu0  ;;  %1038 = vmax.xlane.f32.xlu1 %v1037_v53 }
 0x33a   : > { %v1229_v56 = vadd.f32 %v1228_v55, %v2942_v46 }
 0x33b   : > { %v1240_v57 = vsel %vm1036_vm6, %v1234_v54, -inf }
 0x33c   : > { %v1237_v58 = vsel %vm1036_vm6, %v1229_v56, -inf }
 0x33d   : > { %1238 = vmax.xlane.f32.xlu0 %v1237_v58  ;;  %1241 = vmax.xlane.f32.xlu1 %v1240_v57 }
 0x340   : > { %v2443_v59 = vpop.f32.mrb[2].mxu0 }
 0x341   : > { %v2953_v60 = vadd.f32 %v2443_v59, %v2937_v45  ;;  %v1428_v61 = vpop.f32.mrb[3].mxu0 }
 0x342   : > { %v1429_v62 = vadd.f32 %v1428_v61, %v2942_v46 }
 0x343   : > { %v1440_v63 = vsel %vm1036_vm6, %v2953_v60, -inf }
 0x344   : > { %1441 = vmax.xlane.f32.xlu1 %v1440_v63  ;;  %v1437_v0 = vsel %vm1036_vm6, %v1429_v62, -inf }
 0x345   : > { %1438 = vmax.xlane.f32.xlu0 %v1437_v0 }
 0x355   : > { %2578 = vrot.lane.b32.xlu1 %v2900_v26, %s2681_s18 }
 0x35b   : > { %2573 = vrot.lane.b32.xlu0 %v2900_v26, %s2682_s25  ;;  %s3142_s25 = scalar_lea.vmem %s3104_s8, %s2802_s20 }
 0x3c5   : > { %v1042_v1 = vpop.xlane.xlu0 %1041 }
 0x3c6   : > { %v1044_v2 = vsub.f32 %v1033_v48, %v1042_v1  ;;  %v1039_v3 = vpop.xlane.xlu1 %1038 }
 0x3c7   : > { %v1043_v4 = vsub.f32 %v1028_v50, %v1039_v3 }
 0x3c8   : > { %v1047_v5 = vmul.f32 1.442695, %v1044_v2 }
 0x3c9   : > { %v1045_v6 = vmul.f32 1.442695, %v1043_v4 }
 0x3ca   : > { %2622 = vpow2.f32 %v1047_v5  ;;  %v1239_v7 = vpop.xlane.xlu0 %1238  ;;  %v1242_v8 = vpop.xlane.xlu1 %1241 }
 0x3cb   : > { %2624 = vpow2.f32 %v1045_v6  ;;  %v1243_v9 = vsub.f32 %v1229_v56, %v1239_v7  ;;  %v1244_v10 = vsub.f32 %v1234_v54, %v1242_v8 }
 0x3cd   : > { %v1245_v11 = vmul.f32 1.442695, %v1243_v9  ;;  %v1247_v12 = vmul.f32 1.442695, %v1244_v10 }
 0x3cf   : > { %2626 = vpow2.f32 %v1245_v11 }
 0x3d0   : > { %2628 = vpow2.f32 %v1247_v12 }
 0x3d1   : > { %v1442_v14 = vpop.xlane.xlu1 %1441 }
 0x3d2   : > { %v1439_v17 = vpop.xlane.xlu0 %1438  ;;  %v1444_v42 = vsub.f32 %v2953_v60, %v1442_v14 }
 0x3d3   : > { %v1443_v18 = vsub.f32 %v1429_v62, %v1439_v17 }
 0x3d4   : > { %v2623_v19 = vpop.eup %2622  ;;  %v1447_v43 = vmul.f32 1.442695, %v1444_v42 }
 0x3d5   : > { %v2625_v20 = vpop.eup %2624  ;;  %v1445_v21 = vmul.f32 1.442695, %v1443_v18  ;;  %v2579_v22 = vpop.permute.xlu1 %2578  ;;  %v1052_v23 = vsel %vm1036_vm6, %v2623_v19, 0.0 }
 0x3d6   : > { %v2581_v24 = vunpack.i.h.bf16 %v2579_v22  ;;  %v2574_v28 = vpop.permute.xlu0 %2573  ;;  %1053 = vadd.xlane.f32.xlu1 %v1052_v23  ;;  %v1049_v29 = vsel %vm1036_vm6, %v2625_v20, 0.0  ;;  %v2580_v30 = vunpack.i.l.bf16 %v2579_v22 }
 0x3d7   : > { %2630 = vpow2.f32 %v1445_v21  ;;  %v2576_v31 = vunpack.i.h.bf16 %v2574_v28  ;;  %v2575_v32 = vunpack.i.l.bf16 %v2574_v28  ;;  %1050 = vadd.xlane.f32.xlu0 %v1049_v29 }
 0x3d8   : > { %v2509_v38 = vpack.c.bf16 %v2581_v24, %v2580_v30  ;;  %2632 = vpow2.f32 %v1447_v43 }
 0x3d9   : > { %v2627_v34 = vpop.eup %2626  ;;  %v2499_v35 = vpack.c.bf16 %v2576_v31, %v2575_v32 }
 0x3da   : > { %v2629_v36 = vpop.eup %2628  ;;  %v1249_v37 = vsel %vm1036_vm6, %v2627_v34, 0.0 }
 0x3db   : > { %2500 = vmatprep.subr.bf16.mxu1 %v2499_v35  ;;  %1250 = vadd.xlane.f32.xlu0 %v1249_v37  ;;  %v1252_v39 = vsel %vm1036_vm6, %v2629_v36, 0.0 }
 0x3dc   : > { %1253 = vadd.xlane.f32.xlu1 %v1252_v39  ;;  %2502 = vmatpush3.bf16.msra.mxu1 %v2499_v35 }
 0x3dd   : > { %2510 = vmatprep.subr.bf16.mxu1 %v2509_v38 }
 0x3e1   : > { %v2631_v40 = vpop.eup %2630 }
 0x3e2   : > { %v1449_v41 = vsel %vm1036_vm6, %v2631_v40, 0.0  ;;  %v2633_v44 = vpop.eup %2632 }
 0x3e3   : > { %1450 = vadd.xlane.f32.xlu0 %v1449_v41  ;;  %v1452_v47 = vsel %vm1036_vm6, %v2633_v44, 0.0 }
 0x3ed   : > { %2583 = vrot.lane.b32.xlu1 %v2900_v26, %s2683_s19 }
 0x3f9   : > { %2588 = vrot.lane.b32.xlu0 %v2900_v26, %s2684_s2  ;;  %s3143_s2 = scalar_lea.vmem %s3105_s9, %s2802_s20 }
 0x3fd   : > { %1548 = vrot.lane.b32.xlu0 %v2906_v27, %s2685_s22 }
 0x411   : > { %1453 = vadd.xlane.f32.xlu1 %v1452_v47 }
 0x422   : > { %1546 = vrot.lane.b32.xlu1 %v2895_v25, %s2685_s22 }
 0x463   : > { %v1054_v48 = vpop.xlane.xlu1 %1053 }
 0x464   : > { %2634 = vrcp.f32 %v1054_v48  ;;  %v1051_v49 = vpop.xlane.xlu0 %1050 }
 0x465   : > { %2636 = vrcp.f32 %v1051_v49 }
 0x468   : > { %v1251_v50 = vpop.xlane.xlu0 %1250 }
 0x469   : > { %2638 = vrcp.f32 %v1251_v50  ;;  %v1254_v51 = vpop.xlane.xlu1 %1253  ;;  %v2615_v50 = vld [vmem:[%s3141_s28 + $0x8] sm:$0xff]  }
 0x46a   : > { %2640 = vrcp.f32 %v1254_v51 }
 0x46d   : > { %v2584_v52 = vpop.permute.xlu1 %2583 }
 0x46e   : > { %v2635_v53 = vpop.eup %2634  ;;  %v2586_v27 = vunpack.i.h.bf16 %v2584_v52  ;;  %v2585_v55 = vunpack.i.l.bf16 %v2584_v52 }
 0x46f   : > { %v2637_v54 = vpop.eup %2636  ;;  %v1058_v58 = vmul.f32 %v2635_v53, %v2623_v19 }
 0x470   : > { %v1451_v56 = vpop.xlane.xlu0 %1450  ;;  %v1057_v57 = vmul.f32 %v2637_v54, %v2625_v20  ;;  %v2519_v59 = vpack.c.bf16 %v2586_v27, %v2585_v55 }
 0x471   : > { %2642 = vrcp.f32 %v1451_v56 }
 0x472   : > { %2420 = vmatprep.mubr.msk.f32.mxu1 %vm1036_vm6, %v1057_v57 }
 0x473   : > { %v2639_v25 = vpop.eup %2638  ;;  %2421 = vmatmul.mubr.msk.f32.vlgmr.msra.gmra.mrb[6].mxu1 %vm1036_vm6, %v1058_v58 }
 0x474   : > { %v2641_v60 = vpop.eup %2640  ;;  %2512 = vmatpush3.bf16.msra.mxu1 %v2509_v38  ;;  %v2589_v61 = vpop.permute.xlu0 %2588  ;;  %v1257_v62 = vmul.f32 %v2639_v25, %v2627_v34 }
 0x475   : > { %v1258_v63 = vmul.f32 %v2641_v60, %v2629_v36  ;;  %v2591_v0 = vunpack.i.h.bf16 %v2589_v61  ;;  %v2590_v1 = vunpack.i.l.bf16 %v2589_v61  ;;  %2520 = vmatprep.subr.bf16.mxu1 %v2519_v59 }
 0x476   : > { %2434 = vmatprep.mubr.msk.f32.mxu1 %vm1036_vm6, %v1257_v62 }
 0x477   : > { %v2523_v2 = vpack.c.bf16 %v2591_v0, %v2590_v1  ;;  %2435 = vmatmul.mubr.msk.f32.vlgmr.msra.gmra.mrb[8].mxu1 %vm1036_vm6, %v1258_v63 }
 0x478   : > { %2522 = vmatpush3.bf16.msra.mxu1 %v2519_v59  ;;  %v1549_v9 = vpop.permute.xlu0 %1548 }
 0x479   : > { %2525 = vmatprep.subr.msk.bf16.mxu1 %vm2913_vm5, %v2523_v2 }
 0x47b   : > { %v2643_v3 = vpop.eup %2642 }
 0x47c   : > { %v1457_v4 = vmul.f32 %v2643_v3, %v2631_v40 }
 0x47e   : > { %2448 = vmatprep.mubr.msk.f32.mxu1 %vm1036_vm6, %v1457_v4  ;;  %v2320_v4 = vld [vmem:[%s3142_s25] ss:$0 sm:$0xff] }
 0x49e   : > { %v1454_v5 = vpop.xlane.xlu1 %1453 }
 0x49f   : > { %2644 = vrcp.f32 %v1454_v5 }
 0x4a2   : > { %v1547_v8 = vpop.permute.xlu1 %1546 }
 0x4a9   : > { %v2645_v6 = vpop.eup %2644 }
 0x4aa   : > { %v1458_v7 = vmul.f32 %v2645_v6, %v2633_v44 }
 0x4ac   : > { %2449 = vmatmul.mubr.msk.f32.vlgmr.msra.gmra.mrb[10].mxu1 %vm1036_vm6, %v1458_v7 }
 0x4ad   : > { %2528 = vmatpush3.bf16.xpose.msk.msra.mxu1 %vm2913_vm5, %v2523_v2  ;;  %2455 = vmatprep.mubr.msk.f32.mxu1 %vm950_vm4, %v1547_v8 }
 0x4ae   : > { %2473 = vmatprep.subr.bf16.mxu1 %v2674_v13 }
 0x4b4   : > { %2456 = vmatmul.mubr.msk.f32.vlgmr.msra.gmra.mrb[12].mxu1 %vm950_vm4, %v1549_v9 }
 0x4b5   : > { %2477 = vmatprep.mubr.msk.bf16.mxu1 %vm2675_vm2, %v2674_v13 }
 0x546   : > { %v2987_v10 = vpop.f32.mrb[6].mxu1 }
 0x547   : > { %v2989_v11 = vpop.f32.mrb[7].mxu1 }
 0x54a   : > { %v2436_v12 = vpop.f32.mrb[8].mxu1 }
 0x54b   : > { %v1337_v14 = vpop.f32.mrb[9].mxu1 }
 0x54c   : > { %v2597_v17 = vpack.i.bf16 %v2436_v12, %v1337_v14 }
 0x57f   : > { %v2450_v18 = vpop.f32.mrb[10].mxu1 }
 0x580   : > { %v1537_v33 = vpop.f32.mrb[11].mxu1 }
 0x581   : > { %v2602_v19 = vpack.i.bf16 %v2450_v18, %v1537_v33 }
 0x587   : > { %v2457_v20 = vpop.f32.mrb[12].mxu1 }
 0x588   : > { %v1634_v21 = vadd.f32 %v2457_v20, %v2937_v45  ;;  %v1628_v22 = vpop.f32.mrb[13].mxu1 }
 0x589   : > { %v1629_v23 = vadd.f32 %v1628_v22, %v2942_v46 }
 0x58a   : > { %v1640_v24 = vsel %vm1036_vm6, %v1634_v21, -inf }
 0x58b   : > { %1641 = vmax.xlane.f32.xlu0 %v1640_v24  ;;  %v1637_v28 = vsel %vm1036_vm6, %v1629_v23, -inf }
 0x58c   : > { %1638 = vmax.xlane.f32.xlu1 %v1637_v28  ;;  %v2616_v28 = vld [vmem:[%s2834_s5] sm:$0xff]  }
 0x58d   : > { %2474 = vmatpush3.bf16.msra.mxu1 %v2616_v28  ;;  %v2337_v28 = vld [vmem:[%s759_s17] ss:$0 sm:$0xff] }
 0x58e   : > { %2475 = vmatprep.subr.bf16.mxu1 %v2674_v13 }
 0x618   : > { %v1642_v29 = vpop.xlane.xlu0 %1641 }
 0x619   : > { %v1644_v30 = vsub.f32 %v1634_v21, %v1642_v29  ;;  %v1639_v31 = vpop.xlane.xlu1 %1638  ;;  %v2617_v29 = vld [vmem:[%s2834_s5 + $0x8] sm:$0xff]  }
 0x61a   : > { %v1643_v32 = vsub.f32 %v1629_v23, %v1639_v31  ;;  %2476 = vmatpush3.bf16.msra.mxu1 %v2617_v29  ;;  %v2619_v31 = vld [vmem:[%s2844_s0 + $0x8] sm:$0xff]  }
 0x61b   : > { %v1647_v34 = vmul.f32 1.442695, %v1644_v30  ;;  %v2618_v30 = vld [vmem:[%s2844_s0] sm:$0xff]  }
 0x61c   : > { %v1645_v35 = vmul.f32 1.442695, %v1643_v32 }
 0x61d   : > { %2646 = vpow2.f32 %v1647_v34 }
 0x61e   : > { %2648 = vpow2.f32 %v1645_v35 }
 0x627   : > { %v2647_v36 = vpop.eup %2646 }
 0x628   : > { %v2649_v37 = vpop.eup %2648  ;;  %v1652_v45 = vsel %vm1036_vm6, %v2647_v36, 0.0 }
 0x629   : > { %1653 = vadd.xlane.f32.xlu1 %v1652_v45  ;;  %v1649_v46 = vsel %vm1036_vm6, %v2649_v37, 0.0 }
 0x62a   : > { %1650 = vadd.xlane.f32.xlu0 %v1649_v46 }
 0x63a   : > { %2598 = vrot.lane.b32.xlu1 %v2597_v17, %s2686_s21 }
 0x63e   : > { %2603 = vrot.lane.b32.xlu1 %v2602_v19, %s2687_s24  ;;  %s3144_s24 = scalar_lea.vmem %s3106_s10, %s2802_s20 }
 0x640   : > { %2593 = vrot.lane.b32.xlu0 %v2900_v26, %s2688_s3  ;;  %v2614_v26 = vld [vmem:[%s3141_s28] sm:$0xff]  }
 0x6b6   : > { %v1654_v38 = vpop.xlane.xlu1 %1653 }
 0x6b7   : > { %2650 = vrcp.f32 %v1654_v38  ;;  %v1651_v39 = vpop.xlane.xlu0 %1650  ;;  %v2324_v38 = vld [vmem:[%s3143_s2] ss:$0 sm:$0xff]  ;;  %s3147_s2 = sld [smem:[#allocation12_spill]] (!%p2338_p5) }
 0x6b8   : > { %2652 = vrcp.f32 %v1651_v39 }
 0x6ba   : > { %v2599_v54 = vpop.permute.xlu1 %2598 }
 0x6bb   : > { %v2594_v40 = vpop.permute.xlu0 %2593  ;;  %v2601_v55 = vunpack.i.h.bf16 %v2599_v54  ;;  %v2600_v56 = vunpack.i.l.bf16 %v2599_v54 }
 0x6bc   : > { %v2596_v41 = vunpack.i.h.bf16 %v2594_v40  ;;  %v2595_v42 = vunpack.i.l.bf16 %v2594_v40 }
 0x6bd   : > { %v1771_v59 = vsel %vm950_vm4, %v2987_v10, %v2601_v55  ;;  %v1770_v60 = vsel %vm950_vm4, %v2989_v11, %v2600_v56 }
 0x6be   : > { %v2529_v43 = vpack.c.bf16 %v2596_v41, %v2595_v42  ;;  %v2604_v27 = vpop.permute.xlu1 %2603 }
 0x6bf   : > { %v2606_v57 = vunpack.i.h.bf16 %v2604_v27  ;;  %v2605_v58 = vunpack.i.l.bf16 %v2604_v27 }
 0x6c0   : > { %2530 = vmatprep.subr.bf16.mxu0 %v2529_v43 }
 0x6c1   : > { %v2651_v44 = vpop.eup %2650  ;;  %2532 = vmatpush3.bf16.msra.mxu0 %v2529_v43  ;;  %v1772_v63 = vsel %vm1036_vm6, %v1770_v60, %v2605_v58  ;;  %v1773_v0 = vsel %vm1036_vm6, %v1771_v59, %v2606_v57  ;;  %v2325_v43 = vld [vmem:[%s3144_s24] ss:$0 sm:$0xff]  ;;  %s3148_s24 = sld [smem:[#allocation13_spill]] (!%p2338_p5) }
 0x6c2   : > { %v2653_v47 = vpop.eup %2652  ;;  %2465 = vmatprep.subr.bf16.mxu0 %v2674_v13  ;;  %v1658_v49 = vmul.f32 %v2651_v44, %v2647_v36 }
 0x6c3   : > { %v1657_v48 = vmul.f32 %v2653_v47, %v2649_v37 }
 0x6c5   : > { %2462 = vmatprep.mubr.msk.f32.mxu0 %vm1036_vm6, %v1657_v48 }
 0x6c6   : > { %2463 = vmatmul.mubr.msk.f32.vlgmr.msra.gmra.mrb[4].mxu0 %vm1036_vm6, %v1658_v49 }
 0x6c7   : > { %2469 = vmatprep.mubr.msk.bf16.mxu0 %vm2675_vm2, %v2674_v13  ;;  %2466 = vmatpush3.bf16.msra.mxu0 %v2614_v26  ;;  %v2620_v26 = vld [vmem:[%s2844_s0 + $0x10] sm:$0xff]  }
 0x6c8   : > { %2467 = vmatprep.subr.bf16.mxu0 %v2674_v13 }
 0x6cb   : > { %2468 = vmatpush3.bf16.msra.mxu0 %v2615_v50  ;;  %v2621_v50 = vld [vmem:[%s2844_s0 + $0x18] sm:$0xff]  }
 0x6cc   : > { %2481 = vmatprep.subr.bf16.mxu0 %v2674_v13 }
 0x799   : > { %v2464_v51 = vpop.f32.mrb[4].mxu0 }
 0x79a   : > { %v1737_v52 = vpop.f32.mrb[5].mxu0 }
 0x79b   : > { %v2607_v53 = vpack.i.bf16 %v2464_v51, %v1737_v52 }
 0x79d   : > { %2608 = vrot.lane.b32.xlu0 %v2607_v53, %s2689_s27  ;;  %s3145_s27 = scalar_lea.vmem %s3108_s12, %s2802_s20  ;;  %s3146_s20 = sld [smem:[#allocation11_spill]] (!%p2338_p5) }
 0x79e   : > { %v2326_v51 = vld [vmem:[%s3145_s27] ss:$0 sm:$0xff] }
 0x80f   : > { %v2609_v25 = vpop.permute.xlu0 %2608 }
 0x810   : > { %v2611_v61 = vunpack.i.h.bf16 %v2609_v25  ;;  %v2610_v62 = vunpack.i.l.bf16 %v2609_v25 }
 0x812   : > { %v1775_v1 = vsel %vm1774_vm7, %v1772_v63, %v2610_v62  ;;  %v1776_v2 = vsel %vm1774_vm7, %v1773_v0, %v2611_v61 }
 0x813   : > { %v1777_v3 = vpack.c.bf16 %v1776_v2, %v1775_v1 }
 0x815   : > { %2470 = vmatmul.mubr.msk.bf16.vlgmr.msra.gmra.mrb[8].mxu0 %vm890_vm3, %v1777_v3 }
 0x816   : > { %2489 = vmatprep.mubr.msk.bf16.mxu0 %vm2675_vm2, %v2674_v13  ;;  %2482 = vmatpush3.bf16.msra.mxu0 %v2618_v30 }
 0x817   : > { %2483 = vmatprep.subr.bf16.mxu0 %v2674_v13 }
 0x81a   : > { %2484 = vmatpush3.bf16.msra.mxu0 %v2619_v31 }
 0x81b   : > { %2485 = vmatprep.subr.bf16.mxu0 %v2674_v13 }
 0x81e   : > { %2486 = vmatpush3.bf16.msra.mxu0 %v2620_v26 }
 0x81f   : > { %2487 = vmatprep.subr.bf16.mxu0 %v2674_v13  ;;  %v2330_v13 = vld [vmem:[%s753_s1] ss:$0 sm:$0xff] }
 0x822   : > { %2488 = vmatpush3.bf16.msra.mxu0 %v2621_v50 }
 0x8e8   : > { %v1833_v5 = vpop.f32.mrb[8].mxu0 }
 0x8e9   : > { %v1834_v6 = vadd.f32 %v2320_v4, %v1833_v5  ;;  %v2471_v7 = vpop.f32.mrb[9].mxu0 }
 0x8ea   : > { %v1836_v8 = vpop.f32.mrb[10].mxu0 }
 0x8eb   : > { %v1837_v9 = vadd.f32 %v2320_v4, %v1836_v8  ;;  %v2472_v10 = vpop.f32.mrb[11].mxu0  ;;  %v1840_v11 = vadd.f32 %v1834_v6, %v2882_v15 }
 0x8ed   : > { %v1844_v12 = vsel %vm890_vm3, %v1840_v11, 0.0  ;;  %v1841_v14 = vadd.f32 %v1837_v9, %v2884_v16 }
 0x8ee   : > { %1845 = vadd.xlane.f32.xlu1 %v1844_v12 }
 0x8ef   : > { %v1847_v17 = vsel %vm890_vm3, %v1841_v14, 0.0 }
 0x8f0   : > { %1848 = vadd.xlane.f32.xlu0 %v1847_v17 }
 0x97b   : > { %v1846_v18 = vpop.xlane.xlu1 %1845 }
 0x97c   : > { %v1851_v33 = vmul.f32 0.03125, %v1846_v18 }
 0x97d   : > { %v1849_v19 = vpop.xlane.xlu0 %1848 }
 0x97e   : > { %v1853_v20 = vsub.f32 %v1840_v11, %v1851_v33  ;;  %v1852_v21 = vmul.f32 0.03125, %v1849_v19 }
 0x980   : > { %v1854_v22 = vsub.f32 %v1841_v14, %v1852_v21  ;;  %v1855_v23 = vmul.f32 %v1853_v20, %v1853_v20 }
 0x982   : > { %v1857_v15 = vsel %vm890_vm3, %v1855_v23, 0.0  ;;  %v1856_v24 = vmul.f32 %v1854_v22, %v1854_v22 }
 0x983   : > { %1858 = vadd.xlane.f32.xlu0 %v1857_v15  ;;  %v2336_v15 = vld [vmem:[%s756_s23] ss:$0 sm:$0xff] }
 0x984   : > { %v1860_v16 = vsel %vm890_vm3, %v1856_v24, 0.0 }
 0x985   : > { %1861 = vadd.xlane.f32.xlu1 %v1860_v16 }
 0xa10   : > { %v1859_v32 = vpop.xlane.xlu0 %1858 }
 0xa11   : > { %v1863_v34 = vmul.f32 0.03125, %v1859_v32 }
 0xa12   : > { %v1862_v35 = vpop.xlane.xlu1 %1861 }
 0xa13   : > { %v1865_v36 = vadd.f32 1e-05, %v1863_v34  ;;  %v1864_v37 = vmul.f32 0.03125, %v1862_v35 }
 0xa15   : > { %2654 = vrsqrt.f32 %v1865_v36  ;;  %v1866_v45 = vadd.f32 1e-05, %v1864_v37 }
 0xa17   : > { %2656 = vrsqrt.f32 %v1866_v45 }
 0xa1f   : > { %v2655_v46 = vpop.eup %2654 }
 0xa20   : > { %v1869_v39 = vmul.f32 %v2655_v46, %v1853_v20 }
 0xa21   : > { %v2657_v40 = vpop.eup %2656 }
 0xa22   : > { %v1877_v41 = vmul.f32 %v2324_v38, %v1869_v39  ;;  %v1870_v42 = vmul.f32 %v2657_v40, %v1854_v22 }
 0xa24   : > { %v1878_v44 = vmul.f32 %v2324_v38, %v1870_v42  ;;  %v1885_v47 = vadd.f32 %v2325_v43, %v1877_v41 }
 0xa26   : > { %v1886_v48 = vadd.f32 %v2325_v43, %v1878_v44 }
 0xa28   : > { %v1887_v49 = vpack.c.bf16 %v1886_v48, %v1885_v47 }
 0xa2a   : > { %2478 = vmatmul.mubr.msk.bf16.vlgmr.msra.gmra.mrb[16].mxu1 %vm890_vm3, %v1887_v49 }
 0xafd   : > { %v1948_v52 = vpop.f32.mrb[16].mxu1 }
 0xafe   : > { %v1949_v53 = vadd.f32 %v2326_v51, %v1948_v52  ;;  %v2479_v54 = vpop.f32.mrb[17].mxu1 }
 0xaff   : > { %v1951_v27 = vpop.f32.mrb[18].mxu1 }
 0xb00   : > { %v1952_v55 = vadd.f32 %v2326_v51, %v1951_v27  ;;  %v2480_v56 = vpop.f32.mrb[19].mxu1  ;;  %v1955_v57 = vmax.f32 %v1949_v53, 0.0  ;;  %v2339_v53 = vld [vmem:[%s3146_s20] ss:$0 sm:$0xff] (!%p2338_p5) }
 0xb01   : > { %v2340_v27 = vld [vmem:[%s3147_s2] ss:$0 sm:$0xff] (!%p2338_p5) }
 0xb02   : > { %v1956_v58 = vmax.f32 %v1952_v55, 0.0 }
 0xb04   : > { %v1957_v25 = vpack.c.bf16 %v1956_v58, %v1955_v57 }
 0xb06   : > { %2490 = vmatmul.mubr.msk.bf16.vlgmr.msra.gmra.mrb[12].mxu0 %vm1997_vm8, %v1957_v25 }
 0xbd9   : > { %v2035_v59 = vpop.f32.mrb[12].mxu0 }
 0xbda   : > { %v2036_v60 = vadd.f32 %v2330_v13, %v2035_v59  ;;  %v2491_v61 = vpop.f32.mrb[13].mxu0 }
 0xbdb   : > { %v2038_v62 = vpop.f32.mrb[14].mxu0 }
 0xbdc   : > { %v2039_v63 = vadd.f32 %v2330_v13, %v2038_v62  ;;  %v2492_v0 = vpop.f32.mrb[15].mxu0  ;;  %v2042_v1 = vadd.f32 %v2036_v60, %v1885_v47 }
 0xbde   : > { %v2046_v2 = vsel %vm890_vm3, %v2042_v1, 0.0  ;;  %v2043_v3 = vadd.f32 %v2039_v63, %v1886_v48 }
 0xbdf   : > { %2047 = vadd.xlane.f32.xlu0 %v2046_v2 }
 0xbe0   : > { %v2049_v4 = vsel %vm890_vm3, %v2043_v3, 0.0 }
 0xbe1   : > { %2050 = vadd.xlane.f32.xlu1 %v2049_v4 }
 0xc6c   : > { %v2048_v5 = vpop.xlane.xlu0 %2047 }
 0xc6d   : > { %v2052_v6 = vmul.f32 0.03125, %v2048_v5 }
 0xc6e   : > { %v2051_v7 = vpop.xlane.xlu1 %2050 }
 0xc6f   : > { %v2054_v8 = vsub.f32 %v2042_v1, %v2052_v6  ;;  %v2053_v9 = vmul.f32 0.03125, %v2051_v7 }
 0xc71   : > { %v2055_v10 = vsub.f32 %v2043_v3, %v2053_v9  ;;  %v2056_v11 = vmul.f32 %v2054_v8, %v2054_v8 }
 0xc73   : > { %v2058_v12 = vsel %vm890_vm3, %v2056_v11, 0.0  ;;  %v2057_v14 = vmul.f32 %v2055_v10, %v2055_v10 }
 0xc74   : > { %2059 = vadd.xlane.f32.xlu0 %v2058_v12 }
 0xc75   : > { %v2061_v17 = vsel %vm890_vm3, %v2057_v14, 0.0 }
 0xc76   : > { %2062 = vadd.xlane.f32.xlu1 %v2061_v17 }
 0xd01   : > { %v2060_v18 = vpop.xlane.xlu0 %2059 }
 0xd02   : > { %v2064_v33 = vmul.f32 0.03125, %v2060_v18 }
 0xd03   : > { %v2063_v19 = vpop.xlane.xlu1 %2062 }
 0xd04   : > { %v2066_v20 = vadd.f32 1e-05, %v2064_v33  ;;  %v2065_v21 = vmul.f32 0.03125, %v2063_v19 }
 0xd06   : > { %2658 = vrsqrt.f32 %v2066_v20  ;;  %v2067_v22 = vadd.f32 1e-05, %v2065_v21 }
 0xd08   : > { %2660 = vrsqrt.f32 %v2067_v22 }
 0xd10   : > { %v2659_v23 = vpop.eup %2658 }
 0xd11   : > { %v2070_v24 = vmul.f32 %v2659_v23, %v2054_v8 }
 0xd12   : > { %v2661_v16 = vpop.eup %2660 }
 0xd13   : > { %v2078_v29 = vmul.f32 %v2336_v15, %v2070_v24  ;;  %v2071_v30 = vmul.f32 %v2661_v16, %v2055_v10  ;;  %2093 = sbr.rel (%p2338_p5) target bundleno = 3669 (0xe55), region = 104 }
 0xd15   : > { %v2086_v31 = vadd.f32 %v2337_v28, %v2078_v29  ;;  %v2079_v32 = vmul.f32 %v2336_v15, %v2071_v30 }
 0xd17   : > { %2088 = vst.msk [vmem:[#allocation2] sm:$0xff] %vm890_vm3, %v2086_v31  ;;  %v2087_v34 = vadd.f32 %v2337_v28, %v2079_v32  ;;  %v2096_v35 = vsel (!%p2338_p5), %vm890_vm3, %v2086_v31, 0.0 }
 0xd18   : > { %2097 = vadd.xlane.f32.xlu0 (!%p2338_p5), %v2096_v35 }
 0xd19   : > { %2089 = vst.msk [vmem:[#allocation2 + $0x8] sm:$0xff] %vm890_vm3, %v2087_v34  ;;  %v2099_v36 = vsel (!%p2338_p5), %vm890_vm3, %v2087_v34, 0.0 }
 0xd1c   : > { %2100 = vadd.xlane.f32.xlu0 %v2099_v36 }
 0xda5   : > { %v2098_v37 = vpop.xlane.xlu0 %2097 }
 0xda6   : > { %v2102_v45 = vmul.f32 0.03125, %v2098_v37 }
 0xda8   : > { %v2104_v46 = vsub.f32 %v2086_v31, %v2102_v45 }
 0xda9   : > { %v2101_v38 = vpop.xlane.xlu0 %2100 }
 0xdaa   : > { %v2103_v39 = vmul.f32 0.03125, %v2101_v38  ;;  %v2106_v40 = vmul.f32 %v2104_v46, %v2104_v46 }
 0xdac   : > { %v2105_v41 = vsub.f32 %v2087_v34, %v2103_v39  ;;  %v2108_v42 = vsel %vm890_vm3, %v2106_v40, 0.0 }
 0xdad   : > { %2109 = vadd.xlane.f32.xlu1 %v2108_v42 }
 0xdae   : > { %v2107_v43 = vmul.f32 %v2105_v41, %v2105_v41 }
 0xdb0   : > { %v2111_v44 = vsel %vm890_vm3, %v2107_v43, 0.0 }
 0xdb1   : > { %2112 = vadd.xlane.f32.xlu1 %v2111_v44 }
 0xe3a   : > { %v2110_v47 = vpop.xlane.xlu1 %2109 }
 0xe3b   : > { %v2114_v48 = vmul.f32 0.03125, %v2110_v47 }
 0xe3d   : > { %v2116_v49 = vadd.f32 1e-05, %v2114_v48 }
 0xe3e   : > { %v2113_v26 = vpop.xlane.xlu1 %2112 }
 0xe3f   : > { %2662 = vrsqrt.f32 %v2116_v49  ;;  %v2115_v50 = vmul.f32 0.03125, %v2113_v26 }
 0xe41   : > { %v2117_v51 = vadd.f32 1e-05, %v2115_v50 }
 0xe43   : > { %2664 = vrsqrt.f32 %v2117_v51 }
 0xe49   : > { %v2663_v52 = vpop.eup %2662 }
 0xe4a   : > { %v2120_v54 = vmul.f32 %v2663_v52, %v2104_v46 }
 0xe4c   : > { %v2128_v55 = vmul.f32 %v2339_v53, %v2120_v54 }
 0xe4d   : > { %v2665_v56 = vpop.eup %2664 }
 0xe4e   : > { %v2136_v57 = vadd.f32 %v2340_v27, %v2128_v55  ;;  %v2121_v58 = vmul.f32 %v2665_v56, %v2105_v41 }
 0xe50   : > { %2138 = vst.msk [vmem:[%s3148_s24] sm:$0xff] %vm890_vm3, %v2136_v57  ;;  %v2129_v25 = vmul.f32 %v2339_v53, %v2121_v58 }
 0xe52   : > { %v2137_v13 = vadd.f32 %v2340_v27, %v2129_v25 }
 0xe54   : > { %2139 = vst.msk [vmem:[%s3148_s24 + $0x8] sm:$0xff] %vm890_vm3, %v2137_v13 }
 0xe55 PF: > { %s3149_s27 = sld [smem:[#allocation3_spill]] }
 0xe5b   : > { %s29_s0 = sadd.s32 1, %s3149_s27  }
 0xe5c   : > { %p26_p6 = scmp.ge.s32.totalorder %s29_s0, 8  }
 0xe5e   :  { %28 = sbr.rel (!%p26_p6) target bundleno = 10 (0xa), region = 163 }

// kernel: simple_transformer_forward.3
= control target key start
LH: loop header
LB: loop body
LE: loop exit
PB: predicated region body
PF: predicated region fallthrough
CT: control target
= control target key end

     0   :  { %s4799_s6 = smov 1   ;;  %s4800_s10 = smov 2   ;;  %s5451_s0 = inlined_call_operand.smem [shape: u32[32], index: -1, kind: input, shape index: {}] }
   0x1   :  { %s4858_s5 = sld [smem:[%s5451_s0]]   ;;  %s4801_s14 = smov 3  }
   0x2   :  { %s4863_s9 = sld [smem:[%s5451_s0 + %s4799_s6]]   ;;  %s4802_s18 = smov 4  }
   0x3   :  { %s4868_s13 = sld [smem:[%s5451_s0 + %s4800_s10]]   ;;  %s4803_s22 = smov 5  }
   0x4   :  { %s4873_s17 = sld [smem:[%s5451_s0 + %s4801_s14]]   ;;  %s4804_s26 = smov 6  }
   0x5   :  { %s4878_s21 = sld [smem:[%s5451_s0 + %s4802_s18]]   ;;  %s4805_s30 = smov 7  }
   0x6   :  { %s4883_s25 = sld [smem:[%s5451_s0 + %s4803_s22]]   ;;  %s4806_s4 = smov 8  }
   0x7   :  { %5461 = sst [smem:[#allocation4_spill]] %s4858_s5  ;;  %s4807_s10 = smov 9  }
   0x8   :  { %5462 = sst [smem:[#allocation5_spill]] %s4863_s9  ;;  %s4808_s15 = smov 10  }
   0x9   :  { %5463 = sst [smem:[#allocation6_spill]] %s4868_s13  ;;  %s4809_s20 = smov 11  }
   0xa   :  { %5464 = sst [smem:[#allocation7_spill]] %s4873_s17  ;;  %s4811_s1 = smov 13  }
   0xb   :  { %5465 = sst [smem:[#allocation8_spill]] %s4878_s21  ;;  %s4812_s7 = smov 14  }
   0xc   :  { %5466 = sst [smem:[#allocation9_spill]] %s4883_s25  ;;  %s4814_s22 = smov 16  }
   0xd   :  { %s4888_s29 = sld [smem:[%s5451_s0 + %s4804_s26]]   ;;  %s4810_s26 = smov 12  }
   0xe   :  { %s4893_s3 = sld [smem:[%s5451_s0 + %s4805_s30]]   ;;  %s4815_s28 = smov 17  }
   0xf   :  { %s4898_s8 = sld [smem:[%s5451_s0 + %s4806_s4]]   ;;  %s4829_s16 = smov 31  }
  0x10   :  { %s4903_s14 = sld [smem:[%s5451_s0 + %s4807_s10]]  }
  0x11   :  { %s4908_s19 = sld [smem:[%s5451_s0 + %s4808_s15]]   ;;  %s4813_s15 = smov 15  }
  0x12   :  { %s4913_s24 = sld [smem:[%s5451_s0 + %s4809_s20]]  }
  0x13   :  { %5467 = sst [smem:[#allocation10_spill]] %s4888_s29 }
  0x14   :  { %5468 = sst [smem:[#allocation11_spill]] %s4893_s3 }
  0x15   :  { %5469 = sst [smem:[#allocation12_spill]] %s4898_s8 }
  0x16   :  { %5470 = sst [smem:[#allocation13_spill]] %s4903_s14 }
  0x17   :  { %5471 = sst [smem:[#allocation14_spill]] %s4908_s19 }
  0x18   :  { %5472 = sst [smem:[#allocation15_spill]] %s4913_s24 }
  0x19   :  { %s4918_s30 = sld [smem:[%s5451_s0 + %s4810_s26]]  }
  0x1a   :  { %s4923_s6 = sld [smem:[%s5451_s0 + %s4811_s1]]  }
  0x1b   :  { %s4928_s12 = sld [smem:[%s5451_s0 + %s4812_s7]]   ;;  %s4816_s7 = smov 18  }
  0x1c   :  { %s4933_s20 = sld [smem:[%s5451_s0 + %s4813_s15]]   ;;  %s4817_s15 = smov 19  }
  0x1d   :  { %s4938_s27 = sld [smem:[%s5451_s0 + %s4814_s22]]   ;;  %s4818_s22 = smov 20  }
  0x1e   :  { %s4943_s4 = sld [smem:[%s5451_s0 + %s4815_s28]]   ;;  %s4819_s28 = smov 21  }
  0x1f   :  { %5473 = sst [smem:[#allocation16_spill]] %s4918_s30 }
  0x20   :  { %5474 = sst [smem:[#allocation17_spill]] %s4923_s6 }
  0x21   :  { %s4948_s29 = sld [smem:[%s5451_s0 + %s4816_s7]]   ;;  %s4820_s7 = smov 22  }
  0x22   :  { %5475 = sst [smem:[#allocation18_spill]] %s4933_s20 }
  0x23   :  { %s4953_s21 = sld [smem:[%s5451_s0 + %s4817_s15]]   ;;  %s4821_s15 = smov 23  }
  0x24   :  { %5476 = sst [smem:[#allocation19_spill]] %s4943_s4 }
  0x25   :  { %s4958_s25 = sld [smem:[%s5451_s0 + %s4818_s22]]   ;;  %s4822_s22 = smov 24  }
  0x26   :  { %s4963_s9 = sld [smem:[%s5451_s0 + %s4819_s28]]   ;;  %s4823_s28 = smov 25  }
  0x27   :  { %s4968_s17 = sld [smem:[%s5451_s0 + %s4820_s7]]   ;;  %s4824_s7 = smov 26  }
  0x28   :  { %s4973_s5 = sld [smem:[%s5451_s0 + %s4821_s15]]   ;;  %s4825_s15 = smov 27  }
  0x29   :  { %s4978_s13 = sld [smem:[%s5451_s0 + %s4822_s22]]   ;;  %s4826_s22 = smov 28  }
  0x2c   :  { %5477 = sst [smem:[#allocation20_spill]] %s4963_s9 }
  0x2d   :  { %5478 = sst [smem:[#allocation21_spill]] %s4968_s17 }
  0x2e   :  { %5479 = sst [smem:[#allocation22_spill]] %s4973_s5 }
  0x2f   :  { %5480 = sst [smem:[#allocation23_spill]] %s4978_s13 }
  0x30   :  { %s4983_s9 = sld [smem:[%s5451_s0 + %s4823_s28]]   ;;  %s4827_s28 = smov 29  }
  0x31   :  { %s4988_s17 = sld [smem:[%s5451_s0 + %s4824_s7]]   ;;  %s4828_s7 = smov 30  }
  0x32   :  { %s4993_s5 = sld [smem:[%s5451_s0 + %s4825_s15]]  }
  0x33   :  { %s4998_s13 = sld [smem:[%s5451_s0 + %s4826_s22]]   ;;  %s5013_s22 = smov 0  }
  0x36   :  { %5481 = sst [smem:[#allocation24_spill]] %s4983_s9 }
  0x37   :  { %5482 = sst [smem:[#allocation25_spill]] %s4988_s17 }
  0x38   :  { %5483 = sst [smem:[#allocation26_spill]] %s4993_s5 }
  0x39   :  { %5484 = sst [smem:[#allocation27_spill]] %s4998_s13 }
  0x3a   :  { %s5003_s9 = sld [smem:[%s5451_s0 + %s4827_s28]]  }
  0x3b   :  { %s4046_s17 = sld [smem:[%s5451_s0 + %s4828_s7]]  }
  0x3c   :  { %s5011_s5 = sld [smem:[%s5451_s0 + %s4829_s16]]  }
  0x40   :  { %5485 = sst [smem:[#allocation28_spill]] %s5003_s9 }
  0x41   :  { %v68_v0 = vstv %s4046_s17 }
  0x42   :  { %5486 = sst [smem:[#allocation29_spill]] %s5011_s5  ;;  %69 = vst [vmem:[#allocation3] sm:$0x1] %v68_v0 }
  0x43 LB: > { %5487 = sst [smem:[#allocation30_spill]] %s4797_s22  ;;  %s5019_s23 = sadd.s32 4294967295, %s4797_s22   ;;  %s4797_s22 = sphi %s5013_s22, %s75_s22  }
  0x44   : > { %5488 = sst [smem:[#allocation31_spill]] %s5019_s23  ;;  %p4051_p0 = scmp.ge.s32.totalorder %s4797_s22, 1 }
  0x45   : > { %p1030_p1 = scmp.lt.s32.totalorder %s4797_s22, 7 }
  0x47   : > { %p1031_p2 = pnand %p4051_p0, %p1030_p1 }
  0x49   : > { %1034 = sbr.rel (%p1031_p2) target bundleno = 6288 (0x1890), region = 144 }
  0x50   : > { %s5490_s3 = sld [smem:[#allocation11_spill]]  ;;  %s5491_s14 = sld [smem:[#allocation13_spill]] }
  0x51   : > { %s5495_s6 = sld [smem:[#allocation17_spill]]  ;;  %s5496_s20 = sld [smem:[#allocation18_spill]] }
  0x52   : > { %s5497_s4 = sld [smem:[#allocation19_spill]]  ;;  %p1174_p3 = scmp.lt.s32.totalorder %s5019_s23, 5 }
  0x53   : > { %s5498_s17 = sld [smem:[#allocation20_spill]]  ;;  %s5501_s7 = sld [smem:[#allocation22_spill]] }
  0x54   : > { %s5025_s0 = scalar_select %p1174_p3, %s5019_s23, 5 }
  0x56   : > { %s4162_s26 = sshll.u32 %s5025_s0, 4  ;;  %s1219_s8 = scalar_lea.vmem %s4948_s29, %s5025_s0 }
  0x57   : > { %s5031_s2 = scalar_lea.vmem %s5490_s3, %s4162_s26  ;;  %s5034_s10 = scalar_lea.vmem %s5491_s14, %s4162_s26 }
  0x58   : > { %5500 = sst [smem:[#allocation32_spill]] %s5031_s2  ;;  %s5043_s9 = scalar_lea.vmem %s5495_s6, %s4162_s26 }
  0x59   : > { %5502 = sst [smem:[#allocation33_spill]] %s5034_s10  ;;  %s5048_s23 = scalar_lea.vmem %s5496_s20, %s4162_s26 }
  0x5a   : > { %s5053_s3 = scalar_lea.vmem %s5497_s4, %s4162_s26  ;;  %s1222_s14 = scalar_lea.vmem %s4953_s21, %s5025_s0 }
  0x5b   : > { %s1225_s10 = scalar_lea.vmem %s4958_s25, %s5025_s0  ;;  %s5062_s2 = scalar_lea.vmem %s5498_s17, %s4162_s26 }
  0x5c   : > { %s4168_s19 = sshll.u32 %s5025_s0, 5  ;;  %s5506_s6 = sld [smem:[#allocation31_spill]] }
  0x5d   : > { %s5068_s18 = scalar_lea.vmem %s5501_s7, %s4168_s19 }
  0x62   : > { %p4066_p4 = scmp.ne.s32.totalorder %s5506_s6, 0 }
  0x63   : > { %s5507_s13 = sld [smem:[#allocation6_spill]] (!%p4066_p4)  ;;  %s5508_s20 = sld [smem:[#allocation4_spill]] (!%p4066_p4)  ;;  %vm1263_vm0 = vcmask (!%p4066_p4), 64512   ;;  %vm1349_vm1 = vcmask (!%p4066_p4), 261120  }
  0x64   : > { %1252 = sbr.rel (%p4066_p4) target bundleno = 326 (0x146), region = 148  ;;  %s5509_s1 = sld [smem:[#allocation7_spill]] (!%p4066_p4) }
  0x65   : > { %s5510_s4 = sld [smem:[#allocation5_spill]] (!%p4066_p4) }
  0x69   : > { %v1255_v1 = vld [vmem:[%s5507_s13] sm:$0xff] (!%p4066_p4)  ;;  %v1254_v3 = vld [vmem:[%s5508_s20 + $0x8] sm:$0xff] (!%p4066_p4) }
  0x6a   : > { %v1253_v2 = vld [vmem:[%s5508_s20] sm:$0xff] (!%p4066_p4)  ;;  %4262 = vmatprep.subr.mxu0 (!%p4066_p4), %v1255_v1 }
  0x6b   : > { %4264 = vmatprep.mubr.msk.f32.mxu0 %vm1263_vm0, %v1253_v2  ;;  %4263 = vmatpush3.msra.mxu0 %v1255_v1  ;;  %v4067_v4 = vld [vmem:[%s5509_s1] ss:$0 sm:$0xff]  ;;  %v1346_v6 = vld [vmem:[%s5510_s4 + $0x8] sm:$0xff] }
  0x6c   : > { %4265 = vmatmul.mubr.msk.f32.vlgmr.msra.gmra.mrb[0].mxu0 %vm1263_vm0, %v1254_v3  ;;  %v1345_v9 = vld [vmem:[%s5510_s4] sm:$0xff] }
 0x13f   : > { %v4266_v5 = vpop.f32.mrb[0].mxu0 }
 0x140   : > { %v1342_v7 = vadd.f32 %v4266_v5, %v4067_v4  ;;  %v1336_v8 = vpop.f32.mrb[1].mxu0 }
 0x141   : > { %v1337_v10 = vadd.f32 %v4067_v4, %v1336_v8 }
 0x142   : > { %v1348_v11 = vadd.f32 %v1346_v6, %v1342_v7 }
 0x143   : > { %v1347_v12 = vadd.f32 %v1345_v9, %v1337_v10 }
 0x144   : > { %1351 = vst.msk [vmem:[#allocation2 + $0x8] sm:$0xff] %vm1349_vm1, %v1348_v11 }
 0x145   : > { %1350 = vst.msk [vmem:[#allocation2] sm:$0xff] %vm1349_vm1, %v1347_v12 }
 0x146 PF: > { %s5511_s13 = sld [smem:[#allocation32_spill]]  ;;  %s5512_s19 = sld [smem:[#allocation12_spill]]  ;;  %v4830_v14 = vmov 0.0   ;;  %vm4831_vm2 = vmmov 0   ;;  %vm1381_vm3 = vcmask 261120   ;;  %vm1441_vm4 = vcmask 64512  }
 0x147   : > { %4267 = vmatprep.subr.bf16.mxu1 %v4830_v14  ;;  %4271 = vmatprep.mubr.msk.bf16.mxu1 %vm4831_vm2, %v4830_v14  ;;  %s4832_s22 = smov 120   ;;  %s4833_s17 = smov 96   ;;  %vm5124_vm5 = vmpackc.low %vm1441_vm4, %vm1441_vm4  ;;  %vm1527_vm6 = vcmask 130048   ;;  %vm2265_vm7 = vcmask 195584   ;;  %vm3567_vm8 = vcmask 523264  }
 0x148   : > { %s4834_s26 = smov 80   ;;  %s4835_s28 = smov 88  }
 0x149   : > { %s4836_s1 = smov 112   ;;  %s5516_s7 = sld [smem:[#allocation9_spill]] }
 0x14a   : > { %s4837_s11 = smov 56   ;;  %s4838_s15 = smov 64  }
 0x14b   : > { %v5090_v17 = vld [vmem:[#allocation2 + $0x8] sm:$0xff]  ;;  %s5517_s30 = sld [smem:[#allocation33_spill]]  ;;  %s5518_s5 = sld [smem:[#allocation14_spill]] }
 0x14c   : > { %v4694_v13 = vld [vmem:[%s5511_s13] sm:$0xff]   ;;  %v4695_v15 = vld [vmem:[%s5511_s13 + $0x8] sm:$0xff]   ;;  %s5513_s6 = scalar_lea.vmem %s5512_s19, %s5025_s0  ;;  %s4839_s13 = smov 48  }
 0x14d   : > { %4268 = vmatpush3.bf16.msra.mxu1 %v4694_v13  ;;  %v5088_v16 = vld [vmem:[#allocation2] sm:$0xff]  ;;  %s4840_s19 = smov 72   ;;  %s5522_s24 = sld [smem:[#allocation16_spill]] }
 0x14e   : > { %4269 = vmatprep.subr.bf16.mxu1 %v4830_v14  ;;  %v1357_v18 = vpack.c.bf16 %v5090_v17, %v5088_v16  ;;  %v4070_v19 = vld [vmem:[%s5513_s6] ss:$0 sm:$0xff]  ;;  %s4841_s6 = smov 104   ;;  %s5525_s16 = scalar_lea.vmem %s4938_s27, %s5025_s0 }
 0x14f   : > { %v5146_v46 = vld [vmem:[%s5516_s7 + $0x8] sm:$0xff]  ;;  %v5149_v47 = vld [vmem:[%s5516_s7] sm:$0xff] }
 0x151   : > { %4270 = vmatpush3.bf16.msra.mxu1 %v4695_v15 }
 0x154   : > { %4272 = vmatmul.mubr.msk.bf16.vlgmr.msra.gmra.mrb[0].mxu1 %vm1381_vm3, %v1357_v18 }
 0x227   : > { %v1419_v20 = vpop.f32.mrb[0].mxu1 }
 0x228   : > { %v1420_v21 = vadd.f32 %v4070_v19, %v1419_v20  ;;  %v4273_v22 = vpop.f32.mrb[1].mxu1 }
 0x229   : > { %v1422_v23 = vpop.f32.mrb[2].mxu1 }
 0x22a   : > { %v1423_v24 = vadd.f32 %v4070_v19, %v1422_v23  ;;  %v4274_v25 = vpop.f32.mrb[3].mxu1  ;;  %v5099_v26 = vmul.f32 0.35355338, %v1420_v21 }
 0x22c   : > { %1637 = vrot.lane.b32.xlu1 %v5099_v26, %s4832_s22  ;;  %4279 = vmatprep.mubr.msk.f32.mxu1 %vm1441_vm4, %v5099_v26  ;;  %v5105_v27 = vpack.i.bf16 %v1423_v24, %v1420_v21  ;;  %v5115_v28 = vmul.f32 0.35355338, %v1423_v24 }
 0x22e   : > { %4590 = vrot.lane.b32.xlu0 %v5105_v27, %s4833_s17 }
 0x230   : > { %4600 = vrot.lane.b32.xlu1 %v5105_v27, %s4834_s26 }
 0x232   : > { %4595 = vrot.lane.b32.xlu0 %v5105_v27, %s4835_s28 }
 0x234   : > { %1837 = vrot.lane.b32.xlu1 %v5099_v26, %s4836_s1 }
 0x236   : > { %1639 = vrot.lane.b32.xlu0 %v5115_v28, %s4832_s22 }
 0x23a   : > { %1839 = vrot.lane.b32.xlu0 %v5115_v28, %s4836_s1 }
 0x29e   : > { %v1638_v29 = vpop.permute.xlu1 %1637 }
 0x29f   : > { %4293 = vmatprep.mubr.msk.f32.mxu0 %vm1441_vm4, %v1638_v29 }
 0x2a0   : > { %v4591_v30 = vpop.permute.xlu0 %4590 }
 0x2a1   : > { %v4593_v31 = vunpack.i.h.bf16 %v4591_v30  ;;  %v4592_v32 = vunpack.i.l.bf16 %v4591_v30 }
 0x2a2   : > { %v4601_v33 = vpop.permute.xlu1 %4600 }
 0x2a3   : > { %v4446_v35 = vpack.c.bf16 %v4593_v31, %v4592_v32  ;;  %v4603_v37 = vunpack.i.h.bf16 %v4601_v33  ;;  %v4602_v38 = vunpack.i.l.bf16 %v4601_v33 }
 0x2a4   : > { %v4596_v36 = vpop.permute.xlu0 %4595 }
 0x2a5   : > { %v4598_v39 = vunpack.i.h.bf16 %v4596_v36  ;;  %v4597_v40 = vunpack.i.l.bf16 %v4596_v36  ;;  %4448 = vmatprep.subr.msk.bf16.mxu1 %vm5124_vm5, %v4446_v35  ;;  %v4466_v42 = vpack.c.bf16 %v4603_v37, %v4602_v38 }
 0x2a6   : > { %4451 = vmatpush3.bf16.xpose.msk.msra.mxu1 %vm5124_vm5, %v4446_v35  ;;  %v1838_v44 = vpop.permute.xlu1 %1837 }
 0x2a7   : > { %v4456_v41 = vpack.c.bf16 %v4598_v39, %v4597_v40 }
 0x2a8   : > { %v1640_v43 = vpop.permute.xlu0 %1639 }
 0x2a9   : > { %4458 = vmatprep.subr.msk.bf16.mxu0 %vm5124_vm5, %v4456_v41 }
 0x2aa   : > { %4461 = vmatpush3.bf16.xpose.msk.msra.mxu0 %vm5124_vm5, %v4456_v41 }
 0x2ab   : > { %4468 = vmatprep.subr.msk.bf16.mxu0 %vm5124_vm5, %v4466_v42 }
 0x2ac   : > { %v1840_v45 = vpop.permute.xlu0 %1839 }
 0x2ad   : > { %4280 = vmatmul.mubr.msk.f32.vlgmr.msra.gmra.mrb[4].mxu1 %vm1441_vm4, %v5115_v28 }
 0x2b1   : > { %4294 = vmatmul.mubr.msk.f32.vlgmr.msra.gmra.mrb[0].mxu0 %vm1441_vm4, %v1640_v43 }
 0x2b2   : > { %4471 = vmatpush3.bf16.xpose.msk.msra.mxu0 %vm5124_vm5, %v4466_v42  ;;  %4307 = vmatprep.mubr.msk.f32.mxu0 %vm1441_vm4, %v1838_v44 }
 0x2b9   : > { %4308 = vmatmul.mubr.msk.f32.vlgmr.msra.gmra.mrb[2].mxu0 %vm1441_vm4, %v1840_v45 }
 0x380   : > { %v4281_v48 = vpop.f32.mrb[4].mxu1 }
 0x381   : > { %v1524_v49 = vadd.f32 %v4281_v48, %v5146_v46  ;;  %v1518_v50 = vpop.f32.mrb[5].mxu1 }
 0x382   : > { %v1519_v51 = vadd.f32 %v1518_v50, %v5149_v47 }
 0x383   : > { %v1531_v52 = vsel %vm1527_vm6, %v1524_v49, -inf }
 0x384   : > { %v4295_v53 = vpop.f32.mrb[0].mxu0  ;;  %1532 = vmax.xlane.f32.xlu0 %v1531_v52  ;;  %v1528_v54 = vsel %vm1527_vm6, %v1519_v51, -inf }
 0x385   : > { %v1725_v55 = vadd.f32 %v4295_v53, %v5146_v46  ;;  %v1719_v56 = vpop.f32.mrb[1].mxu0  ;;  %1529 = vmax.xlane.f32.xlu1 %v1528_v54 }
 0x386   : > { %v1720_v57 = vadd.f32 %v1719_v56, %v5149_v47 }
 0x387   : > { %v1731_v58 = vsel %vm1527_vm6, %v1725_v55, -inf }
 0x388   : > { %v1728_v59 = vsel %vm1527_vm6, %v1720_v57, -inf }
 0x389   : > { %1729 = vmax.xlane.f32.xlu0 %v1728_v59  ;;  %1732 = vmax.xlane.f32.xlu1 %v1731_v58 }
 0x38c   : > { %v4309_v60 = vpop.f32.mrb[2].mxu0 }
 0x38d   : > { %v5160_v61 = vadd.f32 %v4309_v60, %v5146_v46  ;;  %v1919_v62 = vpop.f32.mrb[3].mxu0 }
 0x38e   : > { %v1920_v63 = vadd.f32 %v1919_v62, %v5149_v47 }
 0x38f   : > { %v1931_v0 = vsel %vm1527_vm6, %v5160_v61, -inf }
 0x390   : > { %1932 = vmax.xlane.f32.xlu1 %v1931_v0  ;;  %v1928_v1 = vsel %vm1527_vm6, %v1920_v63, -inf }
 0x391   : > { %1929 = vmax.xlane.f32.xlu0 %v1928_v1 }
 0x3a1   : > { %4610 = vrot.lane.b32.xlu1 %v5105_v27, %s4837_s11  ;;  %s4842_s11 = smov 8  }
 0x3a7   : > { %4605 = vrot.lane.b32.xlu0 %v5105_v27, %s4838_s15  ;;  %s4843_s15 = smov 16  }
 0x411   : > { %v1533_v2 = vpop.xlane.xlu0 %1532 }
 0x412   : > { %v1535_v3 = vsub.f32 %v1524_v49, %v1533_v2  ;;  %v1530_v4 = vpop.xlane.xlu1 %1529 }
 0x413   : > { %v1534_v5 = vsub.f32 %v1519_v51, %v1530_v4 }
 0x414   : > { %v1538_v6 = vmul.f32 1.442695, %v1535_v3 }
 0x415   : > { %v1536_v7 = vmul.f32 1.442695, %v1534_v5 }
 0x416   : > { %4710 = vpow2.f32 %v1538_v6  ;;  %v1730_v8 = vpop.xlane.xlu0 %1729  ;;  %v1733_v9 = vpop.xlane.xlu1 %1732 }
 0x417   : > { %4712 = vpow2.f32 %v1536_v7  ;;  %v1734_v10 = vsub.f32 %v1720_v57, %v1730_v8  ;;  %v1735_v11 = vsub.f32 %v1725_v55, %v1733_v9 }
 0x419   : > { %v1736_v12 = vmul.f32 1.442695, %v1734_v10  ;;  %v1738_v13 = vmul.f32 1.442695, %v1735_v11 }
 0x41b   : > { %4714 = vpow2.f32 %v1736_v12 }
 0x41c   : > { %4716 = vpow2.f32 %v1738_v13 }
 0x41d   : > { %v1933_v15 = vpop.xlane.xlu1 %1932 }
 0x41e   : > { %v1930_v18 = vpop.xlane.xlu0 %1929  ;;  %v1935_v43 = vsub.f32 %v5160_v61, %v1933_v15 }
 0x41f   : > { %v1934_v19 = vsub.f32 %v1920_v63, %v1930_v18 }
 0x420   : > { %v4711_v20 = vpop.eup %4710  ;;  %v1938_v44 = vmul.f32 1.442695, %v1935_v43 }
 0x421   : > { %v4713_v21 = vpop.eup %4712  ;;  %v1936_v22 = vmul.f32 1.442695, %v1934_v19  ;;  %v4611_v23 = vpop.permute.xlu1 %4610  ;;  %v1543_v24 = vsel %vm1527_vm6, %v4711_v20, 0.0 }
 0x422   : > { %v4613_v25 = vunpack.i.h.bf16 %v4611_v23  ;;  %v4606_v29 = vpop.permute.xlu0 %4605  ;;  %1544 = vadd.xlane.f32.xlu1 %v1543_v24  ;;  %v1540_v30 = vsel %vm1527_vm6, %v4713_v21, 0.0  ;;  %v4612_v31 = vunpack.i.l.bf16 %v4611_v23 }
 0x423   : > { %4718 = vpow2.f32 %v1936_v22  ;;  %v4608_v32 = vunpack.i.h.bf16 %v4606_v29  ;;  %v4607_v33 = vunpack.i.l.bf16 %v4606_v29  ;;  %1541 = vadd.xlane.f32.xlu0 %v1540_v30 }
 0x424   : > { %v4462_v39 = vpack.c.bf16 %v4613_v25, %v4612_v31  ;;  %4720 = vpow2.f32 %v1938_v44 }
 0x425   : > { %v4715_v35 = vpop.eup %4714  ;;  %v4452_v36 = vpack.c.bf16 %v4608_v32, %v4607_v33 }
 0x426   : > { %v4717_v37 = vpop.eup %4716  ;;  %v1740_v38 = vsel %vm1527_vm6, %v4715_v35, 0.0 }
 0x427   : > { %4453 = vmatprep.subr.bf16.mxu1 %v4452_v36  ;;  %1741 = vadd.xlane.f32.xlu0 %v1740_v38  ;;  %v1743_v40 = vsel %vm1527_vm6, %v4717_v37, 0.0 }
 0x428   : > { %1744 = vadd.xlane.f32.xlu1 %v1743_v40  ;;  %4455 = vmatpush3.bf16.msra.mxu1 %v4452_v36 }
 0x429   : > { %4463 = vmatprep.subr.bf16.mxu1 %v4462_v39 }
 0x42d   : > { %v4719_v41 = vpop.eup %4718 }
 0x42e   : > { %v1940_v42 = vsel %vm1527_vm6, %v4719_v41, 0.0  ;;  %v4721_v45 = vpop.eup %4720 }
 0x42f   : > { %1941 = vadd.xlane.f32.xlu0 %v1940_v42  ;;  %v1943_v48 = vsel %vm1527_vm6, %v4721_v45, 0.0 }
 0x439   : > { %4615 = vrot.lane.b32.xlu1 %v5105_v27, %s4839_s13  ;;  %s4844_s13 = smov 40  }
 0x445   : > { %4620 = vrot.lane.b32.xlu0 %v5105_v27, %s4840_s19 }
 0x449   : > { %2039 = vrot.lane.b32.xlu0 %v5115_v28, %s4841_s6 }
 0x45d   : > { %1944 = vadd.xlane.f32.xlu1 %v1943_v48 }
 0x46e   : > { %2037 = vrot.lane.b32.xlu1 %v5099_v26, %s4841_s6 }
 0x4af   : > { %v1545_v49 = vpop.xlane.xlu1 %1544 }
 0x4b0   : > { %4722 = vrcp.f32 %v1545_v49  ;;  %v1542_v50 = vpop.xlane.xlu0 %1541 }
 0x4b1   : > { %4724 = vrcp.f32 %v1542_v50 }
 0x4b4   : > { %v1742_v51 = vpop.xlane.xlu0 %1741 }
 0x4b5   : > { %4726 = vrcp.f32 %v1742_v51  ;;  %v1745_v52 = vpop.xlane.xlu1 %1744 }
 0x4b6   : > { %4728 = vrcp.f32 %v1745_v52  ;;  %v4697_v52 = vld [vmem:[%s5517_s30 + $0x8] sm:$0xff]  }
 0x4b9   : > { %v4616_v53 = vpop.permute.xlu1 %4615 }
 0x4ba   : > { %v4723_v54 = vpop.eup %4722  ;;  %v4618_v55 = vunpack.i.h.bf16 %v4616_v53  ;;  %v4617_v56 = vunpack.i.l.bf16 %v4616_v53 }
 0x4bb   : > { %v4725_v28 = vpop.eup %4724  ;;  %v1549_v59 = vmul.f32 %v4723_v54, %v4711_v20 }
 0x4bc   : > { %v1942_v57 = vpop.xlane.xlu0 %1941  ;;  %v1548_v58 = vmul.f32 %v4725_v28, %v4713_v21  ;;  %v4472_v60 = vpack.c.bf16 %v4618_v55, %v4617_v56 }
 0x4bd   : > { %4730 = vrcp.f32 %v1942_v57 }
 0x4be   : > { %4286 = vmatprep.mubr.msk.f32.mxu1 %vm1527_vm6, %v1548_v58 }
 0x4bf   : > { %v4727_v26 = vpop.eup %4726  ;;  %4287 = vmatmul.mubr.msk.f32.vlgmr.msra.gmra.mrb[6].mxu1 %vm1527_vm6, %v1549_v59 }
 0x4c0   : > { %v4729_v61 = vpop.eup %4728  ;;  %4465 = vmatpush3.bf16.msra.mxu1 %v4462_v39  ;;  %v4621_v62 = vpop.permute.xlu0 %4620  ;;  %v1748_v63 = vmul.f32 %v4727_v26, %v4715_v35 }
 0x4c1   : > { %v1749_v0 = vmul.f32 %v4729_v61, %v4717_v37  ;;  %v4623_v1 = vunpack.i.h.bf16 %v4621_v62  ;;  %v4622_v2 = vunpack.i.l.bf16 %v4621_v62  ;;  %4473 = vmatprep.subr.bf16.mxu1 %v4472_v60 }
 0x4c2   : > { %4300 = vmatprep.mubr.msk.f32.mxu1 %vm1527_vm6, %v1748_v63 }
 0x4c3   : > { %v4476_v3 = vpack.c.bf16 %v4623_v1, %v4622_v2  ;;  %4301 = vmatmul.mubr.msk.f32.vlgmr.msra.gmra.mrb[8].mxu1 %vm1527_vm6, %v1749_v0 }
 0x4c4   : > { %4475 = vmatpush3.bf16.msra.mxu1 %v4472_v60  ;;  %v2040_v10 = vpop.permute.xlu0 %2039 }
 0x4c5   : > { %4478 = vmatprep.subr.msk.bf16.mxu1 %vm5124_vm5, %v4476_v3 }
 0x4c7   : > { %v4731_v4 = vpop.eup %4730 }
 0x4c8   : > { %v1948_v5 = vmul.f32 %v4731_v4, %v4719_v41 }
 0x4ca   : > { %4314 = vmatprep.mubr.msk.f32.mxu1 %vm1527_vm6, %v1948_v5 }
 0x4ea   : > { %v1945_v6 = vpop.xlane.xlu1 %1944 }
 0x4eb   : > { %4732 = vrcp.f32 %v1945_v6 }
 0x4ee   : > { %v2038_v9 = vpop.permute.xlu1 %2037 }
 0x4f5   : > { %v4733_v7 = vpop.eup %4732 }
 0x4f6   : > { %v1949_v8 = vmul.f32 %v4733_v7, %v4721_v45 }
 0x4f8   : > { %4315 = vmatmul.mubr.msk.f32.vlgmr.msra.gmra.mrb[10].mxu1 %vm1527_vm6, %v1949_v8 }
 0x4f9   : > { %4481 = vmatpush3.bf16.xpose.msk.msra.mxu1 %vm5124_vm5, %v4476_v3  ;;  %4321 = vmatprep.mubr.msk.f32.mxu1 %vm1441_vm4, %v2038_v9 }
 0x4fa   : > { %4339 = vmatprep.subr.bf16.mxu1 %v4830_v14 }
 0x500   : > { %4322 = vmatmul.mubr.msk.f32.vlgmr.msra.gmra.mrb[12].mxu1 %vm1441_vm4, %v2040_v10 }
 0x501   : > { %4343 = vmatprep.mubr.msk.bf16.mxu1 %vm4831_vm2, %v4830_v14 }
 0x592   : > { %v5197_v11 = vpop.f32.mrb[6].mxu1 }
 0x593   : > { %v5199_v12 = vpop.f32.mrb[7].mxu1 }
 0x596   : > { %v4302_v13 = vpop.f32.mrb[8].mxu1 }
 0x597   : > { %v1828_v15 = vpop.f32.mrb[9].mxu1 }
 0x598   : > { %v4629_v18 = vpack.i.bf16 %v4302_v13, %v1828_v15 }
 0x5cb   : > { %v4316_v19 = vpop.f32.mrb[10].mxu1 }
 0x5cc   : > { %v2028_v20 = vpop.f32.mrb[11].mxu1 }
 0x5cd   : > { %v4634_v21 = vpack.i.bf16 %v4316_v19, %v2028_v20 }
 0x5d3   : > { %v4323_v22 = vpop.f32.mrb[12].mxu1 }
 0x5d4   : > { %v2125_v23 = vadd.f32 %v4323_v22, %v5146_v46  ;;  %v2119_v24 = vpop.f32.mrb[13].mxu1 }
 0x5d5   : > { %v2120_v25 = vadd.f32 %v2119_v24, %v5149_v47 }
 0x5d6   : > { %v2131_v29 = vsel %vm1527_vm6, %v2125_v23, -inf }
 0x5d7   : > { %2132 = vmax.xlane.f32.xlu0 %v2131_v29  ;;  %v2128_v30 = vsel %vm1527_vm6, %v2120_v25, -inf }
 0x5d8   : > { %2129 = vmax.xlane.f32.xlu1 %v2128_v30 }
 0x664   : > { %v2133_v31 = vpop.xlane.xlu0 %2132 }
 0x665   : > { %v2135_v32 = vsub.f32 %v2125_v23, %v2133_v31  ;;  %v2130_v33 = vpop.xlane.xlu1 %2129  ;;  %v4698_v31 = vld [vmem:[%s5048_s23] sm:$0xff]  }
 0x666   : > { %v2134_v35 = vsub.f32 %v2120_v25, %v2130_v33  ;;  %4340 = vmatpush3.bf16.msra.mxu1 %v4698_v31 }
 0x667   : > { %v2138_v36 = vmul.f32 1.442695, %v2135_v32  ;;  %4341 = vmatprep.subr.bf16.mxu1 %v4830_v14  ;;  %v4699_v32 = vld [vmem:[%s5048_s23 + $0x8] sm:$0xff]  }
 0x668   : > { %v2136_v37 = vmul.f32 1.442695, %v2134_v35 }
 0x669   : > { %4734 = vpow2.f32 %v2138_v36 }
 0x66a   : > { %4736 = vpow2.f32 %v2136_v37  ;;  %4342 = vmatpush3.bf16.msra.mxu1 %v4699_v32  ;;  %v4700_v37 = vld [vmem:[%s5043_s9] sm:$0xff]  }
 0x673   : > { %v4735_v38 = vpop.eup %4734 }
 0x674   : > { %v4737_v39 = vpop.eup %4736  ;;  %v2143_v46 = vsel %vm1527_vm6, %v4735_v38, 0.0 }
 0x675   : > { %2144 = vadd.xlane.f32.xlu1 %v2143_v46  ;;  %v2140_v47 = vsel %vm1527_vm6, %v4737_v39, 0.0 }
 0x676   : > { %2141 = vadd.xlane.f32.xlu0 %v2140_v47 }
 0x686   : > { %4630 = vrot.lane.b32.xlu1 %v4629_v18, %s4842_s11 }
 0x68a   : > { %4635 = vrot.lane.b32.xlu1 %v4634_v21, %s4843_s15 }
 0x68c   : > { %4625 = vrot.lane.b32.xlu0 %v5105_v27, %s4844_s13  ;;  %v4696_v27 = vld [vmem:[%s5517_s30] sm:$0xff]   ;;  %s4845_s13 = smov 24   ;;  %s5519_s30 = scalar_lea.vmem %s5518_s5, %s5025_s0 }
 0x68d   : > { %v4098_v6 = vld [vmem:[%s5519_s30] ss:$0 sm:$0xff]  ;;  %s5520_s5 = sld [smem:[#allocation8_spill]]  ;;  %s5521_s30 = sld [smem:[#allocation15_spill]] }
 0x693   : > { %v1354_v33 = vld [vmem:[%s5520_s5] sm:$0xff]  ;;  %v1355_v35 = vld [vmem:[%s5520_s5 + $0x8] sm:$0xff]  ;;  %s5523_s23 = scalar_lea.vmem %s5521_s30, %s5025_s0 }
 0x694   : > { %v1356_v36 = vpack.c.bf16 %v1355_v35, %v1354_v33 }
 0x696   : > { %4344 = vmatmul.mubr.msk.bf16.vlgmr.msra.gmra.mrb[16].mxu1 %vm1381_vm3, %v1356_v36 }
 0x702   : > { %v2145_v40 = vpop.xlane.xlu1 %2144 }
 0x703   : > { %4738 = vrcp.f32 %v2145_v40  ;;  %v2142_v41 = vpop.xlane.xlu0 %2141 }
 0x704   : > { %4740 = vrcp.f32 %v2142_v41 }
 0x706   : > { %v4631_v55 = vpop.permute.xlu1 %4630 }
 0x707   : > { %v4626_v42 = vpop.permute.xlu0 %4625  ;;  %v4633_v57 = vunpack.i.h.bf16 %v4631_v55  ;;  %v4632_v58 = vunpack.i.l.bf16 %v4631_v55 }
 0x708   : > { %v4628_v43 = vunpack.i.h.bf16 %v4626_v42  ;;  %v4627_v44 = vunpack.i.l.bf16 %v4626_v42 }
 0x709   : > { %v2262_v61 = vsel %vm1441_vm4, %v5197_v11, %v4633_v57  ;;  %v2261_v62 = vsel %vm1441_vm4, %v5199_v12, %v4632_v58 }
 0x70a   : > { %v4482_v45 = vpack.c.bf16 %v4628_v43, %v4627_v44  ;;  %v4636_v56 = vpop.permute.xlu1 %4635  ;;  %v4102_v44 = vld [vmem:[%s5523_s23] ss:$0 sm:$0xff] }
 0x70b   : > { %v4638_v59 = vunpack.i.h.bf16 %v4636_v56  ;;  %v4637_v26 = vunpack.i.l.bf16 %v4636_v56 }
 0x70c   : > { %4483 = vmatprep.subr.bf16.mxu0 %v4482_v45 }
 0x70d   : > { %v4739_v48 = vpop.eup %4738  ;;  %4485 = vmatpush3.bf16.msra.mxu0 %v4482_v45  ;;  %v2263_v1 = vsel %vm1527_vm6, %v2261_v62, %v4637_v26  ;;  %v2264_v2 = vsel %vm1527_vm6, %v2262_v61, %v4638_v59 }
 0x70e   : > { %v4741_v49 = vpop.eup %4740  ;;  %4331 = vmatprep.subr.bf16.mxu0 %v4830_v14  ;;  %v2149_v51 = vmul.f32 %v4739_v48, %v4735_v38  ;;  %v4701_v38 = vld [vmem:[%s5043_s9 + $0x8] sm:$0xff]   ;;  %s5524_s9 = scalar_lea.vmem %s5522_s24, %s5025_s0  ;;  %s5526_s24 = scalar_lea.vmem %s4928_s12, %s5025_s0 }
 0x70f   : > { %v2148_v50 = vmul.f32 %v4741_v49, %v4737_v39 }
 0x711   : > { %4328 = vmatprep.mubr.msk.f32.mxu0 %vm1527_vm6, %v2148_v50 }
 0x712   : > { %4329 = vmatmul.mubr.msk.f32.vlgmr.msra.gmra.mrb[4].mxu0 %vm1527_vm6, %v2149_v51  ;;  %v4103_v51 = vld [vmem:[%s5524_s9] ss:$0 sm:$0xff] }
 0x713   : > { %4335 = vmatprep.mubr.msk.bf16.mxu0 %vm4831_vm2, %v4830_v14  ;;  %4332 = vmatpush3.bf16.msra.mxu0 %v4696_v27 }
 0x714   : > { %4333 = vmatprep.subr.bf16.mxu0 %v4830_v14 }
 0x717   : > { %4334 = vmatpush3.bf16.msra.mxu0 %v4697_v52 }
 0x718   : > { %4347 = vmatprep.subr.bf16.mxu0 %v4830_v14 }
 0x769   : > { %v2438_v55 = vpop.f32.mrb[16].mxu1 }
 0x76a   : > { %v4345_v57 = vpop.f32.mrb[17].mxu1 }
 0x76b   : > { %v2441_v58 = vpop.f32.mrb[18].mxu1 }
 0x76c   : > { %v4346_v26 = vpop.f32.mrb[19].mxu1 }
 0x7e5   : > { %v4330_v53 = vpop.f32.mrb[4].mxu0 }
 0x7e6   : > { %v2228_v54 = vpop.f32.mrb[5].mxu0 }
 0x7e7   : > { %v4639_v28 = vpack.i.bf16 %v4330_v53, %v2228_v54 }
 0x7e9   : > { %4640 = vrot.lane.b32.xlu0 %v4639_v28, %s4845_s13  ;;  %v4104_v28 = vld [vmem:[%s5525_s16] ss:$0 sm:$0xff]  ;;  %s5527_s16 = sld [smem:[#allocation10_spill]] }
 0x7ea   : > { %v2439_v56 = vadd.f32 %v4104_v28, %v2438_v55  ;;  %v2442_v59 = vadd.f32 %v4104_v28, %v2441_v58 }
 0x7ec   : > { %v5265_v61 = vpack.i.bf16 %v2442_v59, %v2439_v56 }
 0x85b   : > { %v4641_v60 = vpop.permute.xlu0 %4640 }
 0x85c   : > { %v4643_v63 = vunpack.i.h.bf16 %v4641_v60  ;;  %v4642_v0 = vunpack.i.l.bf16 %v4641_v60  ;;  %v4486_v60 = vpack.c.bf16 %v2442_v59, %v2439_v56 }
 0x85e   : > { %v2266_v3 = vsel %vm2265_vm7, %v2263_v1, %v4642_v0  ;;  %v2267_v4 = vsel %vm2265_vm7, %v2264_v2, %v4643_v63  ;;  %4488 = vmatprep.subr.msk.bf16.mxu1 %vm5124_vm5, %v4486_v60  ;;  %v4108_v2 = vld [vmem:[%s5526_s24] ss:$0 sm:$0xff] }
 0x85f   : > { %v2268_v5 = vpack.c.bf16 %v2267_v4, %v2266_v3  ;;  %4491 = vmatpush3.bf16.xpose.msk.msra.mxu1 %vm5124_vm5, %v4486_v60 }
 0x861   : > { %4336 = vmatmul.mubr.msk.bf16.vlgmr.msra.gmra.mrb[8].mxu0 %vm1381_vm3, %v2268_v5 }
 0x862   : > { %4351 = vmatprep.mubr.msk.bf16.mxu0 %vm4831_vm2, %v4830_v14  ;;  %4348 = vmatpush3.bf16.msra.mxu0 %v4700_v37 }
 0x863   : > { %4349 = vmatprep.subr.bf16.mxu0 %v4830_v14 }
 0x866   : > { %4350 = vmatpush3.bf16.msra.mxu0 %v4701_v38 }
 0x934   : > { %v2324_v7 = vpop.f32.mrb[8].mxu0 }
 0x935   : > { %v2325_v8 = vadd.f32 %v4098_v6, %v2324_v7  ;;  %v4337_v9 = vpop.f32.mrb[9].mxu0 }
 0x936   : > { %v2327_v10 = vpop.f32.mrb[10].mxu0 }
 0x937   : > { %v2328_v11 = vadd.f32 %v4098_v6, %v2327_v10  ;;  %v4338_v12 = vpop.f32.mrb[11].mxu0  ;;  %v2331_v13 = vadd.f32 %v2325_v8, %v5088_v16 }
 0x939   : > { %v2335_v15 = vsel %vm1381_vm3, %v2331_v13, 0.0  ;;  %v2332_v18 = vadd.f32 %v2328_v11, %v5090_v17 }
 0x93a   : > { %2336 = vadd.xlane.f32.xlu1 %v2335_v15 }
 0x93b   : > { %v2338_v19 = vsel %vm1381_vm3, %v2332_v18, 0.0 }
 0x93c   : > { %2339 = vadd.xlane.f32.xlu0 %v2338_v19 }
 0x9c7   : > { %v2337_v20 = vpop.xlane.xlu1 %2336 }
 0x9c8   : > { %v2342_v21 = vmul.f32 0.03125, %v2337_v20 }
 0x9c9   : > { %v2340_v22 = vpop.xlane.xlu0 %2339 }
 0x9ca   : > { %v2344_v23 = vsub.f32 %v2331_v13, %v2342_v21  ;;  %v2343_v24 = vmul.f32 0.03125, %v2340_v22  ;;  %v5307_v22 = vld [vmem:[%s5527_s16 + $0x8] sm:$0xff] }
 0x9cc   : > { %v2345_v25 = vsub.f32 %v2332_v18, %v2343_v24  ;;  %v2346_v16 = vmul.f32 %v2344_v23, %v2344_v23 }
 0x9ce   : > { %v2348_v29 = vsel %vm1381_vm3, %v2346_v16, 0.0  ;;  %v2347_v30 = vmul.f32 %v2345_v25, %v2345_v25 }
 0x9cf   : > { %2349 = vadd.xlane.f32.xlu0 %v2348_v29 }
 0x9d0   : > { %v2351_v17 = vsel %vm1381_vm3, %v2347_v30, 0.0 }
 0x9d1   : > { %2352 = vadd.xlane.f32.xlu1 %v2351_v17 }
 0x9e5   : > { %4645 = vrot.lane.b32.xlu0 %v5265_v61, %s4832_s22 }
 0xa5c   : > { %v2350_v39 = vpop.xlane.xlu0 %2349 }
 0xa5d   : > { %v2354_v46 = vmul.f32 0.03125, %v2350_v39 }
 0xa5e   : > { %v2353_v47 = vpop.xlane.xlu1 %2352 }
 0xa5f   : > { %v2356_v40 = vadd.f32 1e-05, %v2354_v46  ;;  %v2355_v41 = vmul.f32 0.03125, %v2353_v47 }
 0xa60   : > { %v4646_v62 = vpop.permute.xlu0 %4645 }
 0xa61   : > { %4742 = vrsqrt.f32 %v2356_v40  ;;  %v2357_v42 = vadd.f32 1e-05, %v2355_v41  ;;  %v4648_v63 = vunpack.i.h.bf16 %v4646_v62  ;;  %v4647_v0 = vunpack.i.l.bf16 %v4646_v62 }
 0xa63   : > { %4744 = vrsqrt.f32 %v2357_v42  ;;  %v4496_v1 = vpack.c.bf16 %v4648_v63, %v4647_v0 }
 0xa65   : > { %4498 = vmatprep.subr.msk.bf16.mxu0 %vm5124_vm5, %v4496_v1 }
 0xa6b   : > { %v4743_v43 = vpop.eup %4742 }
 0xa6c   : > { %v2360_v45 = vmul.f32 %v4743_v43, %v2344_v23  ;;  %v5310_v23 = vld [vmem:[%s5527_s16] sm:$0xff] }
 0xa6d   : > { %v4745_v48 = vpop.eup %4744 }
 0xa6e   : > { %v2368_v49 = vmul.f32 %v4102_v44, %v2360_v45  ;;  %v2361_v50 = vmul.f32 %v4745_v48, %v2345_v25 }
 0xa70   : > { %v2369_v27 = vmul.f32 %v4102_v44, %v2361_v50  ;;  %v5255_v52 = vadd.f32 %v4103_v51, %v2368_v49 }
 0xa72   : > { %v5257_v53 = vadd.f32 %v4103_v51, %v2369_v27 }
 0xa74   : > { %v2445_v54 = vpack.c.bf16 %v5257_v53, %v5255_v52 }
 0xa76   : > { %4352 = vmatmul.mubr.msk.bf16.vlgmr.msra.gmra.mrb[12].mxu0 %vm1381_vm3, %v2445_v54 }
 0xa77   : > { %4501 = vmatpush3.bf16.xpose.msk.msra.mxu0 %vm5124_vm5, %v4496_v1 }
 0xb49   : > { %v2506_v3 = vpop.f32.mrb[12].mxu0 }
 0xb4a   : > { %v2507_v4 = vadd.f32 %v4108_v2, %v2506_v3  ;;  %v4353_v5 = vpop.f32.mrb[13].mxu0 }
 0xb4b   : > { %v2509_v6 = vpop.f32.mrb[14].mxu0 }
 0xb4c   : > { %v5280_v7 = vmul.f32 0.35355338, %v2507_v4  ;;  %v2510_v8 = vadd.f32 %v4108_v2, %v2509_v6  ;;  %v4354_v9 = vpop.f32.mrb[15].mxu0 }
 0xb4e   : > { %v5282_v10 = vmul.f32 0.35355338, %v2510_v8  ;;  %2718 = vrot.lane.b32.xlu1 %v5280_v7, %s4832_s22  ;;  %4359 = vmatprep.mubr.msk.f32.mxu1 %vm1441_vm4, %v5280_v7 }
 0xb50   : > { %2720 = vrot.lane.b32.xlu0 %v5282_v10, %s4832_s22  ;;  %4360 = vmatmul.mubr.msk.f32.vlgmr.msra.gmra.mrb[14].mxu1 %vm1441_vm4, %v5282_v10 }
 0xb52   : > { %4650 = vrot.lane.b32.xlu1 %v5265_v61, %s4836_s1 }
 0xb54   : > { %2920 = vrot.lane.b32.xlu0 %v5282_v10, %s4836_s1 }
 0xb56   : > { %2918 = vrot.lane.b32.xlu1 %v5280_v7, %s4836_s1 }
 0xbc0   : > { %v2719_v11 = vpop.permute.xlu1 %2718 }
 0xbc1   : > { %4373 = vmatprep.mubr.msk.f32.mxu0 %vm1441_vm4, %v2719_v11 }
 0xbc2   : > { %v2721_v12 = vpop.permute.xlu0 %2720 }
 0xbc3   : > { %4374 = vmatmul.mubr.msk.f32.vlgmr.msra.gmra.mrb[6].mxu0 %vm1441_vm4, %v2721_v12 }
 0xbc4   : > { %v4651_v13 = vpop.permute.xlu1 %4650 }
 0xbc5   : > { %v4653_v15 = vunpack.i.h.bf16 %v4651_v13  ;;  %v4652_v18 = vunpack.i.l.bf16 %v4651_v13 }
 0xbc6   : > { %v2921_v21 = vpop.permute.xlu0 %2920 }
 0xbc7   : > { %v4506_v19 = vpack.c.bf16 %v4653_v15, %v4652_v18 }
 0xbc8   : > { %v2919_v20 = vpop.permute.xlu1 %2918 }
 0xbc9   : > { %4508 = vmatprep.subr.msk.bf16.mxu0 %vm5124_vm5, %v4506_v19  ;;  %4387 = vmatprep.mubr.msk.f32.mxu0 %vm1441_vm4, %v2919_v20 }
 0xbca   : > { %4511 = vmatpush3.bf16.xpose.msk.msra.mxu0 %vm5124_vm5, %v4506_v19 }
 0xbd1   : > { %4388 = vmatmul.mubr.msk.f32.vlgmr.msra.gmra.mrb[16].mxu0 %vm1441_vm4, %v2921_v21 }
 0xc23   : > { %v4361_v24 = vpop.f32.mrb[14].mxu1 }
 0xc24   : > { %v2606_v25 = vadd.f32 %v4361_v24, %v5307_v22  ;;  %v2600_v16 = vpop.f32.mrb[15].mxu1 }
 0xc25   : > { %v2601_v29 = vadd.f32 %v2600_v16, %v5310_v23 }
 0xc26   : > { %v2612_v30 = vsel %vm1527_vm6, %v2606_v25, -inf }
 0xc27   : > { %2613 = vmax.xlane.f32.xlu0 %v2612_v30  ;;  %v2609_v17 = vsel %vm1527_vm6, %v2601_v29, -inf }
 0xc28   : > { %2610 = vmax.xlane.f32.xlu1 %v2609_v17 }
 0xc96   : > { %v4375_v31 = vpop.f32.mrb[6].mxu0 }
 0xc97   : > { %v2806_v32 = vadd.f32 %v4375_v31, %v5307_v22  ;;  %v2800_v33 = vpop.f32.mrb[7].mxu0 }
 0xc98   : > { %v2801_v35 = vadd.f32 %v2800_v33, %v5310_v23 }
 0xc99   : > { %v2812_v36 = vsel %vm1527_vm6, %v2806_v32, -inf }
 0xc9a   : > { %2813 = vmax.xlane.f32.xlu1 %v2812_v36  ;;  %v2809_v37 = vsel %vm1527_vm6, %v2801_v35, -inf }
 0xc9b   : > { %2810 = vmax.xlane.f32.xlu0 %v2809_v37 }
 0xca4   : > { %v4389_v38 = vpop.f32.mrb[16].mxu0 }
 0xca5   : > { %v3006_v39 = vadd.f32 %v4389_v38, %v5307_v22  ;;  %v3000_v46 = vpop.f32.mrb[17].mxu0 }
 0xca6   : > { %v3001_v47 = vadd.f32 %v3000_v46, %v5310_v23 }
 0xca7   : > { %v3012_v40 = vsel %vm1527_vm6, %v3006_v39, -inf }
 0xca8   : > { %3013 = vmax.xlane.f32.xlu1 %v3012_v40  ;;  %v3009_v41 = vsel %vm1527_vm6, %v3001_v47, -inf }
 0xca9   : > { %3010 = vmax.xlane.f32.xlu0 %v3009_v41 }
 0xcb4   : > { %v2614_v42 = vpop.xlane.xlu0 %2613 }
 0xcb5   : > { %v2611_v43 = vpop.xlane.xlu1 %2610  ;;  %v2616_v44 = vsub.f32 %v2606_v25, %v2614_v42 }
 0xcb6   : > { %v2615_v45 = vsub.f32 %v2601_v29, %v2611_v43 }
 0xcb7   : > { %v2619_v48 = vmul.f32 1.442695, %v2616_v44 }
 0xcb8   : > { %v2617_v49 = vmul.f32 1.442695, %v2615_v45 }
 0xcb9   : > { %4660 = vrot.lane.b32.xlu1 %v5265_v61, %s4835_s28  ;;  %4746 = vpow2.f32 %v2619_v48 }
 0xcba   : > { %4748 = vpow2.f32 %v2617_v49 }
 0xcbf   : > { %4655 = vrot.lane.b32.xlu0 %v5265_v61, %s4833_s17 }
 0xcc3   : > { %v4747_v50 = vpop.eup %4746 }
 0xcc4   : > { %v4749_v51 = vpop.eup %4748  ;;  %v2624_v27 = vsel %vm1527_vm6, %v4747_v50, 0.0 }
 0xcc5   : > { %v2621_v54 = vsel %vm1527_vm6, %v4749_v51, 0.0 }
 0xcdd   : > { %2625 = vadd.xlane.f32.xlu1 %v2624_v27 }
 0xcde   : > { %2622 = vadd.xlane.f32.xlu0 %v2621_v54 }
 0xd27   : > { %v2814_v28 = vpop.xlane.xlu1 %2813 }
 0xd28   : > { %v2816_v55 = vsub.f32 %v2806_v32, %v2814_v28  ;;  %v2811_v56 = vpop.xlane.xlu0 %2810 }
 0xd29   : > { %v2815_v57 = vsub.f32 %v2801_v35, %v2811_v56 }
 0xd2a   : > { %v2819_v58 = vmul.f32 1.442695, %v2816_v55 }
 0xd2b   : > { %v2817_v59 = vmul.f32 1.442695, %v2815_v57 }
 0xd2c   : > { %4750 = vpow2.f32 %v2819_v58 }
 0xd2d   : > { %4752 = vpow2.f32 %v2817_v59 }
 0xd35   : > { %v3014_v26 = vpop.xlane.xlu1 %3013 }
 0xd36   : > { %v4751_v60 = vpop.eup %4750  ;;  %v3011_v62 = vpop.xlane.xlu0 %3010  ;;  %v3016_v19 = vsub.f32 %v3006_v39, %v3014_v26 }
 0xd37   : > { %v4753_v63 = vpop.eup %4752  ;;  %v3015_v0 = vsub.f32 %v3001_v47, %v3011_v62  ;;  %v2824_v1 = vsel %vm1527_vm6, %v4751_v60, 0.0 }
 0xd38   : > { %2825 = vadd.xlane.f32.xlu1 %v2824_v1  ;;  %v2821_v2 = vsel %vm1527_vm6, %v4753_v63, 0.0  ;;  %v3019_v20 = vmul.f32 1.442695, %v3016_v19 }
 0xd39   : > { %v3017_v3 = vmul.f32 1.442695, %v3015_v0  ;;  %v4661_v4 = vpop.permute.xlu1 %4660  ;;  %2822 = vadd.xlane.f32.xlu0 %v2821_v2 }
 0xd3a   : > { %v4663_v5 = vunpack.i.h.bf16 %v4661_v4  ;;  %v4656_v6 = vpop.permute.xlu0 %4655  ;;  %v4662_v8 = vunpack.i.l.bf16 %v4661_v4 }
 0xd3b   : > { %4754 = vpow2.f32 %v3017_v3  ;;  %v4658_v9 = vunpack.i.h.bf16 %v4656_v6  ;;  %v4657_v11 = vunpack.i.l.bf16 %v4656_v6 }
 0xd3c   : > { %v4502_v13 = vpack.c.bf16 %v4663_v5, %v4662_v8  ;;  %4756 = vpow2.f32 %v3019_v20 }
 0xd3d   : > { %v4492_v12 = vpack.c.bf16 %v4658_v9, %v4657_v11 }
 0xd3f   : > { %4493 = vmatprep.subr.bf16.mxu1 %v4492_v12 }
 0xd40   : > { %4495 = vmatpush3.bf16.msra.mxu1 %v4492_v12 }
 0xd41   : > { %4503 = vmatprep.subr.bf16.mxu1 %v4502_v13 }
 0xd45   : > { %v4755_v15 = vpop.eup %4754 }
 0xd46   : > { %v3021_v18 = vsel %vm1527_vm6, %v4755_v15, 0.0  ;;  %v4757_v21 = vpop.eup %4756 }
 0xd47   : > { %3022 = vadd.xlane.f32.xlu0 %v3021_v18  ;;  %v3024_v16 = vsel %vm1527_vm6, %v4757_v21, 0.0 }
 0xd49   : > { %4665 = vrot.lane.b32.xlu1 %v5265_v61, %s4834_s26  ;;  %s5536_s26 = sld [smem:[#allocation31_spill]] }
 0xd4f   : > { %p4154_p5 = scmp.ne.s32.totalorder %s5536_s26, 5 }
 0xd50   : > { %vm4847_vm9 = vmmov (!%p4154_p5), 0   ;;  %s5538_s28 = sld [smem:[#allocation27_spill]] (!%p4154_p5)  ;;  %s5539_s1 = sld [smem:[#allocation28_spill]] (!%p4154_p5)  ;;  %vm4528_vm10 = vmpackc.low (!%p4154_p5), %vm1381_vm3, %vm1381_vm3  ;;  %vm3798_vm11 = vcmask (!%p4154_p5), 122880  }
 0xd5d   : > { %4670 = vrot.lane.b32.xlu0 %v5265_v61, %s4841_s6 }
 0xd61   : > { %3120 = vrot.lane.b32.xlu0 %v5282_v10, %s4841_s6 }
 0xd6a   : > { %v2626_v24 = vpop.xlane.xlu1 %2625 }
 0xd6b   : > { %4758 = vrcp.f32 %v2626_v24  ;;  %v2623_v25 = vpop.xlane.xlu0 %2622 }
 0xd6c   : > { %4760 = vrcp.f32 %v2623_v25 }
 0xd6d   : > { %3025 = vadd.xlane.f32.xlu1 %v3024_v16 }
 0xd75   : > { %v4759_v29 = vpop.eup %4758 }
 0xd76   : > { %v4761_v30 = vpop.eup %4760  ;;  %v2630_v31 = vmul.f32 %v4759_v29, %v4747_v50  ;;  %v4703_v29 = vld [vmem:[%s5053_s3 + $0x8] sm:$0xff]  }
 0xd77   : > { %v2629_v17 = vmul.f32 %v4761_v30, %v4749_v51 }
 0xd79   : > { %4366 = vmatprep.mubr.msk.f32.mxu1 %vm1527_vm6, %v2629_v17 }
 0xd7a   : > { %4367 = vmatmul.mubr.msk.f32.vlgmr.msra.gmra.mrb[20].mxu1 %vm1527_vm6, %v2630_v31 }
 0xd7b   : > { %4505 = vmatpush3.bf16.msra.mxu1 %v4502_v13 }
 0xd7e   : > { %3118 = vrot.lane.b32.xlu1 %v5280_v7, %s4841_s6 }
 0xdc5   : > { %v2826_v10 = vpop.xlane.xlu1 %2825 }
 0xdc6   : > { %4762 = vrcp.f32 %v2826_v10  ;;  %v2823_v32 = vpop.xlane.xlu0 %2822 }
 0xdc7   : > { %4764 = vrcp.f32 %v2823_v32 }
 0xdc9   : > { %v4666_v33 = vpop.permute.xlu1 %4665 }
 0xdca   : > { %v4668_v35 = vunpack.i.h.bf16 %v4666_v33  ;;  %v4667_v36 = vunpack.i.l.bf16 %v4666_v33 }
 0xdcc   : > { %v4512_v37 = vpack.c.bf16 %v4668_v35, %v4667_v36 }
 0xdce   : > { %4513 = vmatprep.subr.bf16.mxu1 %v4512_v37 }
 0xdd0   : > { %v4763_v38 = vpop.eup %4762 }
 0xdd1   : > { %v4765_v39 = vpop.eup %4764  ;;  %v2830_v47 = vmul.f32 %v4763_v38, %v4751_v60 }
 0xdd2   : > { %v2829_v46 = vmul.f32 %v4765_v39, %v4753_v63 }
 0xdd4   : > { %v3023_v40 = vpop.xlane.xlu0 %3022  ;;  %4380 = vmatprep.mubr.msk.f32.mxu1 %vm1527_vm6, %v2829_v46 }
 0xdd5   : > { %4766 = vrcp.f32 %v3023_v40  ;;  %4381 = vmatmul.mubr.msk.f32.vlgmr.msra.gmra.mrb[22].mxu1 %vm1527_vm6, %v2830_v47 }
 0xdd6   : > { %4515 = vmatpush3.bf16.msra.mxu1 %v4512_v37 }
 0xdd8   : > { %v4671_v7 = vpop.permute.xlu0 %4670 }
 0xdd9   : > { %v4673_v41 = vunpack.i.h.bf16 %v4671_v7  ;;  %v4672_v42 = vunpack.i.l.bf16 %v4671_v7 }
 0xddb   : > { %v4516_v43 = vpack.c.bf16 %v4673_v41, %v4672_v42 }
 0xddc   : > { %v3121_v27 = vpop.permute.xlu0 %3120 }
 0xddd   : > { %4518 = vmatprep.subr.msk.bf16.mxu1 %vm5124_vm5, %v4516_v43 }
 0xddf   : > { %v4767_v44 = vpop.eup %4766 }
 0xde0   : > { %v3029_v45 = vmul.f32 %v4767_v44, %v4755_v15 }
 0xde2   : > { %4394 = vmatprep.mubr.msk.f32.mxu1 %vm1527_vm6, %v3029_v45  ;;  %v4136_v45 = vld [vmem:[%s1219_s8] ss:$0 sm:$0xff]  ;;  %s5529_s8 = sld [smem:[#allocation23_spill]] }
 0xdfa   : > { %v3026_v48 = vpop.xlane.xlu1 %3025 }
 0xdfb   : > { %4768 = vrcp.f32 %v3026_v48 }
 0xdfe   : > { %v3119_v51 = vpop.permute.xlu1 %3118 }
 0xe05   : > { %v4769_v49 = vpop.eup %4768 }
 0xe06   : > { %v3030_v50 = vmul.f32 %v4769_v49, %v4757_v21 }
 0xe08   : > { %4395 = vmatmul.mubr.msk.f32.vlgmr.msra.gmra.mrb[24].mxu1 %vm1527_vm6, %v3030_v50 }
 0xe09   : > { %4521 = vmatpush3.bf16.xpose.msk.msra.mxu1 %vm5124_vm5, %v4516_v43  ;;  %4401 = vmatprep.mubr.msk.f32.mxu1 %vm1441_vm4, %v3119_v51 }
 0xe0a   : > { %4419 = vmatprep.subr.bf16.mxu1 %v4830_v14 }
 0xe10   : > { %4402 = vmatmul.mubr.msk.f32.vlgmr.msra.gmra.mrb[26].mxu1 %vm1441_vm4, %v3121_v27 }
 0xe11   : > { %4423 = vmatprep.mubr.msk.bf16.mxu1 %vm4831_vm2, %v4830_v14 }
 0xe4d   : > { %v5357_v54 = vpop.f32.mrb[20].mxu1 }
 0xe4e   : > { %v5359_v28 = vpop.f32.mrb[21].mxu1 }
 0xea8   : > { %v4382_v55 = vpop.f32.mrb[22].mxu1 }
 0xea9   : > { %v2909_v56 = vpop.f32.mrb[23].mxu1 }
 0xeaa   : > { %v4679_v57 = vpack.i.bf16 %v4382_v55, %v2909_v56 }
 0xedb   : > { %v4396_v58 = vpop.f32.mrb[24].mxu1 }
 0xedc   : > { %v3109_v34 = vpop.f32.mrb[25].mxu1 }
 0xedd   : > { %v4684_v59 = vpack.i.bf16 %v4396_v58, %v3109_v34 }
 0xee3   : > { %v4403_v26 = vpop.f32.mrb[26].mxu1 }
 0xee4   : > { %v3206_v60 = vadd.f32 %v4403_v26, %v5307_v22  ;;  %v3200_v62 = vpop.f32.mrb[27].mxu1 }
 0xee5   : > { %v3201_v63 = vadd.f32 %v3200_v62, %v5310_v23 }
 0xee6   : > { %v3212_v0 = vsel %vm1527_vm6, %v3206_v60, -inf }
 0xee7   : > { %3213 = vmax.xlane.f32.xlu0 %v3212_v0  ;;  %v3209_v1 = vsel %vm1527_vm6, %v3201_v63, -inf }
 0xee8   : > { %3210 = vmax.xlane.f32.xlu1 %v3209_v1  ;;  %v4704_v1 = vld [vmem:[%s5062_s2] sm:$0xff]  }
 0xee9   : > { %4420 = vmatpush3.bf16.msra.mxu1 %v4704_v1 }
 0xeea   : > { %4421 = vmatprep.subr.bf16.mxu1 %v4830_v14 }
 0xf74   : > { %v3214_v2 = vpop.xlane.xlu0 %3213 }
 0xf75   : > { %v3216_v3 = vsub.f32 %v3206_v60, %v3214_v2  ;;  %v3211_v4 = vpop.xlane.xlu1 %3210  ;;  %v4705_v2 = vld [vmem:[%s5062_s2 + $0x8] sm:$0xff]   ;;  %s5531_s2 = scalar_lea.vmem %s5529_s8, %s5025_s0 }
 0xf76   : > { %v3215_v5 = vsub.f32 %v3201_v63, %v3211_v4  ;;  %4422 = vmatpush3.bf16.msra.mxu1 %v4705_v2  ;;  %v4707_v4 = vld [vmem:[%s5068_s18 + $0x8] sm:$0xff]  }
 0xf77   : > { %v3219_v6 = vmul.f32 1.442695, %v3216_v3  ;;  %v4706_v3 = vld [vmem:[%s5068_s18] sm:$0xff]  }
 0xf78   : > { %v3217_v8 = vmul.f32 1.442695, %v3215_v5 }
 0xf79   : > { %4770 = vpow2.f32 %v3219_v6 }
 0xf7a   : > { %4772 = vpow2.f32 %v3217_v8 }
 0xf83   : > { %v4771_v9 = vpop.eup %4770 }
 0xf84   : > { %v4773_v11 = vpop.eup %4772  ;;  %v3224_v22 = vsel %vm1527_vm6, %v4771_v9, 0.0 }
 0xf85   : > { %3225 = vadd.xlane.f32.xlu1 %v3224_v22  ;;  %v3221_v23 = vsel %vm1527_vm6, %v4773_v11, 0.0 }
 0xf86   : > { %3222 = vadd.xlane.f32.xlu0 %v3221_v23 }
 0xf96   : > { %4680 = vrot.lane.b32.xlu1 %v4679_v57, %s4842_s11 }
 0xf9a   : > { %4685 = vrot.lane.b32.xlu1 %v4684_v59, %s4843_s15 }
 0xf9c   : > { %4675 = vrot.lane.b32.xlu0 %v5265_v61, %s4840_s19  ;;  %v4702_v61 = vld [vmem:[%s5053_s3] sm:$0xff]   ;;  %s5528_s3 = sld [smem:[#allocation21_spill]] }
 0xf9d   : > { %s5540_s19 = sld [smem:[#allocation29_spill]] (!%p4154_p5) }
0x1012   : > { %v3226_v12 = vpop.xlane.xlu1 %3225 }
0x1013   : > { %4774 = vrcp.f32 %v3226_v12  ;;  %v3223_v13 = vpop.xlane.xlu0 %3222  ;;  %v4140_v12 = vld [vmem:[%s1222_s14] ss:$0 sm:$0xff]  ;;  %s5530_s14 = scalar_lea.vmem %s5528_s3, %s5025_s0 }
0x1014   : > { %4776 = vrcp.f32 %v3223_v13 }
0x1016   : > { %v4681_v10 = vpop.permute.xlu1 %4680 }
0x1017   : > { %v4676_v15 = vpop.permute.xlu0 %4675  ;;  %v4683_v33 = vunpack.i.h.bf16 %v4681_v10  ;;  %v4682_v35 = vunpack.i.l.bf16 %v4681_v10 }
0x1018   : > { %v4678_v18 = vunpack.i.h.bf16 %v4676_v15  ;;  %v4677_v19 = vunpack.i.l.bf16 %v4676_v15 }
0x1019   : > { %v3343_v39 = vsel %vm1441_vm4, %v5357_v54, %v4683_v33  ;;  %v3342_v46 = vsel %vm1441_vm4, %v5359_v28, %v4682_v35 }
0x101a   : > { %v4522_v20 = vpack.c.bf16 %v4678_v18, %v4677_v19  ;;  %v4686_v32 = vpop.permute.xlu1 %4685 }
0x101b   : > { %v4688_v36 = vunpack.i.h.bf16 %v4686_v32  ;;  %v4687_v37 = vunpack.i.l.bf16 %v4686_v32 }
0x101c   : > { %4523 = vmatprep.subr.bf16.mxu0 %v4522_v20 }
0x101d   : > { %v4775_v21 = vpop.eup %4774  ;;  %4525 = vmatpush3.bf16.msra.mxu0 %v4522_v20  ;;  %v3344_v7 = vsel %vm1527_vm6, %v3342_v46, %v4687_v37  ;;  %v3345_v41 = vsel %vm1527_vm6, %v3343_v39, %v4688_v36  ;;  %v4141_v20 = vld [vmem:[%s1225_s10] ss:$0 sm:$0xff]  ;;  %s5532_s10 = sld [smem:[#allocation24_spill]] }
0x101e   : > { %v4777_v24 = vpop.eup %4776  ;;  %4411 = vmatprep.subr.bf16.mxu0 %v4830_v14  ;;  %v3230_v16 = vmul.f32 %v4775_v21, %v4771_v9  ;;  %v4146_v39 = vld [vmem:[%s5531_s2] ss:$0 sm:$0xff] }
0x101f   : > { %v3229_v25 = vmul.f32 %v4777_v24, %v4773_v11 }
0x1021   : > { %4408 = vmatprep.mubr.msk.f32.mxu0 %vm1527_vm6, %v3229_v25 }
0x1022   : > { %4409 = vmatmul.mubr.msk.f32.vlgmr.msra.gmra.mrb[18].mxu0 %vm1527_vm6, %v3230_v16 }
0x1023   : > { %4415 = vmatprep.mubr.msk.bf16.mxu0 %vm4831_vm2, %v4830_v14  ;;  %4412 = vmatpush3.bf16.msra.mxu0 %v4702_v61  ;;  %v4708_v61 = vld [vmem:[%s5068_s18 + $0x10] sm:$0xff]   ;;  %s5534_s22 = scalar_lea.vmem %s5532_s10, %s5025_s0 }
0x1024   : > { %4413 = vmatprep.subr.bf16.mxu0 %v4830_v14 }
0x1027   : > { %4414 = vmatpush3.bf16.msra.mxu0 %v4703_v29  ;;  %v4709_v29 = vld [vmem:[%s5068_s18 + $0x18] sm:$0xff]   ;;  %s5533_s18 = sld [smem:[#allocation25_spill]] }
0x1028   : > { %4427 = vmatprep.subr.bf16.mxu0 %v4830_v14 }
0x102d   : > { %s5535_s17 = scalar_lea.vmem %s5533_s18, %s5025_s0  ;;  %s5537_s0 = sld [smem:[#allocation26_spill]] (!%p4154_p5) }
0x102e   : > { %v4153_v1 = vld [vmem:[%s5535_s17] ss:$0 sm:$0xff] }
0x10f5   : > { %v4410_v30 = vpop.f32.mrb[18].mxu0 }
0x10f6   : > { %v3309_v17 = vpop.f32.mrb[19].mxu0 }
0x10f7   : > { %v4689_v31 = vpack.i.bf16 %v4410_v30, %v3309_v17  ;;  %v4142_v30 = vld [vmem:[%s5530_s14] ss:$0 sm:$0xff] }
0x10f9   : > { %4690 = vrot.lane.b32.xlu0 %v4689_v31, %s4845_s13 }
0x116b   : > { %v4691_v38 = vpop.permute.xlu0 %4690 }
0x116c   : > { %v4693_v47 = vunpack.i.h.bf16 %v4691_v38  ;;  %v4692_v40 = vunpack.i.l.bf16 %v4691_v38 }
0x116e   : > { %v3346_v42 = vsel %vm2265_vm7, %v3344_v7, %v4692_v40  ;;  %v3347_v43 = vsel %vm2265_vm7, %v3345_v41, %v4693_v47 }
0x116f   : > { %v3348_v44 = vpack.c.bf16 %v3347_v43, %v3346_v42 }
0x1171   : > { %4416 = vmatmul.mubr.msk.bf16.vlgmr.msra.gmra.mrb[20].mxu0 %vm1381_vm3, %v3348_v44 }
0x1172   : > { %4435 = vmatprep.mubr.msk.bf16.mxu0 %vm4831_vm2, %v4830_v14  ;;  %4428 = vmatpush3.bf16.msra.mxu0 %v4706_v3 }
0x1173   : > { %4429 = vmatprep.subr.bf16.mxu0 %v4830_v14 }
0x1176   : > { %4430 = vmatpush3.bf16.msra.mxu0 %v4707_v4 }
0x1177   : > { %4431 = vmatprep.subr.bf16.mxu0 %v4830_v14 }
0x117a   : > { %4432 = vmatpush3.bf16.msra.mxu0 %v4708_v61  ;;  %v4849_v61 = vmov (!%p4154_p5), 0  }
0x117b   : > { %4433 = vmatprep.subr.bf16.mxu0 %v4830_v14  ;;  %4786 = vset.pattern.permute.xlu0 (!%p4154_p5), %v4849_v61 }
0x117e   : > { %4434 = vmatpush3.bf16.msra.mxu0 %v4709_v29 }
0x1244   : > { %v3404_v48 = vpop.f32.mrb[20].mxu0 }
0x1245   : > { %v3405_v49 = vadd.f32 %v4136_v45, %v3404_v48  ;;  %v4417_v50 = vpop.f32.mrb[21].mxu0 }
0x1246   : > { %v3407_v51 = vpop.f32.mrb[22].mxu0 }
0x1247   : > { %v3408_v27 = vadd.f32 %v4136_v45, %v3407_v51  ;;  %v4418_v54 = vpop.f32.mrb[23].mxu0  ;;  %v3411_v28 = vadd.f32 %v3405_v49, %v5255_v52 }
0x1249   : > { %v3415_v55 = vsel %vm1381_vm3, %v3411_v28, 0.0  ;;  %v3412_v56 = vadd.f32 %v3408_v27, %v5257_v53 }
0x124a   : > { %3416 = vadd.xlane.f32.xlu1 %v3415_v55 }
0x124b   : > { %v3418_v57 = vsel %vm1381_vm3, %v3412_v56, 0.0 }
0x124c   : > { %3419 = vadd.xlane.f32.xlu0 %v3418_v57 }
0x12d7   : > { %v3417_v58 = vpop.xlane.xlu1 %3416 }
0x12d8   : > { %v3421_v34 = vmul.f32 0.03125, %v3417_v58 }
0x12d9   : > { %v3420_v59 = vpop.xlane.xlu0 %3419 }
0x12da   : > { %v3423_v26 = vsub.f32 %v3411_v28, %v3421_v34  ;;  %v3422_v60 = vmul.f32 0.03125, %v3420_v59 }
0x12dc   : > { %v3424_v62 = vsub.f32 %v3412_v56, %v3422_v60  ;;  %v3425_v63 = vmul.f32 %v3423_v26, %v3423_v26 }
0x12de   : > { %v3427_v52 = vsel %vm1381_vm3, %v3425_v63, 0.0  ;;  %v3426_v0 = vmul.f32 %v3424_v62, %v3424_v62 }
0x12df   : > { %3428 = vadd.xlane.f32.xlu0 %v3427_v52  ;;  %v4152_v52 = vld [vmem:[%s5534_s22] ss:$0 sm:$0xff] }
0x12e0   : > { %v3430_v53 = vsel %vm1381_vm3, %v3426_v0, 0.0 }
0x12e1   : > { %3431 = vadd.xlane.f32.xlu1 %v3430_v53 }
0x136c   : > { %v3429_v5 = vpop.xlane.xlu0 %3428 }
0x136d   : > { %v3433_v6 = vmul.f32 0.03125, %v3429_v5 }
0x136e   : > { %v3432_v8 = vpop.xlane.xlu1 %3431 }
0x136f   : > { %v3435_v9 = vadd.f32 1e-05, %v3433_v6  ;;  %v3434_v11 = vmul.f32 0.03125, %v3432_v8 }
0x1371   : > { %4778 = vrsqrt.f32 %v3435_v9  ;;  %v3436_v22 = vadd.f32 1e-05, %v3434_v11 }
0x1373   : > { %4780 = vrsqrt.f32 %v3436_v22 }
0x137b   : > { %v4779_v23 = vpop.eup %4778 }
0x137c   : > { %v3439_v13 = vmul.f32 %v4779_v23, %v3423_v26 }
0x137d   : > { %v4781_v15 = vpop.eup %4780 }
0x137e   : > { %v3447_v18 = vmul.f32 %v4140_v12, %v3439_v13  ;;  %v3440_v19 = vmul.f32 %v4781_v15, %v3424_v62 }
0x1380   : > { %v3448_v21 = vmul.f32 %v4140_v12, %v3440_v19  ;;  %v3455_v24 = vadd.f32 %v4141_v20, %v3447_v18 }
0x1382   : > { %v3456_v25 = vadd.f32 %v4141_v20, %v3448_v21 }
0x1384   : > { %v3457_v16 = vpack.c.bf16 %v3456_v25, %v3455_v24 }
0x1386   : > { %4424 = vmatmul.mubr.msk.bf16.vlgmr.msra.gmra.mrb[28].mxu1 %vm1381_vm3, %v3457_v16  ;;  %v3709_v16 = vld [vmem:[#allocation3] sm:$0x1] (!%p4154_p5) }
0x1459   : > { %v3518_v17 = vpop.f32.mrb[28].mxu1 }
0x145a   : > { %v3519_v31 = vadd.f32 %v4142_v30, %v3518_v17  ;;  %v4425_v10 = vpop.f32.mrb[29].mxu1 }
0x145b   : > { %v3521_v32 = vpop.f32.mrb[30].mxu1 }
0x145c   : > { %v3522_v33 = vadd.f32 %v4142_v30, %v3521_v32  ;;  %v4426_v35 = vpop.f32.mrb[31].mxu1  ;;  %v3525_v36 = vmax.f32 %v3519_v31, 0.0 }
0x145e   : > { %v3526_v37 = vmax.f32 %v3522_v33, 0.0 }
0x1460   : > { %v3527_v38 = vpack.c.bf16 %v3526_v37, %v3525_v36  ;;  %v4155_v36 = vld [vmem:[%s5537_s0] ss:$0 sm:$0xff] (!%p4154_p5) }
0x1462   : > { %4436 = vmatmul.mubr.msk.bf16.vlgmr.msra.gmra.mrb[24].mxu0 %vm3567_vm8, %v3527_v38 }
0x1535   : > { %v3605_v46 = vpop.f32.mrb[24].mxu0 }
0x1536   : > { %v3606_v47 = vadd.f32 %v4146_v39, %v3605_v46  ;;  %v4437_v14 = vpop.f32.mrb[25].mxu0  ;;  %v4156_v46 = vld [vmem:[%s5538_s28] ss:$0 sm:$0xff] (!%p4154_p5) }
0x1537   : > { %v3608_v40 = vpop.f32.mrb[26].mxu0 }
0x1538   : > { %v3609_v7 = vadd.f32 %v4146_v39, %v3608_v40  ;;  %v4438_v41 = vpop.f32.mrb[27].mxu0  ;;  %v3612_v42 = vadd.f32 %v3606_v47, %v3455_v24  ;;  %v4846_v24 = vmov (!%p4154_p5), 0.0|0.0  }
0x1539   : > { %4526 = vmatprep.subr.bf16.mxu0 (!%p4154_p5), %v4846_v24  ;;  %v3708_v41 = vld [vmem:[%s5539_s1] sm:$0x1] (!%p4154_p5) }
0x153a   : > { %v3616_v43 = vsel %vm1381_vm3, %v3612_v42, 0.0  ;;  %v3613_v44 = vadd.f32 %v3609_v7, %v3456_v25  ;;  %v4848_v25 = vmov (!%p4154_p5), 0.0  }
0x153b   : > { %3617 = vadd.xlane.f32.xlu0 %v3616_v43  ;;  %4443 = vmatprep.mubr.msk.f32.mxu0 (!%p4154_p5), %vm4847_vm9, %v4848_v25 }
0x153c   : > { %v3619_v45 = vsel %vm1381_vm3, %v3613_v44, 0.0 }
0x153d   : > { %3620 = vadd.xlane.f32.xlu1 %v3619_v45 }
0x15c8   : > { %v3618_v48 = vpop.xlane.xlu0 %3617 }
0x15c9   : > { %v3622_v49 = vmul.f32 0.03125, %v3618_v48 }
0x15ca   : > { %v3621_v50 = vpop.xlane.xlu1 %3620 }
0x15cb   : > { %v3624_v51 = vsub.f32 %v3612_v42, %v3622_v49  ;;  %v3623_v27 = vmul.f32 0.03125, %v3621_v50  ;;  %v3715_v42 = vlaneseq (!%p4154_p5) }
0x15cd   : > { %v3625_v54 = vsub.f32 %v3613_v44, %v3623_v27  ;;  %v3626_v28 = vmul.f32 %v3624_v51, %v3624_v51  ;;  %v3716_v43 = vshrl.u32 (!%p4154_p5), %v3715_v42, 7 }
0x15cf   : > { %v3628_v55 = vsel %vm1381_vm3, %v3626_v28, 0.0  ;;  %v3627_v56 = vmul.f32 %v3625_v54, %v3625_v54  ;;  %v3717_v44 = vsub.s32 (!%p4154_p5), 0, %v3716_v43 }
0x15d0   : > { %3629 = vadd.xlane.f32.xlu0 %v3628_v55 }
0x15d1   : > { %v3631_v57 = vsel %vm1381_vm3, %v3627_v56, 0.0 }
0x15d2   : > { %3632 = vadd.xlane.f32.xlu1 %v3631_v57 }
0x165d   : > { %v3630_v58 = vpop.xlane.xlu0 %3629 }
0x165e   : > { %v3634_v34 = vmul.f32 0.03125, %v3630_v58 }
0x165f   : > { %v3633_v59 = vpop.xlane.xlu1 %3632 }
0x1660   : > { %v3636_v26 = vadd.f32 1e-05, %v3634_v34  ;;  %v3635_v60 = vmul.f32 0.03125, %v3633_v59 }
0x1662   : > { %4782 = vrsqrt.f32 %v3636_v26  ;;  %v3637_v62 = vadd.f32 1e-05, %v3635_v60 }
0x1664   : > { %4784 = vrsqrt.f32 %v3637_v62 }
0x166c   : > { %v4783_v63 = vpop.eup %4782 }
0x166d   : > { %v3640_v0 = vmul.f32 %v4783_v63, %v3624_v51 }
0x166e   : > { %v4785_v53 = vpop.eup %4784 }
0x166f   : > { %v3648_v2 = vmul.f32 %v4152_v52, %v3640_v0  ;;  %v3641_v3 = vmul.f32 %v4785_v53, %v3625_v54  ;;  %3663 = sbr.rel (%p4154_p5) target bundleno = 6288 (0x1890), region = 152 }
0x1671   : > { %v3656_v4 = vadd.f32 %v4153_v1, %v3648_v2  ;;  %v3649_v5 = vmul.f32 %v4152_v52, %v3641_v3 }
0x1673   : > { %3658 = vst.msk [vmem:[#allocation2] sm:$0xff] %vm1381_vm3, %v3656_v4  ;;  %v3657_v6 = vadd.f32 %v4153_v1, %v3649_v5  ;;  %v3666_v8 = vsel (!%p4154_p5), %vm1381_vm3, %v3656_v4, 0.0 }
0x1674   : > { %3667 = vadd.xlane.f32.xlu0 (!%p4154_p5), %v3666_v8 }
0x1675   : > { %3659 = vst.msk [vmem:[#allocation2 + $0x8] sm:$0xff] %vm1381_vm3, %v3657_v6  ;;  %v3669_v9 = vsel (!%p4154_p5), %vm1381_vm3, %v3657_v6, 0.0 }
0x1678   : > { %3670 = vadd.xlane.f32.xlu0 %v3669_v9 }
0x168e   : > { %3712 = vperm.xlu0 %4786, %v3709_v16  }
0x1701   : > { %v3668_v11 = vpop.xlane.xlu0 %3667 }
0x1702   : > { %v3672_v22 = vmul.f32 0.03125, %v3668_v11 }
0x1704   : > { %v3674_v23 = vsub.f32 %v3656_v4, %v3672_v22 }
0x1705   : > { %v3671_v12 = vpop.xlane.xlu0 %3670 }
0x1706   : > { %v3673_v13 = vmul.f32 0.03125, %v3671_v12  ;;  %v3676_v15 = vmul.f32 %v3674_v23, %v3674_v23 }
0x1708   : > { %v3675_v18 = vsub.f32 %v3657_v6, %v3673_v13  ;;  %v3678_v19 = vsel %vm1381_vm3, %v3676_v15, 0.0 }
0x1709   : > { %3679 = vadd.xlane.f32.xlu1 %v3678_v19 }
0x170a   : > { %v3677_v20 = vmul.f32 %v3675_v18, %v3675_v18 }
0x170c   : > { %v3681_v21 = vsel %vm1381_vm3, %v3677_v20, 0.0 }
0x170d   : > { %3682 = vadd.xlane.f32.xlu1 %v3681_v21  ;;  %v3713_v45 = vpop.permute.xlu0 %3712 }
0x170e   : > { %v3718_v48 = vrot.slane %v3713_v45, %v3717_v44 }
0x1796   : > { %v3680_v29 = vpop.xlane.xlu1 %3679 }
0x1797   : > { %v3684_v30 = vmul.f32 0.03125, %v3680_v29 }
0x1799   : > { %v3686_v17 = vadd.f32 1e-05, %v3684_v30 }
0x179a   : > { %v3683_v31 = vpop.xlane.xlu1 %3682 }
0x179b   : > { %4787 = vrsqrt.f32 %v3686_v17  ;;  %v3685_v10 = vmul.f32 0.03125, %v3683_v31 }
0x179d   : > { %v3687_v32 = vadd.f32 1e-05, %v3685_v10 }
0x179f   : > { %4789 = vrsqrt.f32 %v3687_v32 }
0x17a5   : > { %v4788_v33 = vpop.eup %4787 }
0x17a6   : > { %v3690_v35 = vmul.f32 %v4788_v33, %v3674_v23 }
0x17a8   : > { %v3698_v39 = vmul.f32 %v4155_v36, %v3690_v35 }
0x17a9   : > { %v4790_v37 = vpop.eup %4789 }
0x17aa   : > { %v3691_v38 = vmul.f32 %v4790_v37, %v3675_v18  ;;  %v3706_v14 = vadd.f32 %v4156_v46, %v3698_v39 }
0x17ac   : > { %v3699_v47 = vmul.f32 %v4155_v36, %v3691_v38 }
0x17ae   : > { %v3707_v40 = vadd.f32 %v4156_v46, %v3699_v47 }
0x17b0   : > { %v4527_v7 = vpack.c.bf16 %v3707_v40, %v3706_v14 }
0x17b2   : > { %4529 = vmatpush3.bf16.xpose.msk.msra.mxu0 %vm4528_vm10, %v4527_v7 }
0x17b9   : > { %4444 = vmatmul.mubr.msk.f32.vlgmr.msra.gmra.mrb[0].mxu0 %vm1381_vm3, %v3708_v41 }
0x188c   : > { %v3794_v49 = vpop.f32.mrb[0].mxu0 }
0x188d   : > { %v3795_v50 = vadd.f32 %v3794_v49, %v3718_v48  ;;  %v4445_v51 = vpop.f32.mrb[1].mxu0 }
0x188f   : > { %3799 = vst.msk [vmem:[%s5540_s19] sm:$0x1] %vm3798_vm11, %v3795_v50 }
0x1890 PF: > { %s5541_s6 = sld [smem:[#allocation30_spill]] }
0x1896   : > { %s75_s22 = sadd.s32 1, %s5541_s6  }
0x1897   : > { %p72_p6 = scmp.ge.s32.totalorder %s75_s22, 8  }
0x1899   :  { %74 = sbr.rel (!%p72_p6) target bundleno = 67 (0x43), region = 266 }

</bundles_post_ra>
